<compile_context>
chip_gen: v5e
topology: v5e:2x2
jax: 0.10.0
libtpu: 0.0.40
codegen_flags: <defaults>
</compile_context>

<pallas_src>
import functools
import numpy as np

import jax
import jax.numpy as jnp
from jax import lax
from jax.experimental import pallas as pl
from jax.experimental.pallas import tpu as pltpu


_VMEM_LIMIT = 32 * 1024 * 1024  # within scoped/physical budgets on v5e/v6e/v7x


def _cparams(dim_semantics):
    return pltpu.CompilerParams(dimension_semantics=dim_semantics,
                                vmem_limit_bytes=_VMEM_LIMIT)


def _pick_tile(dim, cap, step):
    """Largest multiple of `step` <= cap that divides `dim`; fallback = dim."""
    t = (min(cap, dim) // step) * step
    while t >= step:
        if dim % t == 0:
            return t
        t -= step
    return dim


def _row_tile(m, cap=256):
    """Row tile; prefers >= 2 blocks so both v7x TensorCores get work."""
    if m >= 16:
        cap = min(cap, max(8, m // 2))
    return _pick_tile(m, cap, 8)


# ----------------------------------------------------------------------------
# In-kernel math helpers
# ----------------------------------------------------------------------------

def _ln(y, g, b, eps):
    mean = jnp.mean(y, axis=-1, keepdims=True)
    var = jnp.mean(jnp.square(y - mean), axis=-1, keepdims=True)
    return (y - mean) * lax.rsqrt(var + eps) * g + b


def _mha_out_proj(q, k, v, wo, nhead, scale):
    """Multi-head SDPA fused with the output projection.

    q:(Sq,E), k,v:(Sk,E) f32 values; wo:(E,E) bf16 value.
    Returns sum_h softmax(q_h k_h^T * scale) v_h @ Wo[h*dh:(h+1)*dh, :]  (Sq,E) f32.
    No concatenate, no scratch: each head's contribution is accumulated
    straight through its slice of the output projection.
    """
    sq, e = q.shape
    dh = e // nhead
    proj = jnp.zeros((sq, e), jnp.float32)
    for h in range(nhead):                        # static unroll; nhead is small
        lo = h * dh
        qh = (q[:, lo:lo + dh] * scale).astype(jnp.bfloat16)  # scale folded into q
        kh = k[:, lo:lo + dh].astype(jnp.bfloat16)
        vh = v[:, lo:lo + dh].astype(jnp.bfloat16)
        # contract last dims of both (no k.T / XLU transpose)
        s = lax.dot_general(qh, kh, (((1,), (1,)), ((), ())),
                            preferred_element_type=jnp.float32)
        m = jnp.max(s, axis=-1, keepdims=True)
        p = jnp.exp(s - m)
        l = jnp.sum(p, axis=-1, keepdims=True)
        pv = jnp.dot(p.astype(jnp.bfloat16), vh,
                     preferred_element_type=jnp.float32)
        pv = pv * pl.reciprocal(l, approx=True)   # normalize after the PV matmul
        proj = proj + jnp.dot(pv.astype(jnp.bfloat16), wo[lo:lo + dh, :],
                              preferred_element_type=jnp.float32)
    return proj


# ----------------------------------------------------------------------------
# Fused self-attention sublayer:  LN(x + MHA(x) @ Wo)
# ----------------------------------------------------------------------------

def _self_attn_ln_kernel(x_ref, wqkv_ref, bqkv_ref, wo_ref, bo_ref,
                         g_ref, be_ref, o_ref, *, nhead, scale, eps):
    x = x_ref[0].astype(jnp.float32)                         # (S, E)
    e = x.shape[-1]
    qkv = jnp.dot(x.astype(jnp.bfloat16), wqkv_ref[...],
                  preferred_element_type=jnp.float32)
    qkv = qkv + bqkv_ref[...].astype(jnp.float32)            # (S, 3E)
    proj = _mha_out_proj(qkv[:, :e], qkv[:, e:2 * e], qkv[:, 2 * e:],
                         wo_ref[...], nhead, scale)
    y = x + proj + bo_ref[...].astype(jnp.float32)
    o_ref[0] = _ln(y, g_ref[...].astype(jnp.float32),
                   be_ref[...].astype(jnp.float32), eps).astype(o_ref.dtype)


def self_attn_sublayer(x, p, ln_w, ln_b, nhead, eps=1e-5):
    """x: (B, S, E) batch-first -> (B, S, E). One grid step per batch element."""
    B, S, E = x.shape
    scale = 1.0 / float(np.sqrt(E // nhead))
    return pl.pallas_call(
        functools.partial(_self_attn_ln_kernel, nhead=nhead, scale=scale, eps=eps),
        out_shape=jax.ShapeDtypeStruct((B, S, E), x.dtype),
        grid=(B,),
        in_specs=[
            pl.BlockSpec((1, S, E), lambda b: (b, 0, 0)),
            pl.BlockSpec((E, 3 * E), lambda b: (0, 0)),
            pl.BlockSpec((1, 3 * E), lambda b: (0, 0)),
            pl.BlockSpec((E, E), lambda b: (0, 0)),
            pl.BlockSpec((1, E), lambda b: (0, 0)),
            pl.BlockSpec((1, E), lambda b: (0, 0)),
            pl.BlockSpec((1, E), lambda b: (0, 0)),
        ],
        out_specs=pl.BlockSpec((1, S, E), lambda b: (b, 0, 0)),
        compiler_params=_cparams(("parallel",)),
    )(x, p["wqkv"], p["bqkv"].reshape(1, -1), p["wo"], p["bo"].reshape(1, -1),
      ln_w.reshape(1, -1), ln_b.reshape(1, -1))


# ----------------------------------------------------------------------------
# Fused cross-attention sublayer:  LN(x + MHA(x, mem) @ Wo)
# ----------------------------------------------------------------------------

def _cross_attn_ln_kernel(x_ref, mem_ref, wq_ref, bq_ref, wkv_ref, bkv_ref,
                          wo_ref, bo_ref, g_ref, be_ref, o_ref,
                          *, nhead, scale, eps):
    x = x_ref[0].astype(jnp.float32)                         # (Sq, E)
    mem = mem_ref[0].astype(jnp.float32)                     # (Sk, E)
    e = x.shape[-1]
    q = jnp.dot(x.astype(jnp.bfloat16), wq_ref[...],
                preferred_element_type=jnp.float32) + bq_ref[...].astype(jnp.float32)
    kv = jnp.dot(mem.astype(jnp.bfloat16), wkv_ref[...],
                 preferred_element_type=jnp.float32) + bkv_ref[...].astype(jnp.float32)
    proj = _mha_out_proj(q, kv[:, :e], kv[:, e:], wo_ref[...], nhead, scale)
    y = x + proj + bo_ref[...].astype(jnp.float32)
    o_ref[0] = _ln(y, g_ref[...].astype(jnp.float32),
                   be_ref[...].astype(jnp.float32), eps).astype(o_ref.dtype)


def cross_attn_sublayer(x, memory, p, ln_w, ln_b, nhead, eps=1e-5):
    B, Sq, E = x.shape
    Sk = memory.shape[1]
    scale = 1.0 / float(np.sqrt(E // nhead))
    return pl.pallas_call(
        functools.partial(_cross_attn_ln_kernel, nhead=nhead, scale=scale, eps=eps),
        out_shape=jax.ShapeDtypeStruct((B, Sq, E), x.dtype),
        grid=(B,),
        in_specs=[
            pl.BlockSpec((1, Sq, E), lambda b: (b, 0, 0)),
            pl.BlockSpec((1, Sk, E), lambda b: (b, 0, 0)),
            pl.BlockSpec((E, E), lambda b: (0, 0)),
            pl.BlockSpec((1, E), lambda b: (0, 0)),
            pl.BlockSpec((E, 2 * E), lambda b: (0, 0)),
            pl.BlockSpec((1, 2 * E), lambda b: (0, 0)),
            pl.BlockSpec((E, E), lambda b: (0, 0)),
            pl.BlockSpec((1, E), lambda b: (0, 0)),
            pl.BlockSpec((1, E), lambda b: (0, 0)),
            pl.BlockSpec((1, E), lambda b: (0, 0)),
        ],
        out_specs=pl.BlockSpec((1, Sq, E), lambda b: (b, 0, 0)),
        compiler_params=_cparams(("parallel",)),
    )(x, memory, p["wq"], p["bq"].reshape(1, -1),
      p["wkv"], p["bkv"].reshape(1, -1),
      p["wo"], p["bo"].reshape(1, -1),
      ln_w.reshape(1, -1), ln_b.reshape(1, -1))


# ----------------------------------------------------------------------------
# Fused FFN sublayer:  LN(x + relu(x @ W1 + b1) @ W2 + b2)
# ----------------------------------------------------------------------------

def _ffn_ln_kernel(x_ref, w1_ref, b1_ref, w2_ref, b2_ref, g_ref, be_ref, o_ref,
                   *, eps):
    x = x_ref[...].astype(jnp.float32)
    h = jnp.dot(x.astype(jnp.bfloat16), w1_ref[...],
                preferred_element_type=jnp.float32) + b1_ref[...].astype(jnp.float32)
    h = jnp.maximum(h, 0.0)                      # intermediate never leaves VMEM
    y = jnp.dot(h.astype(jnp.bfloat16), w2_ref[...],
                preferred_element_type=jnp.float32) + b2_ref[...].astype(jnp.float32)
    y = y + x
    o_ref[...] = _ln(y, g_ref[...].astype(jnp.float32),
                     be_ref[...].astype(jnp.float32), eps).astype(o_ref.dtype)


def ffn_sublayer(x2d, p, ln_w, ln_b, eps=1e-5):
    """x2d: (M, E) with M = B*S (free reshape of the batch-first activation)."""
    M, E = x2d.shape
    F = p["w1"].shape[1]
    tm = _row_tile(M)
    return pl.pallas_call(
        functools.partial(_ffn_ln_kernel, eps=eps),
        out_shape=jax.ShapeDtypeStruct((M, E), x2d.dtype),
        grid=(M // tm,),
        in_specs=[
            pl.BlockSpec((tm, E), lambda i: (i, 0)),
            pl.BlockSpec((E, F), lambda i: (0, 0)),
            pl.BlockSpec((1, F), lambda i: (0, 0)),
            pl.BlockSpec((F, E), lambda i: (0, 0)),
            pl.BlockSpec((1, E), lambda i: (0, 0)),
            pl.BlockSpec((1, E), lambda i: (0, 0)),
            pl.BlockSpec((1, E), lambda i: (0, 0)),
        ],
        out_specs=pl.BlockSpec((tm, E), lambda i: (i, 0)),
        compiler_params=_cparams(("parallel",)),
    )(x2d, p["w1"], p["b1"].reshape(1, -1), p["w2"], p["b2"].reshape(1, -1),
      ln_w.reshape(1, -1), ln_b.reshape(1, -1))


# ----------------------------------------------------------------------------
# Standalone LayerNorm (encoder final norm)
# ----------------------------------------------------------------------------

def _ln_kernel(x_ref, g_ref, b_ref, o_ref, *, eps):
    o_ref[...] = _ln(x_ref[...].astype(jnp.float32),
                     g_ref[...].astype(jnp.float32),
                     b_ref[...].astype(jnp.float32), eps).astype(o_ref.dtype)


def layernorm(x2d, gamma, beta, eps=1e-5):
    M, E = x2d.shape
    tm = _row_tile(M, cap=1024)
    return pl.pallas_call(
        functools.partial(_ln_kernel, eps=eps),
        out_shape=jax.ShapeDtypeStruct((M, E), x2d.dtype),
        grid=(M // tm,),
        in_specs=[pl.BlockSpec((tm, E), lambda i: (i, 0)),
                  pl.BlockSpec((1, E), lambda i: (0, 0)),
                  pl.BlockSpec((1, E), lambda i: (0, 0))],
        out_specs=pl.BlockSpec((tm, E), lambda i: (i, 0)),
        compiler_params=_cparams(("parallel",)),
    )(x2d, gamma.reshape(1, -1), beta.reshape(1, -1))


# ----------------------------------------------------------------------------
# Fused final projection:  LN(x) @ W + b   (decoder final norm + vocab fc)
# ----------------------------------------------------------------------------

def _ln_linear_kernel(x_ref, g_ref, bln_ref, w_ref, b_ref, o_ref, *, eps):
    x = _ln(x_ref[...].astype(jnp.float32), g_ref[...].astype(jnp.float32),
            bln_ref[...].astype(jnp.float32), eps)
    y = jnp.dot(x.astype(jnp.bfloat16), w_ref[...],
                preferred_element_type=jnp.float32) + b_ref[...].astype(jnp.float32)
    o_ref[...] = y.astype(o_ref.dtype)


def ln_linear(x2d, ln_w, ln_b, w, b, eps=1e-5):
    """x2d:(M,K) f32, w:(K,N) bf16 pre-transposed. K kept whole per block
    (fast path — every contraction in this model fits a single k-tile)."""
    M, K = x2d.shape
    N = w.shape[1]
    tm = _row_tile(M, cap=512)
    step = 256 if N % 256 == 0 else 128          # 256-aligned tn for v6e/v7x MXU
    tn = _pick_tile(N, 512, step)
    cost = pl.CostEstimate(flops=2 * M * N * K + 10 * M * K, transcendentals=0,
                           bytes_accessed=4 * M * K + 2 * K * N + 4 * M * N + 4 * N)
    return pl.pallas_call(
        functools.partial(_ln_linear_kernel, eps=eps),
        out_shape=jax.ShapeDtypeStruct((M, N), x2d.dtype),
        grid=(M // tm, N // tn),
        in_specs=[
            pl.BlockSpec((tm, K), lambda i, j: (i, 0)),
            pl.BlockSpec((1, K), lambda i, j: (0, 0)),
            pl.BlockSpec((1, K), lambda i, j: (0, 0)),
            pl.BlockSpec((K, tn), lambda i, j: (0, j)),
            pl.BlockSpec((1, tn), lambda i, j: (0, j)),
        ],
        out_specs=pl.BlockSpec((tm, tn), lambda i, j: (i, j)),
        compiler_params=_cparams(("parallel", "parallel")),
        cost_estimate=cost,
    )(x2d, ln_w.reshape(1, -1), ln_b.reshape(1, -1), w, b.reshape(1, N))


# ----------------------------------------------------------------------------
# Transformer layers (post-norm, batch-first activations)
# ----------------------------------------------------------------------------

def encoder_layer(x, p, nhead):
    B, S, E = x.shape
    x = self_attn_sublayer(x, p["self_attn"], p["norm1_w"], p["norm1_b"], nhead)
    x = ffn_sublayer(x.reshape(B * S, E), p["ffn"], p["norm2_w"], p["norm2_b"])
    return x.reshape(B, S, E)


def decoder_layer(x, memory, p, nhead):
    B, S, E = x.shape
    x = self_attn_sublayer(x, p["self_attn"], p["norm1_w"], p["norm1_b"], nhead)
    x = cross_attn_sublayer(x, memory, p["cross_attn"],
                            p["norm2_w"], p["norm2_b"], nhead)
    x = ffn_sublayer(x.reshape(B * S, E), p["ffn"], p["norm3_w"], p["norm3_b"])
    return x.reshape(B, S, E)


def transformer_forward(params, src, tgt, nhead):
    """src, tgt: (S, B) int32 token ids -> (S_tgt, B, vocab) f32 logits."""
    emb = params["embedding"]
    pe = params["pe"]                                   # (max_len, E)

    # Batch-first internal layout (only the tiny id transpose and the final
    # logits transpose touch the seq-first boundary layout).
    # Reference module does NOT scale embeddings by sqrt(d_model).
    src_e = jnp.take(emb, src.T, axis=0) + pe[: src.shape[0]]     # (B, Ss, E)
    tgt_e = jnp.take(emb, tgt.T, axis=0) + pe[: tgt.shape[0]]     # (B, St, E)
    # TODO(synk): dropout (p=0.1) treated as eval-mode identity.

    # encoder
    memory = src_e
    for lp in params["encoder_layers"]:
        memory = encoder_layer(memory, lp, nhead)
    B, Ss, E = memory.shape
    memory = layernorm(memory.reshape(B * Ss, E),
                       params["encoder_norm_w"],
                       params["encoder_norm_b"]).reshape(B, Ss, E)

    # decoder (no masks passed in the reference -> no causal mask)
    out = tgt_e
    for lp in params["decoder_layers"]:
        out = decoder_layer(out, memory, lp, nhead)
    St = out.shape[1]

    # decoder final LayerNorm fused into the vocab projection
    logits = ln_linear(out.reshape(B * St, E),
                       params["decoder_norm_w"], params["decoder_norm_b"],
                       params["fc_w"], params["fc_b"])
    return logits.reshape(B, St, -1).transpose(1, 0, 2)           # (St, B, V)


# ----------------------------------------------------------------------------
# Deterministic parameter init (pre-transposed (in,out), bf16 MXU weights)
# ----------------------------------------------------------------------------

def make_positional_encoding(d_model, max_len=5000):
    position = np.arange(max_len, dtype=np.float32)[:, None]
    div_term = np.exp(np.arange(0, d_model, 2, dtype=np.float32)
                      * (-np.log(10000.0) / d_model))
    pe = np.zeros((max_len, d_model), dtype=np.float32)
    pe[:, 0::2] = np.sin(position * div_term)
    pe[:, 1::2] = np.cos(position * div_term)
    return jnp.asarray(pe)                              # (max_len, E)


def init_params(key, vocab_size, d_model, nhead, n_enc, n_dec, dff):
    keys = iter(jax.random.split(key, 512))

    def w(shape, scale=0.02):
        # MXU-path weights live in bf16; vector math stays f32 in-kernel.
        return (scale * jax.random.normal(next(keys), shape)).astype(jnp.bfloat16)

    def zeros(shape):
        return jnp.zeros(shape, jnp.float32)

    def ones(shape):
        return jnp.ones(shape, jnp.float32)

    def self_attn():
        return {"wqkv": w((d_model, 3 * d_model)), "bqkv": zeros((3 * d_model,)),
                "wo": w((d_model, d_model)), "bo": zeros((d_model,))}

    def cross_attn():
        return {"wq": w((d_model, d_model)), "bq": zeros((d_model,)),
                "wkv": w((d_model, 2 * d_model)), "bkv": zeros((2 * d_model,)),
                "wo": w((d_model, d_model)), "bo": zeros((d_model,))}

    def ffn():
        return {"w1": w((d_model, dff)), "b1": zeros((dff,)),
                "w2": w((dff, d_model)), "b2": zeros((d_model,))}

    def enc_layer():
        return {"self_attn": self_attn(), "ffn": ffn(),
                "norm1_w": ones((d_model,)), "norm1_b": zeros((d_model,)),
                "norm2_w": ones((d_model,)), "norm2_b": zeros((d_model,))}

    def dec_layer():
        d = enc_layer()
        d["cross_attn"] = cross_attn()
        d["norm3_w"] = ones((d_model,))
        d["norm3_b"] = zeros((d_model,))
        return d

    return {
        "embedding": jax.random.normal(next(keys),
                                       (vocab_size, d_model)).astype(jnp.float32),
        "pe": make_positional_encoding(d_model),
        "encoder_layers": [enc_layer() for _ in range(n_enc)],
        "decoder_layers": [dec_layer() for _ in range(n_dec)],
        "encoder_norm_w": ones((d_model,)), "encoder_norm_b": zeros((d_model,)),
        "decoder_norm_w": ones((d_model,)), "decoder_norm_b": zeros((d_model,)),
        "fc_w": w((d_model, vocab_size)), "fc_b": zeros((vocab_size,)),
    }


# ----------------------------------------------------------------------------
# Driver
# ----------------------------------------------------------------------------

if __name__ == "__main__":
    # Small but lane-aligned shapes (E, dff, vocab multiples of 128).
    VOCAB = 256
    D_MODEL = 128
    NHEAD = 4
    N_ENC = 2
    N_DEC = 2
    DFF = 256
    SEQ_SRC = 8
    SEQ_TGT = 8
    BATCH = 2

    key = jax.random.PRNGKey(0)
    k_params, k_src, k_tgt = jax.random.split(key, 3)

    params = init_params(k_params, VOCAB, D_MODEL, NHEAD, N_ENC, N_DEC, DFF)

    # Token ids are (S, B), seq-first like PyTorch nn.Transformer default.
    src = jax.random.randint(k_src, (SEQ_SRC, BATCH), 0, VOCAB, dtype=jnp.int32)
    tgt = jax.random.randint(k_tgt, (SEQ_TGT, BATCH), 0, VOCAB, dtype=jnp.int32)

    fwd = jax.jit(functools.partial(transformer_forward, nhead=NHEAD))
    logits = fwd(params, src, tgt)
    jax.block_until_ready(logits)

    assert logits.shape == (SEQ_TGT, BATCH, VOCAB), logits.shape
    assert bool(jnp.all(jnp.isfinite(logits)))
    print("KERNEL_OK")
</pallas_src>

<mosaic_0001>
module attributes {stable_mosaic.version = 11 : i64} {
  func.func @_cross_attn_ln_kernel(%arg0: i32, %arg1: memref<1x8x128xf32, #tpu.memory_space<vmem>>, %arg2: memref<1x8x128xf32, #tpu.memory_space<vmem>>, %arg3: memref<128x128xbf16, #tpu.memory_space<vmem>>, %arg4: memref<1x128xf32, #tpu.memory_space<vmem>>, %arg5: memref<128x256xbf16, #tpu.memory_space<vmem>>, %arg6: memref<1x256xf32, #tpu.memory_space<vmem>>, %arg7: memref<128x128xbf16, #tpu.memory_space<vmem>>, %arg8: memref<1x128xf32, #tpu.memory_space<vmem>>, %arg9: memref<1x128xf32, #tpu.memory_space<vmem>>, %arg10: memref<1x128xf32, #tpu.memory_space<vmem>>, %arg11: memref<1x8x128xf32, #tpu.memory_space<vmem>>) attributes {dimension_semantics = [#tpu.dimension_semantics<parallel>], iteration_bounds = array<i64: 2>, scalar_prefetch = 0 : i64, scratch_operands = 0 : i64, tpu.core_type = #tpu.core_type<tc>, window_params = [{transform_indices = @transform_0, window_bounds = array<i64: 1, 8, 128>}, {transform_indices = @transform_1, window_bounds = array<i64: 1, 8, 128>}, {pipeline_mode = #tpu.pipeline_mode<synchronous>, transform_indices = @transform_2, window_bounds = array<i64: 128, 128>}, {pipeline_mode = #tpu.pipeline_mode<synchronous>, transform_indices = @transform_3, window_bounds = array<i64: 1, 128>}, {pipeline_mode = #tpu.pipeline_mode<synchronous>, transform_indices = @transform_4, window_bounds = array<i64: 128, 256>}, {pipeline_mode = #tpu.pipeline_mode<synchronous>, transform_indices = @transform_5, window_bounds = array<i64: 1, 256>}, {pipeline_mode = #tpu.pipeline_mode<synchronous>, transform_indices = @transform_6, window_bounds = array<i64: 128, 128>}, {pipeline_mode = #tpu.pipeline_mode<synchronous>, transform_indices = @transform_7, window_bounds = array<i64: 1, 128>}, {pipeline_mode = #tpu.pipeline_mode<synchronous>, transform_indices = @transform_8, window_bounds = array<i64: 1, 128>}, {pipeline_mode = #tpu.pipeline_mode<synchronous>, transform_indices = @transform_9, window_bounds = array<i64: 1, 128>}, {transform_indices = @transform_10, window_bounds = array<i64: 1, 8, 128>}]} {
    %c0 = arith.constant 0 : index
    %c0_0 = arith.constant 0 : index
    %c0_1 = arith.constant 0 : index
    %0 = vector.load %arg1[%c0, %c0_0, %c0_1] : memref<1x8x128xf32, #tpu.memory_space<vmem>>, vector<1x8x128xf32>
    %1 = vector.shape_cast %0 : vector<1x8x128xf32> to vector<8x128xf32>
    %c0_2 = arith.constant 0 : index
    %c0_3 = arith.constant 0 : index
    %c0_4 = arith.constant 0 : index
    %2 = vector.load %arg2[%c0_2, %c0_3, %c0_4] : memref<1x8x128xf32, #tpu.memory_space<vmem>>, vector<1x8x128xf32>
    %3 = vector.shape_cast %2 : vector<1x8x128xf32> to vector<8x128xf32>
    %4 = arith.truncf %1 : vector<8x128xf32> to vector<8x128xbf16>
    %c0_5 = arith.constant 0 : index
    %c0_6 = arith.constant 0 : index
    %5 = vector.load %arg3[%c0_5, %c0_6] : memref<128x128xbf16, #tpu.memory_space<vmem>>, vector<128x128xbf16>
    %cst = arith.constant dense<0.000000e+00> : vector<8x128xf32>
    %6 = tpu.matmul %4, %5, %cst {dimension_numbers = #tpu.dot_dimension_numbers<[1], [0], [0], [1], [0, 0, 1, 1], [], []>} : vector<8x128xbf16>, vector<128x128xbf16>, vector<8x128xf32> -> vector<8x128xf32>
    %c0_7 = arith.constant 0 : index
    %c0_8 = arith.constant 0 : index
    %7 = vector.load %arg4[%c0_7, %c0_8] : memref<1x128xf32, #tpu.memory_space<vmem>>, vector<1x128xf32>
    %8 = vector.broadcast %7 : vector<1x128xf32> to vector<8x128xf32>
    %9 = arith.addf %6, %8 : vector<8x128xf32>
    %10 = arith.truncf %3 : vector<8x128xf32> to vector<8x128xbf16>
    %c0_9 = arith.constant 0 : index
    %c0_10 = arith.constant 0 : index
    %11 = vector.load %arg5[%c0_9, %c0_10] : memref<128x256xbf16, #tpu.memory_space<vmem>>, vector<128x256xbf16>
    %cst_11 = arith.constant dense<0.000000e+00> : vector<8x256xf32>
    %12 = tpu.matmul %10, %11, %cst_11 {dimension_numbers = #tpu.dot_dimension_numbers<[1], [0], [0], [1], [0, 0, 1, 1], [], []>} : vector<8x128xbf16>, vector<128x256xbf16>, vector<8x256xf32> -> vector<8x256xf32>
    %c0_12 = arith.constant 0 : index
    %c0_13 = arith.constant 0 : index
    %13 = vector.load %arg6[%c0_12, %c0_13] : memref<1x256xf32, #tpu.memory_space<vmem>>, vector<1x256xf32>
    %14 = vector.broadcast %13 : vector<1x256xf32> to vector<8x256xf32>
    %15 = arith.addf %12, %14 : vector<8x256xf32>
    %16 = vector.extract_strided_slice %15 {offsets = [0, 0], sizes = [8, 128], strides = [1, 1]} : vector<8x256xf32> to vector<8x128xf32>
    %17 = vector.extract_strided_slice %15 {offsets = [0, 128], sizes = [8, 128], strides = [1, 1]} : vector<8x256xf32> to vector<8x128xf32>
    %c0_14 = arith.constant 0 : index
    %c0_15 = arith.constant 0 : index
    %18 = vector.load %arg7[%c0_14, %c0_15] : memref<128x128xbf16, #tpu.memory_space<vmem>>, vector<128x128xbf16>
    %cst_16 = arith.constant 0.000000e+00 : f32
    %19 = vector.broadcast %cst_16 : f32 to vector<8x128xf32>
    %20 = vector.extract_strided_slice %9 {offsets = [0, 0], sizes = [8, 32], strides = [1, 1]} : vector<8x128xf32> to vector<8x32xf32>
    %cst_17 = arith.constant 0.176776692 : f32
    %21 = vector.broadcast %cst_17 : f32 to vector<8x32xf32>
    %22 = arith.mulf %20, %21 : vector<8x32xf32>
    %23 = arith.truncf %22 : vector<8x32xf32> to vector<8x32xbf16>
    %24 = vector.extract_strided_slice %16 {offsets = [0, 0], sizes = [8, 32], strides = [1, 1]} : vector<8x128xf32> to vector<8x32xf32>
    %25 = arith.truncf %24 : vector<8x32xf32> to vector<8x32xbf16>
    %26 = vector.extract_strided_slice %17 {offsets = [0, 0], sizes = [8, 32], strides = [1, 1]} : vector<8x128xf32> to vector<8x32xf32>
    %27 = arith.truncf %26 : vector<8x32xf32> to vector<8x32xbf16>
    %cst_18 = arith.constant dense<0.000000e+00> : vector<8x8xf32>
    %28 = tpu.matmul %23, %25, %cst_18 {dimension_numbers = #tpu.dot_dimension_numbers<[1], [1], [0], [0], [0, 0, 1, 0], [], []>} : vector<8x32xbf16>, vector<8x32xbf16>, vector<8x8xf32> -> vector<8x8xf32>
    %cst_19 = arith.constant dense<0xFF800000> : vector<8xf32>
    %29 = vector.multi_reduction <maximumf>, %28, %cst_19 [1] : vector<8x8xf32> to vector<8xf32>
    %30 = vector.shape_cast %29 : vector<8xf32> to vector<8x1xf32>
    %31 = vector.broadcast %30 : vector<8x1xf32> to vector<8x8xf32>
    %32 = arith.subf %28, %31 : vector<8x8xf32>
    %33 = math.exp %32 : vector<8x8xf32>
    %cst_20 = arith.constant dense<0.000000e+00> : vector<8xf32>
    %34 = vector.multi_reduction <add>, %33, %cst_20 [1] : vector<8x8xf32> to vector<8xf32>
    %35 = vector.shape_cast %34 : vector<8xf32> to vector<8x1xf32>
    %36 = arith.truncf %33 : vector<8x8xf32> to vector<8x8xbf16>
    %cst_21 = arith.constant dense<0.000000e+00> : vector<8x32xf32>
    %37 = tpu.matmul %36, %27, %cst_21 {dimension_numbers = #tpu.dot_dimension_numbers<[1], [0], [0], [1], [0, 0, 1, 1], [], []>} : vector<8x8xbf16>, vector<8x32xbf16>, vector<8x32xf32> -> vector<8x32xf32>
    %38 = tpu.reciprocal %35 {approx = true} : vector<8x1xf32> -> vector<8x1xf32>
    %39 = vector.broadcast %38 : vector<8x1xf32> to vector<8x32xf32>
    %40 = arith.mulf %37, %39 : vector<8x32xf32>
    %41 = arith.truncf %40 : vector<8x32xf32> to vector<8x32xbf16>
    %42 = vector.extract_strided_slice %18 {offsets = [0, 0], sizes = [32, 128], strides = [1, 1]} : vector<128x128xbf16> to vector<32x128xbf16>
    %cst_22 = arith.constant dense<0.000000e+00> : vector<8x128xf32>
    %43 = tpu.matmul %41, %42, %cst_22 {dimension_numbers = #tpu.dot_dimension_numbers<[1], [0], [0], [1], [0, 0, 1, 1], [], []>} : vector<8x32xbf16>, vector<32x128xbf16>, vector<8x128xf32> -> vector<8x128xf32>
    %44 = arith.addf %19, %43 : vector<8x128xf32>
    %45 = vector.extract_strided_slice %9 {offsets = [0, 32], sizes = [8, 32], strides = [1, 1]} : vector<8x128xf32> to vector<8x32xf32>
    %cst_23 = arith.constant 0.176776692 : f32
    %46 = vector.broadcast %cst_23 : f32 to vector<8x32xf32>
    %47 = arith.mulf %45, %46 : vector<8x32xf32>
    %48 = arith.truncf %47 : vector<8x32xf32> to vector<8x32xbf16>
    %49 = vector.extract_strided_slice %16 {offsets = [0, 32], sizes = [8, 32], strides = [1, 1]} : vector<8x128xf32> to vector<8x32xf32>
    %50 = arith.truncf %49 : vector<8x32xf32> to vector<8x32xbf16>
    %51 = vector.extract_strided_slice %17 {offsets = [0, 32], sizes = [8, 32], strides = [1, 1]} : vector<8x128xf32> to vector<8x32xf32>
    %52 = arith.truncf %51 : vector<8x32xf32> to vector<8x32xbf16>
    %cst_24 = arith.constant dense<0.000000e+00> : vector<8x8xf32>
    %53 = tpu.matmul %48, %50, %cst_24 {dimension_numbers = #tpu.dot_dimension_numbers<[1], [1], [0], [0], [0, 0, 1, 0], [], []>} : vector<8x32xbf16>, vector<8x32xbf16>, vector<8x8xf32> -> vector<8x8xf32>
    %cst_25 = arith.constant dense<0xFF800000> : vector<8xf32>
    %54 = vector.multi_reduction <maximumf>, %53, %cst_25 [1] : vector<8x8xf32> to vector<8xf32>
    %55 = vector.shape_cast %54 : vector<8xf32> to vector<8x1xf32>
    %56 = vector.broadcast %55 : vector<8x1xf32> to vector<8x8xf32>
    %57 = arith.subf %53, %56 : vector<8x8xf32>
    %58 = math.exp %57 : vector<8x8xf32>
    %cst_26 = arith.constant dense<0.000000e+00> : vector<8xf32>
    %59 = vector.multi_reduction <add>, %58, %cst_26 [1] : vector<8x8xf32> to vector<8xf32>
    %60 = vector.shape_cast %59 : vector<8xf32> to vector<8x1xf32>
    %61 = arith.truncf %58 : vector<8x8xf32> to vector<8x8xbf16>
    %cst_27 = arith.constant dense<0.000000e+00> : vector<8x32xf32>
    %62 = tpu.matmul %61, %52, %cst_27 {dimension_numbers = #tpu.dot_dimension_numbers<[1], [0], [0], [1], [0, 0, 1, 1], [], []>} : vector<8x8xbf16>, vector<8x32xbf16>, vector<8x32xf32> -> vector<8x32xf32>
    %63 = tpu.reciprocal %60 {approx = true} : vector<8x1xf32> -> vector<8x1xf32>
    %64 = vector.broadcast %63 : vector<8x1xf32> to vector<8x32xf32>
    %65 = arith.mulf %62, %64 : vector<8x32xf32>
    %66 = arith.truncf %65 : vector<8x32xf32> to vector<8x32xbf16>
    %67 = vector.extract_strided_slice %18 {offsets = [32, 0], sizes = [32, 128], strides = [1, 1]} : vector<128x128xbf16> to vector<32x128xbf16>
    %cst_28 = arith.constant dense<0.000000e+00> : vector<8x128xf32>
    %68 = tpu.matmul %66, %67, %cst_28 {dimension_numbers = #tpu.dot_dimension_numbers<[1], [0], [0], [1], [0, 0, 1, 1], [], []>} : vector<8x32xbf16>, vector<32x128xbf16>, vector<8x128xf32> -> vector<8x128xf32>
    %69 = arith.addf %44, %68 : vector<8x128xf32>
    %70 = vector.extract_strided_slice %9 {offsets = [0, 64], sizes = [8, 32], strides = [1, 1]} : vector<8x128xf32> to vector<8x32xf32>
    %cst_29 = arith.constant 0.176776692 : f32
    %71 = vector.broadcast %cst_29 : f32 to vector<8x32xf32>
    %72 = arith.mulf %70, %71 : vector<8x32xf32>
    %73 = arith.truncf %72 : vector<8x32xf32> to vector<8x32xbf16>
    %74 = vector.extract_strided_slice %16 {offsets = [0, 64], sizes = [8, 32], strides = [1, 1]} : vector<8x128xf32> to vector<8x32xf32>
    %75 = arith.truncf %74 : vector<8x32xf32> to vector<8x32xbf16>
    %76 = vector.extract_strided_slice %17 {offsets = [0, 64], sizes = [8, 32], strides = [1, 1]} : vector<8x128xf32> to vector<8x32xf32>
    %77 = arith.truncf %76 : vector<8x32xf32> to vector<8x32xbf16>
    %cst_30 = arith.constant dense<0.000000e+00> : vector<8x8xf32>
    %78 = tpu.matmul %73, %75, %cst_30 {dimension_numbers = #tpu.dot_dimension_numbers<[1], [1], [0], [0], [0, 0, 1, 0], [], []>} : vector<8x32xbf16>, vector<8x32xbf16>, vector<8x8xf32> -> vector<8x8xf32>
    %cst_31 = arith.constant dense<0xFF800000> : vector<8xf32>
    %79 = vector.multi_reduction <maximumf>, %78, %cst_31 [1] : vector<8x8xf32> to vector<8xf32>
    %80 = vector.shape_cast %79 : vector<8xf32> to vector<8x1xf32>
    %81 = vector.broadcast %80 : vector<8x1xf32> to vector<8x8xf32>
    %82 = arith.subf %78, %81 : vector<8x8xf32>
    %83 = math.exp %82 : vector<8x8xf32>
    %cst_32 = arith.constant dense<0.000000e+00> : vector<8xf32>
    %84 = vector.multi_reduction <add>, %83, %cst_32 [1] : vector<8x8xf32> to vector<8xf32>
    %85 = vector.shape_cast %84 : vector<8xf32> to vector<8x1xf32>
    %86 = arith.truncf %83 : vector<8x8xf32> to vector<8x8xbf16>
    %cst_33 = arith.constant dense<0.000000e+00> : vector<8x32xf32>
    %87 = tpu.matmul %86, %77, %cst_33 {dimension_numbers = #tpu.dot_dimension_numbers<[1], [0], [0], [1], [0, 0, 1, 1], [], []>} : vector<8x8xbf16>, vector<8x32xbf16>, vector<8x32xf32> -> vector<8x32xf32>
    %88 = tpu.reciprocal %85 {approx = true} : vector<8x1xf32> -> vector<8x1xf32>
    %89 = vector.broadcast %88 : vector<8x1xf32> to vector<8x32xf32>
    %90 = arith.mulf %87, %89 : vector<8x32xf32>
    %91 = arith.truncf %90 : vector<8x32xf32> to vector<8x32xbf16>
    %92 = vector.extract_strided_slice %18 {offsets = [64, 0], sizes = [32, 128], strides = [1, 1]} : vector<128x128xbf16> to vector<32x128xbf16>
    %cst_34 = arith.constant dense<0.000000e+00> : vector<8x128xf32>
    %93 = tpu.matmul %91, %92, %cst_34 {dimension_numbers = #tpu.dot_dimension_numbers<[1], [0], [0], [1], [0, 0, 1, 1], [], []>} : vector<8x32xbf16>, vector<32x128xbf16>, vector<8x128xf32> -> vector<8x128xf32>
    %94 = arith.addf %69, %93 : vector<8x128xf32>
    %95 = vector.extract_strided_slice %9 {offsets = [0, 96], sizes = [8, 32], strides = [1, 1]} : vector<8x128xf32> to vector<8x32xf32>
    %cst_35 = arith.constant 0.176776692 : f32
    %96 = vector.broadcast %cst_35 : f32 to vector<8x32xf32>
    %97 = arith.mulf %95, %96 : vector<8x32xf32>
    %98 = arith.truncf %97 : vector<8x32xf32> to vector<8x32xbf16>
    %99 = vector.extract_strided_slice %16 {offsets = [0, 96], sizes = [8, 32], strides = [1, 1]} : vector<8x128xf32> to vector<8x32xf32>
    %100 = arith.truncf %99 : vector<8x32xf32> to vector<8x32xbf16>
    %101 = vector.extract_strided_slice %17 {offsets = [0, 96], sizes = [8, 32], strides = [1, 1]} : vector<8x128xf32> to vector<8x32xf32>
    %102 = arith.truncf %101 : vector<8x32xf32> to vector<8x32xbf16>
    %cst_36 = arith.constant dense<0.000000e+00> : vector<8x8xf32>
    %103 = tpu.matmul %98, %100, %cst_36 {dimension_numbers = #tpu.dot_dimension_numbers<[1], [1], [0], [0], [0, 0, 1, 0], [], []>} : vector<8x32xbf16>, vector<8x32xbf16>, vector<8x8xf32> -> vector<8x8xf32>
    %cst_37 = arith.constant dense<0xFF800000> : vector<8xf32>
    %104 = vector.multi_reduction <maximumf>, %103, %cst_37 [1] : vector<8x8xf32> to vector<8xf32>
    %105 = vector.shape_cast %104 : vector<8xf32> to vector<8x1xf32>
    %106 = vector.broadcast %105 : vector<8x1xf32> to vector<8x8xf32>
    %107 = arith.subf %103, %106 : vector<8x8xf32>
    %108 = math.exp %107 : vector<8x8xf32>
    %cst_38 = arith.constant dense<0.000000e+00> : vector<8xf32>
    %109 = vector.multi_reduction <add>, %108, %cst_38 [1] : vector<8x8xf32> to vector<8xf32>
    %110 = vector.shape_cast %109 : vector<8xf32> to vector<8x1xf32>
    %111 = arith.truncf %108 : vector<8x8xf32> to vector<8x8xbf16>
    %cst_39 = arith.constant dense<0.000000e+00> : vector<8x32xf32>
    %112 = tpu.matmul %111, %102, %cst_39 {dimension_numbers = #tpu.dot_dimension_numbers<[1], [0], [0], [1], [0, 0, 1, 1], [], []>} : vector<8x8xbf16>, vector<8x32xbf16>, vector<8x32xf32> -> vector<8x32xf32>
    %113 = tpu.reciprocal %110 {approx = true} : vector<8x1xf32> -> vector<8x1xf32>
    %114 = vector.broadcast %113 : vector<8x1xf32> to vector<8x32xf32>
    %115 = arith.mulf %112, %114 : vector<8x32xf32>
    %116 = arith.truncf %115 : vector<8x32xf32> to vector<8x32xbf16>
    %117 = vector.extract_strided_slice %18 {offsets = [96, 0], sizes = [32, 128], strides = [1, 1]} : vector<128x128xbf16> to vector<32x128xbf16>
    %cst_40 = arith.constant dense<0.000000e+00> : vector<8x128xf32>
    %118 = tpu.matmul %116, %117, %cst_40 {dimension_numbers = #tpu.dot_dimension_numbers<[1], [0], [0], [1], [0, 0, 1, 1], [], []>} : vector<8x32xbf16>, vector<32x128xbf16>, vector<8x128xf32> -> vector<8x128xf32>
    %119 = arith.addf %94, %118 : vector<8x128xf32>
    %120 = arith.addf %1, %119 : vector<8x128xf32>
    %c0_41 = arith.constant 0 : index
    %c0_42 = arith.constant 0 : index
    %121 = vector.load %arg8[%c0_41, %c0_42] : memref<1x128xf32, #tpu.memory_space<vmem>>, vector<1x128xf32>
    %122 = vector.broadcast %121 : vector<1x128xf32> to vector<8x128xf32>
    %123 = arith.addf %120, %122 : vector<8x128xf32>
    %c0_43 = arith.constant 0 : index
    %c0_44 = arith.constant 0 : index
    %124 = vector.load %arg9[%c0_43, %c0_44] : memref<1x128xf32, #tpu.memory_space<vmem>>, vector<1x128xf32>
    %c0_45 = arith.constant 0 : index
    %c0_46 = arith.constant 0 : index
    %125 = vector.load %arg10[%c0_45, %c0_46] : memref<1x128xf32, #tpu.memory_space<vmem>>, vector<1x128xf32>
    %cst_47 = arith.constant dense<0.000000e+00> : vector<8xf32>
    %126 = vector.multi_reduction <add>, %123, %cst_47 [1] : vector<8x128xf32> to vector<8xf32>
    %127 = vector.shape_cast %126 : vector<8xf32> to vector<8x1xf32>
    %cst_48 = arith.constant 1.280000e+02 : f32
    %128 = vector.broadcast %cst_48 : f32 to vector<8x1xf32>
    %129 = arith.divf %127, %128 : vector<8x1xf32>
    %130 = vector.broadcast %129 : vector<8x1xf32> to vector<8x128xf32>
    %131 = arith.subf %123, %130 : vector<8x128xf32>
    %132 = arith.mulf %131, %131 : vector<8x128xf32>
    %cst_49 = arith.constant dense<0.000000e+00> : vector<8xf32>
    %133 = vector.multi_reduction <add>, %132, %cst_49 [1] : vector<8x128xf32> to vector<8xf32>
    %134 = vector.shape_cast %133 : vector<8xf32> to vector<8x1xf32>
    %cst_50 = arith.constant 1.280000e+02 : f32
    %135 = vector.broadcast %cst_50 : f32 to vector<8x1xf32>
    %136 = arith.divf %134, %135 : vector<8x1xf32>
    %137 = vector.broadcast %129 : vector<8x1xf32> to vector<8x128xf32>
    %138 = arith.subf %123, %137 : vector<8x128xf32>
    %cst_51 = arith.constant 9.99999974E-6 : f32
    %139 = vector.broadcast %cst_51 : f32 to vector<8x1xf32>
    %140 = arith.addf %136, %139 : vector<8x1xf32>
    %141 = math.rsqrt %140 : vector<8x1xf32>
    %142 = vector.broadcast %141 : vector<8x1xf32> to vector<8x128xf32>
    %143 = arith.mulf %138, %142 : vector<8x128xf32>
    %144 = vector.broadcast %124 : vector<1x128xf32> to vector<8x128xf32>
    %145 = arith.mulf %143, %144 : vector<8x128xf32>
    %146 = vector.broadcast %125 : vector<1x128xf32> to vector<8x128xf32>
    %147 = arith.addf %145, %146 : vector<8x128xf32>
    %c0_52 = arith.constant 0 : index
    %c0_53 = arith.constant 0 : index
    %c0_54 = arith.constant 0 : index
    %148 = vector.load %arg11[%c0_52, %c0_53, %c0_54] : memref<1x8x128xf32, #tpu.memory_space<vmem>>, vector<1x8x128xf32>
    %149 = vector.shape_cast %148 : vector<1x8x128xf32> to vector<8x128xf32>
    %150 = vector.shape_cast %147 : vector<8x128xf32> to vector<1x8x128xf32>
    tpu.vector_store %arg11[%c0_52, %c0_53, %c0_54], %150 {strides = array<i32>} : memref<1x8x128xf32, #tpu.memory_space<vmem>>, vector<1x8x128xf32>,
    return
  }
  func.func @transform_0(%arg0: i32) -> (i32, i32, i32) {
    %c0_i32 = arith.constant 0 : i32
    %c0_i32_0 = arith.constant 0 : i32
    %c0_i32_1 = arith.constant 0 : i32
    return %arg0, %c0_i32, %c0_i32_0 : i32, i32, i32
  }
  func.func @transform_1(%arg0: i32) -> (i32, i32, i32) {
    %c0_i32 = arith.constant 0 : i32
    %c0_i32_0 = arith.constant 0 : i32
    %c0_i32_1 = arith.constant 0 : i32
    return %arg0, %c0_i32, %c0_i32_0 : i32, i32, i32
  }
  func.func @transform_2(%arg0: i32) -> (i32, i32) {
    %c0_i32 = arith.constant 0 : i32
    %c0_i32_0 = arith.constant 0 : i32
    %c0_i32_1 = arith.constant 0 : i32
    return %c0_i32, %c0_i32_0 : i32, i32
  }
  func.func @transform_3(%arg0: i32) -> (i32, i32) {
    %c0_i32 = arith.constant 0 : i32
    %c0_i32_0 = arith.constant 0 : i32
    %c0_i32_1 = arith.constant 0 : i32
    return %c0_i32, %c0_i32_0 : i32, i32
  }
  func.func @transform_4(%arg0: i32) -> (i32, i32) {
    %c0_i32 = arith.constant 0 : i32
    %c0_i32_0 = arith.constant 0 : i32
    %c0_i32_1 = arith.constant 0 : i32
    return %c0_i32, %c0_i32_0 : i32, i32
  }
  func.func @transform_5(%arg0: i32) -> (i32, i32) {
    %c0_i32 = arith.constant 0 : i32
    %c0_i32_0 = arith.constant 0 : i32
    %c0_i32_1 = arith.constant 0 : i32
    return %c0_i32, %c0_i32_0 : i32, i32
  }
  func.func @transform_6(%arg0: i32) -> (i32, i32) {
    %c0_i32 = arith.constant 0 : i32
    %c0_i32_0 = arith.constant 0 : i32
    %c0_i32_1 = arith.constant 0 : i32
    return %c0_i32, %c0_i32_0 : i32, i32
  }
  func.func @transform_7(%arg0: i32) -> (i32, i32) {
    %c0_i32 = arith.constant 0 : i32
    %c0_i32_0 = arith.constant 0 : i32
    %c0_i32_1 = arith.constant 0 : i32
    return %c0_i32, %c0_i32_0 : i32, i32
  }
  func.func @transform_8(%arg0: i32) -> (i32, i32) {
    %c0_i32 = arith.constant 0 : i32
    %c0_i32_0 = arith.constant 0 : i32
    %c0_i32_1 = arith.constant 0 : i32
    return %c0_i32, %c0_i32_0 : i32, i32
  }
  func.func @transform_9(%arg0: i32) -> (i32, i32) {
    %c0_i32 = arith.constant 0 : i32
    %c0_i32_0 = arith.constant 0 : i32
    %c0_i32_1 = arith.constant 0 : i32
    return %c0_i32, %c0_i32_0 : i32, i32
  }
  func.func @transform_10(%arg0: i32) -> (i32, i32, i32) {
    %c0_i32 = arith.constant 0 : i32
    %c0_i32_0 = arith.constant 0 : i32
    %c0_i32_1 = arith.constant 0 : i32
    return %arg0, %c0_i32, %c0_i32_0 : i32, i32, i32
  }
}

module attributes {stable_mosaic.version = 11 : i64} {
  func.func @_ffn_ln_kernel(%arg0: i32, %arg1: memref<8x128xf32, #tpu.memory_space<vmem>>, %arg2: memref<128x256xbf16, #tpu.memory_space<vmem>>, %arg3: memref<1x256xf32, #tpu.memory_space<vmem>>, %arg4: memref<256x128xbf16, #tpu.memory_space<vmem>>, %arg5: memref<1x128xf32, #tpu.memory_space<vmem>>, %arg6: memref<1x128xf32, #tpu.memory_space<vmem>>, %arg7: memref<1x128xf32, #tpu.memory_space<vmem>>, %arg8: memref<8x128xf32, #tpu.memory_space<vmem>>) attributes {dimension_semantics = [#tpu.dimension_semantics<parallel>], iteration_bounds = array<i64: 2>, scalar_prefetch = 0 : i64, scratch_operands = 0 : i64, tpu.core_type = #tpu.core_type<tc>, window_params = [{transform_indices = @transform_0, window_bounds = array<i64: 8, 128>}, {pipeline_mode = #tpu.pipeline_mode<synchronous>, transform_indices = @transform_1, window_bounds = array<i64: 128, 256>}, {pipeline_mode = #tpu.pipeline_mode<synchronous>, transform_indices = @transform_2, window_bounds = array<i64: 1, 256>}, {pipeline_mode = #tpu.pipeline_mode<synchronous>, transform_indices = @transform_3, window_bounds = array<i64: 256, 128>}, {pipeline_mode = #tpu.pipeline_mode<synchronous>, transform_indices = @transform_4, window_bounds = array<i64: 1, 128>}, {pipeline_mode = #tpu.pipeline_mode<synchronous>, transform_indices = @transform_5, window_bounds = array<i64: 1, 128>}, {pipeline_mode = #tpu.pipeline_mode<synchronous>, transform_indices = @transform_6, window_bounds = array<i64: 1, 128>}, {transform_indices = @transform_7, window_bounds = array<i64: 8, 128>}]} {
    %c0 = arith.constant 0 : index
    %c0_0 = arith.constant 0 : index
    %0 = vector.load %arg1[%c0, %c0_0] : memref<8x128xf32, #tpu.memory_space<vmem>>, vector<8x128xf32>
    %1 = arith.truncf %0 : vector<8x128xf32> to vector<8x128xbf16>
    %c0_1 = arith.constant 0 : index
    %c0_2 = arith.constant 0 : index
    %2 = vector.load %arg2[%c0_1, %c0_2] : memref<128x256xbf16, #tpu.memory_space<vmem>>, vector<128x256xbf16>
    %cst = arith.constant dense<0.000000e+00> : vector<8x256xf32>
    %3 = tpu.matmul %1, %2, %cst {dimension_numbers = #tpu.dot_dimension_numbers<[1], [0], [0], [1], [0, 0, 1, 1], [], []>} : vector<8x128xbf16>, vector<128x256xbf16>, vector<8x256xf32> -> vector<8x256xf32>
    %c0_3 = arith.constant 0 : index
    %c0_4 = arith.constant 0 : index
    %4 = vector.load %arg3[%c0_3, %c0_4] : memref<1x256xf32, #tpu.memory_space<vmem>>, vector<1x256xf32>
    %5 = vector.broadcast %4 : vector<1x256xf32> to vector<8x256xf32>
    %6 = arith.addf %3, %5 : vector<8x256xf32>
    %cst_5 = arith.constant 0.000000e+00 : f32
    %7 = vector.broadcast %cst_5 : f32 to vector<8x256xf32>
    %8 = arith.maximumf %6, %7 : vector<8x256xf32>
    %9 = arith.truncf %8 : vector<8x256xf32> to vector<8x256xbf16>
    %c0_6 = arith.constant 0 : index
    %c0_7 = arith.constant 0 : index
    %10 = vector.load %arg4[%c0_6, %c0_7] : memref<256x128xbf16, #tpu.memory_space<vmem>>, vector<256x128xbf16>
    %cst_8 = arith.constant dense<0.000000e+00> : vector<8x128xf32>
    %11 = tpu.matmul %9, %10, %cst_8 {dimension_numbers = #tpu.dot_dimension_numbers<[1], [0], [0], [1], [0, 0, 1, 1], [], []>} : vector<8x256xbf16>, vector<256x128xbf16>, vector<8x128xf32> -> vector<8x128xf32>
    %c0_9 = arith.constant 0 : index
    %c0_10 = arith.constant 0 : index
    %12 = vector.load %arg5[%c0_9, %c0_10] : memref<1x128xf32, #tpu.memory_space<vmem>>, vector<1x128xf32>
    %13 = vector.broadcast %12 : vector<1x128xf32> to vector<8x128xf32>
    %14 = arith.addf %11, %13 : vector<8x128xf32>
    %15 = arith.addf %14, %0 : vector<8x128xf32>
    %c0_11 = arith.constant 0 : index
    %c0_12 = arith.constant 0 : index
    %16 = vector.load %arg6[%c0_11, %c0_12] : memref<1x128xf32, #tpu.memory_space<vmem>>, vector<1x128xf32>
    %c0_13 = arith.constant 0 : index
    %c0_14 = arith.constant 0 : index
    %17 = vector.load %arg7[%c0_13, %c0_14] : memref<1x128xf32, #tpu.memory_space<vmem>>, vector<1x128xf32>
    %cst_15 = arith.constant dense<0.000000e+00> : vector<8xf32>
    %18 = vector.multi_reduction <add>, %15, %cst_15 [1] : vector<8x128xf32> to vector<8xf32>
    %19 = vector.shape_cast %18 : vector<8xf32> to vector<8x1xf32>
    %cst_16 = arith.constant 1.280000e+02 : f32
    %20 = vector.broadcast %cst_16 : f32 to vector<8x1xf32>
    %21 = arith.divf %19, %20 : vector<8x1xf32>
    %22 = vector.broadcast %21 : vector<8x1xf32> to vector<8x128xf32>
    %23 = arith.subf %15, %22 : vector<8x128xf32>
    %24 = arith.mulf %23, %23 : vector<8x128xf32>
    %cst_17 = arith.constant dense<0.000000e+00> : vector<8xf32>
    %25 = vector.multi_reduction <add>, %24, %cst_17 [1] : vector<8x128xf32> to vector<8xf32>
    %26 = vector.shape_cast %25 : vector<8xf32> to vector<8x1xf32>
    %cst_18 = arith.constant 1.280000e+02 : f32
    %27 = vector.broadcast %cst_18 : f32 to vector<8x1xf32>
    %28 = arith.divf %26, %27 : vector<8x1xf32>
    %29 = vector.broadcast %21 : vector<8x1xf32> to vector<8x128xf32>
    %30 = arith.subf %15, %29 : vector<8x128xf32>
    %cst_19 = arith.constant 9.99999974E-6 : f32
    %31 = vector.broadcast %cst_19 : f32 to vector<8x1xf32>
    %32 = arith.addf %28, %31 : vector<8x1xf32>
    %33 = math.rsqrt %32 : vector<8x1xf32>
    %34 = vector.broadcast %33 : vector<8x1xf32> to vector<8x128xf32>
    %35 = arith.mulf %30, %34 : vector<8x128xf32>
    %36 = vector.broadcast %16 : vector<1x128xf32> to vector<8x128xf32>
    %37 = arith.mulf %35, %36 : vector<8x128xf32>
    %38 = vector.broadcast %17 : vector<1x128xf32> to vector<8x128xf32>
    %39 = arith.addf %37, %38 : vector<8x128xf32>
    %c0_20 = arith.constant 0 : index
    %c0_21 = arith.constant 0 : index
    %40 = vector.load %arg8[%c0_20, %c0_21] : memref<8x128xf32, #tpu.memory_space<vmem>>, vector<8x128xf32>
    tpu.vector_store %arg8[%c0_20, %c0_21], %39 {strides = array<i32>} : memref<8x128xf32, #tpu.memory_space<vmem>>, vector<8x128xf32>,
    return
  }
  func.func @transform_0(%arg0: i32) -> (i32, i32) {
    %c0_i32 = arith.constant 0 : i32
    %c0_i32_0 = arith.constant 0 : i32
    return %arg0, %c0_i32 : i32, i32
  }
  func.func @transform_1(%arg0: i32) -> (i32, i32) {
    %c0_i32 = arith.constant 0 : i32
    %c0_i32_0 = arith.constant 0 : i32
    %c0_i32_1 = arith.constant 0 : i32
    return %c0_i32, %c0_i32_0 : i32, i32
  }
  func.func @transform_2(%arg0: i32) -> (i32, i32) {
    %c0_i32 = arith.constant 0 : i32
    %c0_i32_0 = arith.constant 0 : i32
    %c0_i32_1 = arith.constant 0 : i32
    return %c0_i32, %c0_i32_0 : i32, i32
  }
  func.func @transform_3(%arg0: i32) -> (i32, i32) {
    %c0_i32 = arith.constant 0 : i32
    %c0_i32_0 = arith.constant 0 : i32
    %c0_i32_1 = arith.constant 0 : i32
    return %c0_i32, %c0_i32_0 : i32, i32
  }
  func.func @transform_4(%arg0: i32) -> (i32, i32) {
    %c0_i32 = arith.constant 0 : i32
    %c0_i32_0 = arith.constant 0 : i32
    %c0_i32_1 = arith.constant 0 : i32
    return %c0_i32, %c0_i32_0 : i32, i32
  }
  func.func @transform_5(%arg0: i32) -> (i32, i32) {
    %c0_i32 = arith.constant 0 : i32
    %c0_i32_0 = arith.constant 0 : i32
    %c0_i32_1 = arith.constant 0 : i32
    return %c0_i32, %c0_i32_0 : i32, i32
  }
  func.func @transform_6(%arg0: i32) -> (i32, i32) {
    %c0_i32 = arith.constant 0 : i32
    %c0_i32_0 = arith.constant 0 : i32
    %c0_i32_1 = arith.constant 0 : i32
    return %c0_i32, %c0_i32_0 : i32, i32
  }
  func.func @transform_7(%arg0: i32) -> (i32, i32) {
    %c0_i32 = arith.constant 0 : i32
    %c0_i32_0 = arith.constant 0 : i32
    return %arg0, %c0_i32 : i32, i32
  }
}

module attributes {stable_mosaic.version = 11 : i64} {
  func.func @_ln_kernel(%arg0: i32, %arg1: memref<8x128xf32, #tpu.memory_space<vmem>>, %arg2: memref<1x128xf32, #tpu.memory_space<vmem>>, %arg3: memref<1x128xf32, #tpu.memory_space<vmem>>, %arg4: memref<8x128xf32, #tpu.memory_space<vmem>>) attributes {dimension_semantics = [#tpu.dimension_semantics<parallel>], iteration_bounds = array<i64: 2>, scalar_prefetch = 0 : i64, scratch_operands = 0 : i64, tpu.core_type = #tpu.core_type<tc>, window_params = [{transform_indices = @transform_0, window_bounds = array<i64: 8, 128>}, {pipeline_mode = #tpu.pipeline_mode<synchronous>, transform_indices = @transform_1, window_bounds = array<i64: 1, 128>}, {pipeline_mode = #tpu.pipeline_mode<synchronous>, transform_indices = @transform_2, window_bounds = array<i64: 1, 128>}, {transform_indices = @transform_3, window_bounds = array<i64: 8, 128>}]} {
    %c0 = arith.constant 0 : index
    %c0_0 = arith.constant 0 : index
    %0 = vector.load %arg1[%c0, %c0_0] : memref<8x128xf32, #tpu.memory_space<vmem>>, vector<8x128xf32>
    %c0_1 = arith.constant 0 : index
    %c0_2 = arith.constant 0 : index
    %1 = vector.load %arg2[%c0_1, %c0_2] : memref<1x128xf32, #tpu.memory_space<vmem>>, vector<1x128xf32>
    %c0_3 = arith.constant 0 : index
    %c0_4 = arith.constant 0 : index
    %2 = vector.load %arg3[%c0_3, %c0_4] : memref<1x128xf32, #tpu.memory_space<vmem>>, vector<1x128xf32>
    %cst = arith.constant dense<0.000000e+00> : vector<8xf32>
    %3 = vector.multi_reduction <add>, %0, %cst [1] : vector<8x128xf32> to vector<8xf32>
    %4 = vector.shape_cast %3 : vector<8xf32> to vector<8x1xf32>
    %cst_5 = arith.constant 1.280000e+02 : f32
    %5 = vector.broadcast %cst_5 : f32 to vector<8x1xf32>
    %6 = arith.divf %4, %5 : vector<8x1xf32>
    %7 = vector.broadcast %6 : vector<8x1xf32> to vector<8x128xf32>
    %8 = arith.subf %0, %7 : vector<8x128xf32>
    %9 = arith.mulf %8, %8 : vector<8x128xf32>
    %cst_6 = arith.constant dense<0.000000e+00> : vector<8xf32>
    %10 = vector.multi_reduction <add>, %9, %cst_6 [1] : vector<8x128xf32> to vector<8xf32>
    %11 = vector.shape_cast %10 : vector<8xf32> to vector<8x1xf32>
    %cst_7 = arith.constant 1.280000e+02 : f32
    %12 = vector.broadcast %cst_7 : f32 to vector<8x1xf32>
    %13 = arith.divf %11, %12 : vector<8x1xf32>
    %14 = vector.broadcast %6 : vector<8x1xf32> to vector<8x128xf32>
    %15 = arith.subf %0, %14 : vector<8x128xf32>
    %cst_8 = arith.constant 9.99999974E-6 : f32
    %16 = vector.broadcast %cst_8 : f32 to vector<8x1xf32>
    %17 = arith.addf %13, %16 : vector<8x1xf32>
    %18 = math.rsqrt %17 : vector<8x1xf32>
    %19 = vector.broadcast %18 : vector<8x1xf32> to vector<8x128xf32>
    %20 = arith.mulf %15, %19 : vector<8x128xf32>
    %21 = vector.broadcast %1 : vector<1x128xf32> to vector<8x128xf32>
    %22 = arith.mulf %20, %21 : vector<8x128xf32>
    %23 = vector.broadcast %2 : vector<1x128xf32> to vector<8x128xf32>
    %24 = arith.addf %22, %23 : vector<8x128xf32>
    %c0_9 = arith.constant 0 : index
    %c0_10 = arith.constant 0 : index
    %25 = vector.load %arg4[%c0_9, %c0_10] : memref<8x128xf32, #tpu.memory_space<vmem>>, vector<8x128xf32>
    tpu.vector_store %arg4[%c0_9, %c0_10], %24 {strides = array<i32>} : memref<8x128xf32, #tpu.memory_space<vmem>>, vector<8x128xf32>,
    return
  }
  func.func @transform_0(%arg0: i32) -> (i32, i32) {
    %c0_i32 = arith.constant 0 : i32
    %c0_i32_0 = arith.constant 0 : i32
    return %arg0, %c0_i32 : i32, i32
  }
  func.func @transform_1(%arg0: i32) -> (i32, i32) {
    %c0_i32 = arith.constant 0 : i32
    %c0_i32_0 = arith.constant 0 : i32
    %c0_i32_1 = arith.constant 0 : i32
    return %c0_i32, %c0_i32_0 : i32, i32
  }
  func.func @transform_2(%arg0: i32) -> (i32, i32) {
    %c0_i32 = arith.constant 0 : i32
    %c0_i32_0 = arith.constant 0 : i32
    %c0_i32_1 = arith.constant 0 : i32
    return %c0_i32, %c0_i32_0 : i32, i32
  }
  func.func @transform_3(%arg0: i32) -> (i32, i32) {
    %c0_i32 = arith.constant 0 : i32
    %c0_i32_0 = arith.constant 0 : i32
    return %arg0, %c0_i32 : i32, i32
  }
}

module attributes {stable_mosaic.version = 11 : i64} {
  func.func @_self_attn_ln_kernel(%arg0: i32, %arg1: memref<1x8x128xf32, #tpu.memory_space<vmem>>, %arg2: memref<128x384xbf16, #tpu.memory_space<vmem>>, %arg3: memref<1x384xf32, #tpu.memory_space<vmem>>, %arg4: memref<128x128xbf16, #tpu.memory_space<vmem>>, %arg5: memref<1x128xf32, #tpu.memory_space<vmem>>, %arg6: memref<1x128xf32, #tpu.memory_space<vmem>>, %arg7: memref<1x128xf32, #tpu.memory_space<vmem>>, %arg8: memref<1x8x128xf32, #tpu.memory_space<vmem>>) attributes {dimension_semantics = [#tpu.dimension_semantics<parallel>], iteration_bounds = array<i64: 2>, scalar_prefetch = 0 : i64, scratch_operands = 0 : i64, tpu.core_type = #tpu.core_type<tc>, window_params = [{transform_indices = @transform_0, window_bounds = array<i64: 1, 8, 128>}, {pipeline_mode = #tpu.pipeline_mode<synchronous>, transform_indices = @transform_1, window_bounds = array<i64: 128, 384>}, {pipeline_mode = #tpu.pipeline_mode<synchronous>, transform_indices = @transform_2, window_bounds = array<i64: 1, 384>}, {pipeline_mode = #tpu.pipeline_mode<synchronous>, transform_indices = @transform_3, window_bounds = array<i64: 128, 128>}, {pipeline_mode = #tpu.pipeline_mode<synchronous>, transform_indices = @transform_4, window_bounds = array<i64: 1, 128>}, {pipeline_mode = #tpu.pipeline_mode<synchronous>, transform_indices = @transform_5, window_bounds = array<i64: 1, 128>}, {pipeline_mode = #tpu.pipeline_mode<synchronous>, transform_indices = @transform_6, window_bounds = array<i64: 1, 128>}, {transform_indices = @transform_7, window_bounds = array<i64: 1, 8, 128>}]} {
    %c0 = arith.constant 0 : index
    %c0_0 = arith.constant 0 : index
    %c0_1 = arith.constant 0 : index
    %0 = vector.load %arg1[%c0, %c0_0, %c0_1] : memref<1x8x128xf32, #tpu.memory_space<vmem>>, vector<1x8x128xf32>
    %1 = vector.shape_cast %0 : vector<1x8x128xf32> to vector<8x128xf32>
    %2 = arith.truncf %1 : vector<8x128xf32> to vector<8x128xbf16>
    %c0_2 = arith.constant 0 : index
    %c0_3 = arith.constant 0 : index
    %3 = vector.load %arg2[%c0_2, %c0_3] : memref<128x384xbf16, #tpu.memory_space<vmem>>, vector<128x384xbf16>
    %cst = arith.constant dense<0.000000e+00> : vector<8x384xf32>
    %4 = tpu.matmul %2, %3, %cst {dimension_numbers = #tpu.dot_dimension_numbers<[1], [0], [0], [1], [0, 0, 1, 1], [], []>} : vector<8x128xbf16>, vector<128x384xbf16>, vector<8x384xf32> -> vector<8x384xf32>
    %c0_4 = arith.constant 0 : index
    %c0_5 = arith.constant 0 : index
    %5 = vector.load %arg3[%c0_4, %c0_5] : memref<1x384xf32, #tpu.memory_space<vmem>>, vector<1x384xf32>
    %6 = vector.broadcast %5 : vector<1x384xf32> to vector<8x384xf32>
    %7 = arith.addf %4, %6 : vector<8x384xf32>
    %8 = vector.extract_strided_slice %7 {offsets = [0, 0], sizes = [8, 128], strides = [1, 1]} : vector<8x384xf32> to vector<8x128xf32>
    %9 = vector.extract_strided_slice %7 {offsets = [0, 128], sizes = [8, 128], strides = [1, 1]} : vector<8x384xf32> to vector<8x128xf32>
    %10 = vector.extract_strided_slice %7 {offsets = [0, 256], sizes = [8, 128], strides = [1, 1]} : vector<8x384xf32> to vector<8x128xf32>
    %c0_6 = arith.constant 0 : index
    %c0_7 = arith.constant 0 : index
    %11 = vector.load %arg4[%c0_6, %c0_7] : memref<128x128xbf16, #tpu.memory_space<vmem>>, vector<128x128xbf16>
    %cst_8 = arith.constant 0.000000e+00 : f32
    %12 = vector.broadcast %cst_8 : f32 to vector<8x128xf32>
    %13 = vector.extract_strided_slice %8 {offsets = [0, 0], sizes = [8, 32], strides = [1, 1]} : vector<8x128xf32> to vector<8x32xf32>
    %cst_9 = arith.constant 0.176776692 : f32
    %14 = vector.broadcast %cst_9 : f32 to vector<8x32xf32>
    %15 = arith.mulf %13, %14 : vector<8x32xf32>
    %16 = arith.truncf %15 : vector<8x32xf32> to vector<8x32xbf16>
    %17 = vector.extract_strided_slice %9 {offsets = [0, 0], sizes = [8, 32], strides = [1, 1]} : vector<8x128xf32> to vector<8x32xf32>
    %18 = arith.truncf %17 : vector<8x32xf32> to vector<8x32xbf16>
    %19 = vector.extract_strided_slice %10 {offsets = [0, 0], sizes = [8, 32], strides = [1, 1]} : vector<8x128xf32> to vector<8x32xf32>
    %20 = arith.truncf %19 : vector<8x32xf32> to vector<8x32xbf16>
    %cst_10 = arith.constant dense<0.000000e+00> : vector<8x8xf32>
    %21 = tpu.matmul %16, %18, %cst_10 {dimension_numbers = #tpu.dot_dimension_numbers<[1], [1], [0], [0], [0, 0, 1, 0], [], []>} : vector<8x32xbf16>, vector<8x32xbf16>, vector<8x8xf32> -> vector<8x8xf32>
    %cst_11 = arith.constant dense<0xFF800000> : vector<8xf32>
    %22 = vector.multi_reduction <maximumf>, %21, %cst_11 [1] : vector<8x8xf32> to vector<8xf32>
    %23 = vector.shape_cast %22 : vector<8xf32> to vector<8x1xf32>
    %24 = vector.broadcast %23 : vector<8x1xf32> to vector<8x8xf32>
    %25 = arith.subf %21, %24 : vector<8x8xf32>
    %26 = math.exp %25 : vector<8x8xf32>
    %cst_12 = arith.constant dense<0.000000e+00> : vector<8xf32>
    %27 = vector.multi_reduction <add>, %26, %cst_12 [1] : vector<8x8xf32> to vector<8xf32>
    %28 = vector.shape_cast %27 : vector<8xf32> to vector<8x1xf32>
    %29 = arith.truncf %26 : vector<8x8xf32> to vector<8x8xbf16>
    %cst_13 = arith.constant dense<0.000000e+00> : vector<8x32xf32>
    %30 = tpu.matmul %29, %20, %cst_13 {dimension_numbers = #tpu.dot_dimension_numbers<[1], [0], [0], [1], [0, 0, 1, 1], [], []>} : vector<8x8xbf16>, vector<8x32xbf16>, vector<8x32xf32> -> vector<8x32xf32>
    %31 = tpu.reciprocal %28 {approx = true} : vector<8x1xf32> -> vector<8x1xf32>
    %32 = vector.broadcast %31 : vector<8x1xf32> to vector<8x32xf32>
    %33 = arith.mulf %30, %32 : vector<8x32xf32>
    %34 = arith.truncf %33 : vector<8x32xf32> to vector<8x32xbf16>
    %35 = vector.extract_strided_slice %11 {offsets = [0, 0], sizes = [32, 128], strides = [1, 1]} : vector<128x128xbf16> to vector<32x128xbf16>
    %cst_14 = arith.constant dense<0.000000e+00> : vector<8x128xf32>
    %36 = tpu.matmul %34, %35, %cst_14 {dimension_numbers = #tpu.dot_dimension_numbers<[1], [0], [0], [1], [0, 0, 1, 1], [], []>} : vector<8x32xbf16>, vector<32x128xbf16>, vector<8x128xf32> -> vector<8x128xf32>
    %37 = arith.addf %12, %36 : vector<8x128xf32>
    %38 = vector.extract_strided_slice %8 {offsets = [0, 32], sizes = [8, 32], strides = [1, 1]} : vector<8x128xf32> to vector<8x32xf32>
    %cst_15 = arith.constant 0.176776692 : f32
    %39 = vector.broadcast %cst_15 : f32 to vector<8x32xf32>
    %40 = arith.mulf %38, %39 : vector<8x32xf32>
    %41 = arith.truncf %40 : vector<8x32xf32> to vector<8x32xbf16>
    %42 = vector.extract_strided_slice %9 {offsets = [0, 32], sizes = [8, 32], strides = [1, 1]} : vector<8x128xf32> to vector<8x32xf32>
    %43 = arith.truncf %42 : vector<8x32xf32> to vector<8x32xbf16>
    %44 = vector.extract_strided_slice %10 {offsets = [0, 32], sizes = [8, 32], strides = [1, 1]} : vector<8x128xf32> to vector<8x32xf32>
    %45 = arith.truncf %44 : vector<8x32xf32> to vector<8x32xbf16>
    %cst_16 = arith.constant dense<0.000000e+00> : vector<8x8xf32>
    %46 = tpu.matmul %41, %43, %cst_16 {dimension_numbers = #tpu.dot_dimension_numbers<[1], [1], [0], [0], [0, 0, 1, 0], [], []>} : vector<8x32xbf16>, vector<8x32xbf16>, vector<8x8xf32> -> vector<8x8xf32>
    %cst_17 = arith.constant dense<0xFF800000> : vector<8xf32>
    %47 = vector.multi_reduction <maximumf>, %46, %cst_17 [1] : vector<8x8xf32> to vector<8xf32>
    %48 = vector.shape_cast %47 : vector<8xf32> to vector<8x1xf32>
    %49 = vector.broadcast %48 : vector<8x1xf32> to vector<8x8xf32>
    %50 = arith.subf %46, %49 : vector<8x8xf32>
    %51 = math.exp %50 : vector<8x8xf32>
    %cst_18 = arith.constant dense<0.000000e+00> : vector<8xf32>
    %52 = vector.multi_reduction <add>, %51, %cst_18 [1] : vector<8x8xf32> to vector<8xf32>
    %53 = vector.shape_cast %52 : vector<8xf32> to vector<8x1xf32>
    %54 = arith.truncf %51 : vector<8x8xf32> to vector<8x8xbf16>
    %cst_19 = arith.constant dense<0.000000e+00> : vector<8x32xf32>
    %55 = tpu.matmul %54, %45, %cst_19 {dimension_numbers = #tpu.dot_dimension_numbers<[1], [0], [0], [1], [0, 0, 1, 1], [], []>} : vector<8x8xbf16>, vector<8x32xbf16>, vector<8x32xf32> -> vector<8x32xf32>
    %56 = tpu.reciprocal %53 {approx = true} : vector<8x1xf32> -> vector<8x1xf32>
    %57 = vector.broadcast %56 : vector<8x1xf32> to vector<8x32xf32>
    %58 = arith.mulf %55, %57 : vector<8x32xf32>
    %59 = arith.truncf %58 : vector<8x32xf32> to vector<8x32xbf16>
    %60 = vector.extract_strided_slice %11 {offsets = [32, 0], sizes = [32, 128], strides = [1, 1]} : vector<128x128xbf16> to vector<32x128xbf16>
    %cst_20 = arith.constant dense<0.000000e+00> : vector<8x128xf32>
    %61 = tpu.matmul %59, %60, %cst_20 {dimension_numbers = #tpu.dot_dimension_numbers<[1], [0], [0], [1], [0, 0, 1, 1], [], []>} : vector<8x32xbf16>, vector<32x128xbf16>, vector<8x128xf32> -> vector<8x128xf32>
    %62 = arith.addf %37, %61 : vector<8x128xf32>
    %63 = vector.extract_strided_slice %8 {offsets = [0, 64], sizes = [8, 32], strides = [1, 1]} : vector<8x128xf32> to vector<8x32xf32>
    %cst_21 = arith.constant 0.176776692 : f32
    %64 = vector.broadcast %cst_21 : f32 to vector<8x32xf32>
    %65 = arith.mulf %63, %64 : vector<8x32xf32>
    %66 = arith.truncf %65 : vector<8x32xf32> to vector<8x32xbf16>
    %67 = vector.extract_strided_slice %9 {offsets = [0, 64], sizes = [8, 32], strides = [1, 1]} : vector<8x128xf32> to vector<8x32xf32>
    %68 = arith.truncf %67 : vector<8x32xf32> to vector<8x32xbf16>
    %69 = vector.extract_strided_slice %10 {offsets = [0, 64], sizes = [8, 32], strides = [1, 1]} : vector<8x128xf32> to vector<8x32xf32>
    %70 = arith.truncf %69 : vector<8x32xf32> to vector<8x32xbf16>
    %cst_22 = arith.constant dense<0.000000e+00> : vector<8x8xf32>
    %71 = tpu.matmul %66, %68, %cst_22 {dimension_numbers = #tpu.dot_dimension_numbers<[1], [1], [0], [0], [0, 0, 1, 0], [], []>} : vector<8x32xbf16>, vector<8x32xbf16>, vector<8x8xf32> -> vector<8x8xf32>
    %cst_23 = arith.constant dense<0xFF800000> : vector<8xf32>
    %72 = vector.multi_reduction <maximumf>, %71, %cst_23 [1] : vector<8x8xf32> to vector<8xf32>
    %73 = vector.shape_cast %72 : vector<8xf32> to vector<8x1xf32>
    %74 = vector.broadcast %73 : vector<8x1xf32> to vector<8x8xf32>
    %75 = arith.subf %71, %74 : vector<8x8xf32>
    %76 = math.exp %75 : vector<8x8xf32>
    %cst_24 = arith.constant dense<0.000000e+00> : vector<8xf32>
    %77 = vector.multi_reduction <add>, %76, %cst_24 [1] : vector<8x8xf32> to vector<8xf32>
    %78 = vector.shape_cast %77 : vector<8xf32> to vector<8x1xf32>
    %79 = arith.truncf %76 : vector<8x8xf32> to vector<8x8xbf16>
    %cst_25 = arith.constant dense<0.000000e+00> : vector<8x32xf32>
    %80 = tpu.matmul %79, %70, %cst_25 {dimension_numbers = #tpu.dot_dimension_numbers<[1], [0], [0], [1], [0, 0, 1, 1], [], []>} : vector<8x8xbf16>, vector<8x32xbf16>, vector<8x32xf32> -> vector<8x32xf32>
    %81 = tpu.reciprocal %78 {approx = true} : vector<8x1xf32> -> vector<8x1xf32>
    %82 = vector.broadcast %81 : vector<8x1xf32> to vector<8x32xf32>
    %83 = arith.mulf %80, %82 : vector<8x32xf32>
    %84 = arith.truncf %83 : vector<8x32xf32> to vector<8x32xbf16>
    %85 = vector.extract_strided_slice %11 {offsets = [64, 0], sizes = [32, 128], strides = [1, 1]} : vector<128x128xbf16> to vector<32x128xbf16>
    %cst_26 = arith.constant dense<0.000000e+00> : vector<8x128xf32>
    %86 = tpu.matmul %84, %85, %cst_26 {dimension_numbers = #tpu.dot_dimension_numbers<[1], [0], [0], [1], [0, 0, 1, 1], [], []>} : vector<8x32xbf16>, vector<32x128xbf16>, vector<8x128xf32> -> vector<8x128xf32>
    %87 = arith.addf %62, %86 : vector<8x128xf32>
    %88 = vector.extract_strided_slice %8 {offsets = [0, 96], sizes = [8, 32], strides = [1, 1]} : vector<8x128xf32> to vector<8x32xf32>
    %cst_27 = arith.constant 0.176776692 : f32
    %89 = vector.broadcast %cst_27 : f32 to vector<8x32xf32>
    %90 = arith.mulf %88, %89 : vector<8x32xf32>
    %91 = arith.truncf %90 : vector<8x32xf32> to vector<8x32xbf16>
    %92 = vector.extract_strided_slice %9 {offsets = [0, 96], sizes = [8, 32], strides = [1, 1]} : vector<8x128xf32> to vector<8x32xf32>
    %93 = arith.truncf %92 : vector<8x32xf32> to vector<8x32xbf16>
    %94 = vector.extract_strided_slice %10 {offsets = [0, 96], sizes = [8, 32], strides = [1, 1]} : vector<8x128xf32> to vector<8x32xf32>
    %95 = arith.truncf %94 : vector<8x32xf32> to vector<8x32xbf16>
    %cst_28 = arith.constant dense<0.000000e+00> : vector<8x8xf32>
    %96 = tpu.matmul %91, %93, %cst_28 {dimension_numbers = #tpu.dot_dimension_numbers<[1], [1], [0], [0], [0, 0, 1, 0], [], []>} : vector<8x32xbf16>, vector<8x32xbf16>, vector<8x8xf32> -> vector<8x8xf32>
    %cst_29 = arith.constant dense<0xFF800000> : vector<8xf32>
    %97 = vector.multi_reduction <maximumf>, %96, %cst_29 [1] : vector<8x8xf32> to vector<8xf32>
    %98 = vector.shape_cast %97 : vector<8xf32> to vector<8x1xf32>
    %99 = vector.broadcast %98 : vector<8x1xf32> to vector<8x8xf32>
    %100 = arith.subf %96, %99 : vector<8x8xf32>
    %101 = math.exp %100 : vector<8x8xf32>
    %cst_30 = arith.constant dense<0.000000e+00> : vector<8xf32>
    %102 = vector.multi_reduction <add>, %101, %cst_30 [1] : vector<8x8xf32> to vector<8xf32>
    %103 = vector.shape_cast %102 : vector<8xf32> to vector<8x1xf32>
    %104 = arith.truncf %101 : vector<8x8xf32> to vector<8x8xbf16>
    %cst_31 = arith.constant dense<0.000000e+00> : vector<8x32xf32>
    %105 = tpu.matmul %104, %95, %cst_31 {dimension_numbers = #tpu.dot_dimension_numbers<[1], [0], [0], [1], [0, 0, 1, 1], [], []>} : vector<8x8xbf16>, vector<8x32xbf16>, vector<8x32xf32> -> vector<8x32xf32>
    %106 = tpu.reciprocal %103 {approx = true} : vector<8x1xf32> -> vector<8x1xf32>
    %107 = vector.broadcast %106 : vector<8x1xf32> to vector<8x32xf32>
    %108 = arith.mulf %105, %107 : vector<8x32xf32>
    %109 = arith.truncf %108 : vector<8x32xf32> to vector<8x32xbf16>
    %110 = vector.extract_strided_slice %11 {offsets = [96, 0], sizes = [32, 128], strides = [1, 1]} : vector<128x128xbf16> to vector<32x128xbf16>
    %cst_32 = arith.constant dense<0.000000e+00> : vector<8x128xf32>
    %111 = tpu.matmul %109, %110, %cst_32 {dimension_numbers = #tpu.dot_dimension_numbers<[1], [0], [0], [1], [0, 0, 1, 1], [], []>} : vector<8x32xbf16>, vector<32x128xbf16>, vector<8x128xf32> -> vector<8x128xf32>
    %112 = arith.addf %87, %111 : vector<8x128xf32>
    %113 = arith.addf %1, %112 : vector<8x128xf32>
    %c0_33 = arith.constant 0 : index
    %c0_34 = arith.constant 0 : index
    %114 = vector.load %arg5[%c0_33, %c0_34] : memref<1x128xf32, #tpu.memory_space<vmem>>, vector<1x128xf32>
    %115 = vector.broadcast %114 : vector<1x128xf32> to vector<8x128xf32>
    %116 = arith.addf %113, %115 : vector<8x128xf32>
    %c0_35 = arith.constant 0 : index
    %c0_36 = arith.constant 0 : index
    %117 = vector.load %arg6[%c0_35, %c0_36] : memref<1x128xf32, #tpu.memory_space<vmem>>, vector<1x128xf32>
    %c0_37 = arith.constant 0 : index
    %c0_38 = arith.constant 0 : index
    %118 = vector.load %arg7[%c0_37, %c0_38] : memref<1x128xf32, #tpu.memory_space<vmem>>, vector<1x128xf32>
    %cst_39 = arith.constant dense<0.000000e+00> : vector<8xf32>
    %119 = vector.multi_reduction <add>, %116, %cst_39 [1] : vector<8x128xf32> to vector<8xf32>
    %120 = vector.shape_cast %119 : vector<8xf32> to vector<8x1xf32>
    %cst_40 = arith.constant 1.280000e+02 : f32
    %121 = vector.broadcast %cst_40 : f32 to vector<8x1xf32>
    %122 = arith.divf %120, %121 : vector<8x1xf32>
    %123 = vector.broadcast %122 : vector<8x1xf32> to vector<8x128xf32>
    %124 = arith.subf %116, %123 : vector<8x128xf32>
    %125 = arith.mulf %124, %124 : vector<8x128xf32>
    %cst_41 = arith.constant dense<0.000000e+00> : vector<8xf32>
    %126 = vector.multi_reduction <add>, %125, %cst_41 [1] : vector<8x128xf32> to vector<8xf32>
    %127 = vector.shape_cast %126 : vector<8xf32> to vector<8x1xf32>
    %cst_42 = arith.constant 1.280000e+02 : f32
    %128 = vector.broadcast %cst_42 : f32 to vector<8x1xf32>
    %129 = arith.divf %127, %128 : vector<8x1xf32>
    %130 = vector.broadcast %122 : vector<8x1xf32> to vector<8x128xf32>
    %131 = arith.subf %116, %130 : vector<8x128xf32>
    %cst_43 = arith.constant 9.99999974E-6 : f32
    %132 = vector.broadcast %cst_43 : f32 to vector<8x1xf32>
    %133 = arith.addf %129, %132 : vector<8x1xf32>
    %134 = math.rsqrt %133 : vector<8x1xf32>
    %135 = vector.broadcast %134 : vector<8x1xf32> to vector<8x128xf32>
    %136 = arith.mulf %131, %135 : vector<8x128xf32>
    %137 = vector.broadcast %117 : vector<1x128xf32> to vector<8x128xf32>
    %138 = arith.mulf %136, %137 : vector<8x128xf32>
    %139 = vector.broadcast %118 : vector<1x128xf32> to vector<8x128xf32>
    %140 = arith.addf %138, %139 : vector<8x128xf32>
    %c0_44 = arith.constant 0 : index
    %c0_45 = arith.constant 0 : index
    %c0_46 = arith.constant 0 : index
    %141 = vector.load %arg8[%c0_44, %c0_45, %c0_46] : memref<1x8x128xf32, #tpu.memory_space<vmem>>, vector<1x8x128xf32>
    %142 = vector.shape_cast %141 : vector<1x8x128xf32> to vector<8x128xf32>
    %143 = vector.shape_cast %140 : vector<8x128xf32> to vector<1x8x128xf32>
    tpu.vector_store %arg8[%c0_44, %c0_45, %c0_46], %143 {strides = array<i32>} : memref<1x8x128xf32, #tpu.memory_space<vmem>>, vector<1x8x128xf32>,
    return
  }
  func.func @transform_0(%arg0: i32) -> (i32, i32, i32) {
    %c0_i32 = arith.constant 0 : i32
    %c0_i32_0 = arith.constant 0 : i32
    %c0_i32_1 = arith.constant 0 : i32
    return %arg0, %c0_i32, %c0_i32_0 : i32, i32, i32
  }
  func.func @transform_1(%arg0: i32) -> (i32, i32) {
    %c0_i32 = arith.constant 0 : i32
    %c0_i32_0 = arith.constant 0 : i32
    %c0_i32_1 = arith.constant 0 : i32
    return %c0_i32, %c0_i32_0 : i32, i32
  }
  func.func @transform_2(%arg0: i32) -> (i32, i32) {
    %c0_i32 = arith.constant 0 : i32
    %c0_i32_0 = arith.constant 0 : i32
    %c0_i32_1 = arith.constant 0 : i32
    return %c0_i32, %c0_i32_0 : i32, i32
  }
  func.func @transform_3(%arg0: i32) -> (i32, i32) {
    %c0_i32 = arith.constant 0 : i32
    %c0_i32_0 = arith.constant 0 : i32
    %c0_i32_1 = arith.constant 0 : i32
    return %c0_i32, %c0_i32_0 : i32, i32
  }
  func.func @transform_4(%arg0: i32) -> (i32, i32) {
    %c0_i32 = arith.constant 0 : i32
    %c0_i32_0 = arith.constant 0 : i32
    %c0_i32_1 = arith.constant 0 : i32
    return %c0_i32, %c0_i32_0 : i32, i32
  }
  func.func @transform_5(%arg0: i32) -> (i32, i32) {
    %c0_i32 = arith.constant 0 : i32
    %c0_i32_0 = arith.constant 0 : i32
    %c0_i32_1 = arith.constant 0 : i32
    return %c0_i32, %c0_i32_0 : i32, i32
  }
  func.func @transform_6(%arg0: i32) -> (i32, i32) {
    %c0_i32 = arith.constant 0 : i32
    %c0_i32_0 = arith.constant 0 : i32
    %c0_i32_1 = arith.constant 0 : i32
    return %c0_i32, %c0_i32_0 : i32, i32
  }
  func.func @transform_7(%arg0: i32) -> (i32, i32, i32) {
    %c0_i32 = arith.constant 0 : i32
    %c0_i32_0 = arith.constant 0 : i32
    %c0_i32_1 = arith.constant 0 : i32
    return %arg0, %c0_i32, %c0_i32_0 : i32, i32, i32
  }
}

module attributes {stable_mosaic.version = 11 : i64} {
  func.func @_ln_linear_kernel(%arg0: i32, %arg1: i32, %arg2: memref<8x128xf32, #tpu.memory_space<vmem>>, %arg3: memref<1x128xf32, #tpu.memory_space<vmem>>, %arg4: memref<1x128xf32, #tpu.memory_space<vmem>>, %arg5: memref<128x256xbf16, #tpu.memory_space<vmem>>, %arg6: memref<1x256xf32, #tpu.memory_space<vmem>>, %arg7: memref<8x256xf32, #tpu.memory_space<vmem>>) attributes {dimension_semantics = [#tpu.dimension_semantics<parallel>, #tpu.dimension_semantics<parallel>], iteration_bounds = array<i64: 2, 1>, scalar_prefetch = 0 : i64, scratch_operands = 0 : i64, tpu.core_type = #tpu.core_type<tc>, window_params = [{transform_indices = @transform_0, window_bounds = array<i64: 8, 128>}, {pipeline_mode = #tpu.pipeline_mode<synchronous>, transform_indices = @transform_1, window_bounds = array<i64: 1, 128>}, {pipeline_mode = #tpu.pipeline_mode<synchronous>, transform_indices = @transform_2, window_bounds = array<i64: 1, 128>}, {transform_indices = @transform_3, window_bounds = array<i64: 128, 256>}, {transform_indices = @transform_4, window_bounds = array<i64: 1, 256>}, {transform_indices = @transform_5, window_bounds = array<i64: 8, 256>}]} {
    %c0 = arith.constant 0 : index
    %c0_0 = arith.constant 0 : index
    %0 = vector.load %arg2[%c0, %c0_0] : memref<8x128xf32, #tpu.memory_space<vmem>>, vector<8x128xf32>
    %c0_1 = arith.constant 0 : index
    %c0_2 = arith.constant 0 : index
    %1 = vector.load %arg3[%c0_1, %c0_2] : memref<1x128xf32, #tpu.memory_space<vmem>>, vector<1x128xf32>
    %c0_3 = arith.constant 0 : index
    %c0_4 = arith.constant 0 : index
    %2 = vector.load %arg4[%c0_3, %c0_4] : memref<1x128xf32, #tpu.memory_space<vmem>>, vector<1x128xf32>
    %cst = arith.constant dense<0.000000e+00> : vector<8xf32>
    %3 = vector.multi_reduction <add>, %0, %cst [1] : vector<8x128xf32> to vector<8xf32>
    %4 = vector.shape_cast %3 : vector<8xf32> to vector<8x1xf32>
    %cst_5 = arith.constant 1.280000e+02 : f32
    %5 = vector.broadcast %cst_5 : f32 to vector<8x1xf32>
    %6 = arith.divf %4, %5 : vector<8x1xf32>
    %7 = vector.broadcast %6 : vector<8x1xf32> to vector<8x128xf32>
    %8 = arith.subf %0, %7 : vector<8x128xf32>
    %9 = arith.mulf %8, %8 : vector<8x128xf32>
    %cst_6 = arith.constant dense<0.000000e+00> : vector<8xf32>
    %10 = vector.multi_reduction <add>, %9, %cst_6 [1] : vector<8x128xf32> to vector<8xf32>
    %11 = vector.shape_cast %10 : vector<8xf32> to vector<8x1xf32>
    %cst_7 = arith.constant 1.280000e+02 : f32
    %12 = vector.broadcast %cst_7 : f32 to vector<8x1xf32>
    %13 = arith.divf %11, %12 : vector<8x1xf32>
    %14 = vector.broadcast %6 : vector<8x1xf32> to vector<8x128xf32>
    %15 = arith.subf %0, %14 : vector<8x128xf32>
    %cst_8 = arith.constant 9.99999974E-6 : f32
    %16 = vector.broadcast %cst_8 : f32 to vector<8x1xf32>
    %17 = arith.addf %13, %16 : vector<8x1xf32>
    %18 = math.rsqrt %17 : vector<8x1xf32>
    %19 = vector.broadcast %18 : vector<8x1xf32> to vector<8x128xf32>
    %20 = arith.mulf %15, %19 : vector<8x128xf32>
    %21 = vector.broadcast %1 : vector<1x128xf32> to vector<8x128xf32>
    %22 = arith.mulf %20, %21 : vector<8x128xf32>
    %23 = vector.broadcast %2 : vector<1x128xf32> to vector<8x128xf32>
    %24 = arith.addf %22, %23 : vector<8x128xf32>
    %25 = arith.truncf %24 : vector<8x128xf32> to vector<8x128xbf16>
    %c0_9 = arith.constant 0 : index
    %c0_10 = arith.constant 0 : index
    %26 = vector.load %arg5[%c0_9, %c0_10] : memref<128x256xbf16, #tpu.memory_space<vmem>>, vector<128x256xbf16>
    %cst_11 = arith.constant dense<0.000000e+00> : vector<8x256xf32>
    %27 = tpu.matmul %25, %26, %cst_11 {dimension_numbers = #tpu.dot_dimension_numbers<[1], [0], [0], [1], [0, 0, 1, 1], [], []>} : vector<8x128xbf16>, vector<128x256xbf16>, vector<8x256xf32> -> vector<8x256xf32>
    %c0_12 = arith.constant 0 : index
    %c0_13 = arith.constant 0 : index
    %28 = vector.load %arg6[%c0_12, %c0_13] : memref<1x256xf32, #tpu.memory_space<vmem>>, vector<1x256xf32>
    %29 = vector.broadcast %28 : vector<1x256xf32> to vector<8x256xf32>
    %30 = arith.addf %27, %29 : vector<8x256xf32>
    %c0_14 = arith.constant 0 : index
    %c0_15 = arith.constant 0 : index
    %31 = vector.load %arg7[%c0_14, %c0_15] : memref<8x256xf32, #tpu.memory_space<vmem>>, vector<8x256xf32>
    tpu.vector_store %arg7[%c0_14, %c0_15], %30 {strides = array<i32>} : memref<8x256xf32, #tpu.memory_space<vmem>>, vector<8x256xf32>,
    return
  }
  func.func @transform_0(%arg0: i32, %arg1: i32) -> (i32, i32) {
    %c0_i32 = arith.constant 0 : i32
    %c0_i32_0 = arith.constant 0 : i32
    return %arg0, %c0_i32 : i32, i32
  }
  func.func @transform_1(%arg0: i32, %arg1: i32) -> (i32, i32) {
    %c0_i32 = arith.constant 0 : i32
    %c0_i32_0 = arith.constant 0 : i32
    %c0_i32_1 = arith.constant 0 : i32
    return %c0_i32, %c0_i32_0 : i32, i32
  }
  func.func @transform_2(%arg0: i32, %arg1: i32) -> (i32, i32) {
    %c0_i32 = arith.constant 0 : i32
    %c0_i32_0 = arith.constant 0 : i32
    %c0_i32_1 = arith.constant 0 : i32
    return %c0_i32, %c0_i32_0 : i32, i32
  }
  func.func @transform_3(%arg0: i32, %arg1: i32) -> (i32, i32) {
    %c0_i32 = arith.constant 0 : i32
    %c0_i32_0 = arith.constant 0 : i32
    return %c0_i32, %arg1 : i32, i32
  }
  func.func @transform_4(%arg0: i32, %arg1: i32) -> (i32, i32) {
    %c0_i32 = arith.constant 0 : i32
    %c0_i32_0 = arith.constant 0 : i32
    return %c0_i32, %arg1 : i32, i32
  }
  func.func @transform_5(%arg0: i32, %arg1: i32) -> (i32, i32) {
    %c0_i32 = arith.constant 0 : i32
    return %arg0, %arg1 : i32, i32
  }
}

</mosaic_0001>

<bundles_post_ra>
// kernel: transformer_forward.16
= control target key start
LH: loop header
LB: loop body
LE: loop exit
PB: predicated region body
PF: predicated region fallthrough
CT: control target
= control target key end

     0   :  { %8 = vsyncpa [#allocation3], 0  ;;  %s501_s0 = inlined_call_operand.vmem [shape: f32[16,128], index: 0, kind: input, shape index: {}]   ;;  %s502_s1 = inlined_call_operand.hbm [shape: f32[1,128], index: 1, kind: input, shape index: {}]   ;;  %s503_s2 = inlined_call_operand.hbm [shape: f32[1,128], index: 2, kind: input, shape index: {}]   ;;  %s504_s3 = inlined_call_operand.vmem [shape: f32[16,128], index: 3, kind: output, shape index: {}]  }
   0x1   :  { %9 = vsyncpa [#allocation5], 0  ;;  %s458_s12 = smov 0  }
   0x2 LB: > { %s126_s15 = sshll.u32 %s502_s1, 4  ;;  %s310_s16 = sadd.s32 4294967295, %s433_s12   ;;  %s433_s12 = sphi %s458_s12, %s15_s12   ;;  %s127_s15 = int_to_ptr.hbm [resolvable:$true] %s126_s15 }
   0x3   : > { %p312_p0 = scmp.ge.s32.totalorder %s433_s12, 1  ;;  %p114_p1 = scmp.lt.s32.totalorder %s433_s12, 3 }
   0x4   : > { %p338_p2 = scmp.eq.s32.totalorder %s310_s16, 0  ;;  %s435_s18 = smov [#allocation2]  }
   0x5   : > { %p469_p3 = pnand %p312_p0, %p114_p1  ;;  %s128_s19 = sshll.u32 %s435_s18, 4  ;;  %s129_s19 = int_to_ptr.vmem [resolvable:$true] %s128_s19 }
   0x6   : > { %s138_s22 = sshll.u32 %s503_s2, 4  ;;  %s436_s23 = smov [#allocation4]   ;;  %s139_s22 = int_to_ptr.hbm [resolvable:$true] %s138_s22 }
   0x7   : > { %p331_p4 = pneg %p469_p3  ;;  %s140_s24 = sshll.u32 %s436_s23, 4  ;;  %s141_s24 = int_to_ptr.vmem [resolvable:$true] %s140_s24 }
   0x8   : > { %160 = sbr.rel (%p469_p3) target bundleno = 289 (0x121), region = 32 }
   0x9   : > { %p332_p5 = pnand %p338_p2, %p331_p4 }
   0xb   : > { %334 = dma.hbm_to_vmem [thread:$0]  (!%p332_p5), %s127_s15, 16, %s129_s19, [#allocation3]  }
   0xc   : > { %337 = dma.hbm_to_vmem [thread:$0]  (!%p332_p5), %s139_s22, 16, %s141_s24, [#allocation5]  }
   0xd   : > { %424 = dma.done.wait (%p338_p2), [#allocation3], 16  }
   0xe   : > { %426 = vsyncadd (%p338_p2), [#allocation3], 4294967280 }
   0xf   : > { %428 = dma.done.wait (%p338_p2), [#allocation5], 16  }
  0x10   : > { %430 = vsyncadd (%p338_p2), [#allocation5], 4294967280  ;;  %p188_p6 = scmp.lt.s32.totalorder %s310_s16, 1  ;;  %v437_v1 = vmov 128.0   ;;  %v353_v21 = vld [vmem:[#allocation2] ss:$0 sm:$0xff] }
  0x11   : > { %355 = vrcp.f32 %v437_v1  ;;  %v354_v23 = vld [vmem:[#allocation4] ss:$0 sm:$0xff] }
  0x12   : > { %s507_s16 = smov (!%p188_p6, %s310_s16), 1 }
  0x13   : > { %s319_s25 = sshll.u32 %s507_s16, 3 }
  0x14   : > { %s191_s28 = scalar_lea.vmem %s501_s0, %s319_s25  ;;  %s195_s4 = scalar_lea.vmem %s504_s3, %s319_s25 }
  0x15   : > { %v196_v0 = vld [vmem:[%s191_s28] sm:$0xff] }
  0x16   : > { %199 = vadd.xlane.f32.xlu0 %v196_v0 }
  0x17   : > { %v356_v2 = vpop.eup %355 }
  0x18   : > { %v202_v3 = vmul.f32 128.0, %v356_v2  ;;  %vm206_vm0 = vweird.f32 %v356_v2 }
  0x1a   : > { %v203_v4 = vsub.f32 1.0, %v202_v3 }
  0x1c   : > { %v204_v5 = vmul.f32 %v356_v2, %v203_v4 }
  0x1e   : > { %v205_v6 = vadd.f32 %v356_v2, %v204_v5 }
  0x20   : > { %v207_v7 = vsel %vm206_vm0, %v356_v2, %v205_v6 }
  0x89   : > { %v200_v8 = vpop.xlane.xlu0 %199 }
  0x8a   : > { %v208_v9 = vmul.f32 %v207_v7, %v200_v8 }
  0x8c   : > { %v209_v10 = vsub.f32 %v196_v0, %v208_v9 }
  0x8e   : > { %v210_v11 = vmul.f32 %v209_v10, %v209_v10 }
  0x90   : > { %211 = vadd.xlane.f32.xlu0 %v210_v11 }
 0x103   : > { %v212_v12 = vpop.xlane.xlu0 %211 }
 0x104   : > { %v213_v13 = vmul.f32 %v212_v12, %v207_v7 }
 0x106   : > { %v214_v14 = vadd.f32 1e-05, %v213_v13 }
 0x108   : > { %357 = vrsqrt.f32 %v214_v14  ;;  %vm221_vm2 = vweird.f32 %v214_v14 }
 0x10e   : > { %v358_v15 = vpop.eup %357 }
 0x10f   : > { %v216_v16 = vmul.f32 %v358_v15, %v214_v14  ;;  %vm222_vm1 = vweird.f32 %v358_v15 }
 0x110   : > { %vm223_vm3 = vmor %vm221_vm2, %vm222_vm1 }
 0x111   : > { %v217_v17 = vmul.f32 %v358_v15, %v216_v16 }
 0x113   : > { %v218_v18 = vmul.f32 0.5, %v217_v17 }
 0x115   : > { %v219_v19 = vsub.f32 1.5, %v218_v18 }
 0x117   : > { %v220_v20 = vmul.f32 %v358_v15, %v219_v19 }
 0x119   : > { %v224_v22 = vsel %vm223_vm3, %v358_v15, %v220_v20 }
 0x11a   : > { %v225_v24 = vmul.f32 %v224_v22, %v209_v10 }
 0x11c   : > { %v229_v25 = vmul.f32 %v353_v21, %v225_v24 }
 0x11e   : > { %v233_v26 = vadd.f32 %v354_v23, %v229_v25 }
 0x120   : > { %234 = vst [vmem:[%s195_s4] sm:$0xff] %v233_v26 }
 0x121 PF: > { %s15_s12 = sadd.s32 1, %s433_s12  }
 0x122   : > { %p12_p7 = scmp.ge.s32.totalorder %s15_s12, 4  }
 0x124   :  { %14 = sbr.rel (!%p12_p7) target bundleno = 2 (0x2), region = 71 }
 0x129   :  { %254 = vsyncpa [#allocation3], 1 }
 0x12a   :  { %256 = vsyncpa [#allocation3 + $0x1], 1 }
 0x12b   :  { %257 = vsyncpa [#allocation5], 1 }

// kernel: transformer_forward.13
= control target key start
LH: loop header
LB: loop body
LE: loop exit
PB: predicated region body
PF: predicated region fallthrough
CT: control target
= control target key end

     0   :  { %12 = vsyncpa [#allocation3], 0  ;;  %s1416_s0 = inlined_call_operand.vmem [shape: f32[16,128], index: 0, kind: input, shape index: {}]   ;;  %s1417_s1 = inlined_call_operand.hbm [shape: bf16[128,256], index: 1, kind: input, shape index: {}]   ;;  %s1418_s2 = inlined_call_operand.hbm [shape: f32[1,256], index: 2, kind: input, shape index: {}]   ;;  %s1419_s3 = inlined_call_operand.hbm [shape: bf16[256,128], index: 3, kind: input, shape index: {}]   ;;  %s1420_s4 = inlined_call_operand.hbm [shape: f32[1,128], index: 4, kind: input, shape index: {}]   ;;  %s1421_s5 = inlined_call_operand.hbm [shape: f32[1,128], index: 5, kind: input, shape index: {}]   ;;  %s1422_s6 = inlined_call_operand.hbm [shape: f32[1,128], index: 6, kind: input, shape index: {}]   ;;  %s1423_s7 = inlined_call_operand.vmem [shape: f32[16,128], index: 7, kind: output, shape index: {}]  }
   0x1   :  { %13 = vsyncpa [#allocation5], 0 }
   0x2   :  { %14 = vsyncpa [#allocation8], 0 }
   0x3   :  { %15 = vsyncpa [#allocation11], 0  ;;  %s1327_s24 = smov 0  }
   0x4 LB: > { %s230_s27 = sshll.u32 %s1418_s2, 4  ;;  %s1336_s28 = sadd.s32 4294967295, %s1274_s24   ;;  %s1274_s24 = sphi %s1327_s24, %s21_s24   ;;  %s231_s27 = int_to_ptr.hbm [resolvable:$true] %s230_s27 }
   0x5   : > { %p812_p0 = scmp.ge.s32.totalorder %s1274_s24, 1  ;;  %p204_p1 = scmp.lt.s32.totalorder %s1274_s24, 3 }
   0x6   : > { %p1034_p2 = scmp.eq.s32.totalorder %s1336_s28, 0  ;;  %s1276_s30 = smov [#allocation4]  }
   0x7   : > { %p1341_p3 = pnand %p812_p0, %p204_p1  ;;  %s232_s8 = sshll.u32 %s1276_s30, 4  ;;  %s233_s8 = int_to_ptr.vmem [resolvable:$true] %s232_s8 }
   0x8   : > { %s256_s11 = sshll.u32 %s1420_s4, 4  ;;  %s215_s14 = sshll.u32 %s1417_s1, 4  ;;  %s257_s11 = int_to_ptr.hbm [resolvable:$true] %s256_s11  ;;  %s216_s14 = int_to_ptr.hbm [resolvable:$true] %s215_s14 }
   0x9   : > { %p1015_p4 = pneg %p1341_p3  ;;  %s1277_s16 = smov [#allocation7]  }
   0xa   : > { %s258_s17 = sshll.u32 %s1277_s16, 4  ;;  %s1278_s18 = smov [#allocation2]   ;;  %s259_s17 = int_to_ptr.vmem [resolvable:$true] %s258_s17 }
   0xb   : > { %p1355_p5 = pnand %p1034_p2, %p1015_p4  ;;  %s217_s19 = sshll.u32 %s1278_s18, 4  ;;  %s218_s19 = int_to_ptr.vmem [resolvable:$true] %s217_s19 }
   0xc   : > { %s1279_s20 = smov 128   ;;  %s1280_s21 = smov 8  }
   0xd   : > { %1021 = dma.hbm_to_vmem [thread:$0]  (!%p1355_p5), %s231_s27, 32, %s233_s8, [#allocation5]  }
   0xe   : > { %1027 = dma.hbm_to_vmem [thread:$0]  (!%p1355_p5), %s257_s11, 16, %s259_s17, [#allocation8]  }
   0xf   : > { %1018 = dma.hbm_to_vmem [thread:$0]  (!%p1355_p5), %s216_s14, 2048, %s218_s19, [#allocation3], %s1279_s20, %s1279_s20, %s1280_s21  }
  0x10   : > { %s241_s25 = sshll.u32 %s1419_s3, 4  ;;  %s1281_s26 = smov [#allocation6]   ;;  %s242_s25 = int_to_ptr.hbm [resolvable:$true] %s241_s25 }
  0x11   : > { %s243_s30 = sshll.u32 %s1281_s26, 4  ;;  %s268_s9 = sshll.u32 %s1421_s5, 4  ;;  %s244_s30 = int_to_ptr.vmem [resolvable:$true] %s243_s30  ;;  %s269_s9 = int_to_ptr.hbm [resolvable:$true] %s268_s9 }
  0x12   : > { %s1282_s10 = smov 64   ;;  %s1283_s11 = smov 4  }
  0x13   : > { %1024 = dma.hbm_to_vmem [thread:$0]  (!%p1355_p5), %s242_s25, 2048, %s244_s30, [#allocation5], %s1282_s10, %s1282_s10, %s1283_s11  }
  0x14   : > { %s1284_s12 = smov [#allocation9]   ;;  %s280_s17 = sshll.u32 %s1422_s6, 4  ;;  %s281_s17 = int_to_ptr.hbm [resolvable:$true] %s280_s17 }
  0x15   : > { %s270_s13 = sshll.u32 %s1284_s12, 4  ;;  %s1285_s18 = smov [#allocation10]   ;;  %s271_s13 = int_to_ptr.vmem [resolvable:$true] %s270_s13 }
  0x16   : > { %1030 = dma.hbm_to_vmem [thread:$0]  (!%p1355_p5), %s269_s9, 16, %s271_s13, [#allocation8]  }
  0x17   : > { %s282_s19 = sshll.u32 %s1285_s18, 4  ;;  %302 = sbr.rel (%p1341_p3) target bundleno = 606 (0x25e), region = 48  ;;  %s283_s19 = int_to_ptr.vmem [resolvable:$true] %s282_s19 }
  0x18   : > { %1033 = dma.hbm_to_vmem [thread:$0]  (!%p1355_p5), %s281_s17, 16, %s283_s19, [#allocation11]  }
  0x1c   : > { %1257 = dma.done.wait (%p1034_p2), [#allocation3], 2048  }
  0x1d   : > { %1259 = vsyncadd (%p1034_p2), [#allocation3], 4294965248 }
  0x1e   : > { %1261 = dma.done.wait (%p1034_p2), [#allocation5], 2080  }
  0x1f   : > { %1263 = vsyncadd (%p1034_p2), [#allocation5], 4294965216 }
  0x20   : > { %1265 = dma.done.wait (%p1034_p2), [#allocation8], 32  }
  0x21   : > { %1267 = vsyncadd (%p1034_p2), [#allocation8], 4294967264 }
  0x22   : > { %1269 = dma.done.wait (%p1034_p2), [#allocation11], 16  }
  0x23   : > { %1271 = vsyncadd (%p1034_p2), [#allocation11], 4294967280  ;;  %v887_v0 = vld [vmem:[#allocation2 + $0x70] sm:$0xf]  ;;  %v974_v1 = vld [vmem:[#allocation2 + $0x74] sm:$0xf0] }
  0x24   : > { %v973_v2 = vld [vmem:[#allocation2 + $0x74] sm:$0xf]  ;;  %v888_v3 = vor.u32 %v974_v1, %v887_v0  ;;  %v889_v4 = vld [vmem:[#allocation2 + $0x78] sm:$0xf0]  ;;  %v879_v5 = vld [vmem:[#allocation2 + $0x60] sm:$0xf] }
  0x25   : > { %v972_v6 = vld [vmem:[#allocation2 + $0x64] sm:$0xf0]  ;;  %v892_v7 = vor.u32 %v973_v2, %v889_v4  ;;  %v971_v8 = vld [vmem:[#allocation2 + $0x64] sm:$0xf]  ;;  %v881_v9 = vld [vmem:[#allocation2 + $0x68] sm:$0xf0] }
  0x26   : > { %470 = vmatpush.bf16.msra.mxu0 %v888_v3  ;;  %v880_v10 = vor.u32 %v972_v6, %v879_v5  ;;  %v884_v11 = vor.u32 %v971_v8, %v881_v9  ;;  %v871_v12 = vld [vmem:[#allocation2 + $0x50] sm:$0xf]  ;;  %v970_v13 = vld [vmem:[#allocation2 + $0x54] sm:$0xf0]  ;;  %v969_v14 = vld [vmem:[#allocation2 + $0x54] sm:$0xf] }
  0x27   : > { %483 = vmatpush.bf16.msra.mxu1 %v892_v7  ;;  %v873_v15 = vld [vmem:[#allocation2 + $0x58] sm:$0xf0]  ;;  %v872_v16 = vor.u32 %v970_v13, %v871_v12  ;;  %v863_v18 = vld [vmem:[#allocation2 + $0x40] sm:$0xf]  ;;  %v968_v19 = vld [vmem:[#allocation2 + $0x44] sm:$0xf0] }
  0x28   : > { %v876_v17 = vor.u32 %v969_v14, %v873_v15  ;;  %v967_v20 = vld [vmem:[#allocation2 + $0x44] sm:$0xf]  ;;  %v865_v21 = vld [vmem:[#allocation2 + $0x48] sm:$0xf0]  ;;  %v864_v22 = vor.u32 %v968_v19, %v863_v18  ;;  %v982_v23 = vld [vmem:[#allocation6 + $0x38] sm:$0xff]  ;;  %p358_p6 = scmp.lt.s32.totalorder %s1336_s28, 1 }
  0x29   : > { %v990_v24 = vld [vmem:[#allocation6 + $0x78] sm:$0xff]  ;;  %v868_v25 = vor.u32 %v967_v20, %v865_v21  ;;  %v855_v26 = vld [vmem:[#allocation2 + $0x30] sm:$0xf]  ;;  %v965_v28 = vld [vmem:[#allocation2 + $0x34] sm:$0xf]  ;;  %632 = vmatpush.bf16.msra.mxu2 %v982_v23  ;;  %v1286_v23 = vmov 128.0  }
  0x2a   : > { %471 = vmatpush.bf16.msra.mxu0 %v880_v10  ;;  %v966_v27 = vld [vmem:[#allocation2 + $0x34] sm:$0xf0]  ;;  %v857_v29 = vld [vmem:[#allocation2 + $0x38] sm:$0xf0]  ;;  %645 = vmatpush.bf16.msra.mxu3 %v990_v24  ;;  %v847_v33 = vld [vmem:[#allocation2 + $0x20] sm:$0xf]  ;;  %1068 = vrcp.f32 %v1286_v23 }
  0x2b   : > { %484 = vmatpush.bf16.msra.mxu1 %v884_v11  ;;  %v981_v30 = vld [vmem:[#allocation6 + $0x30] sm:$0xff]  ;;  %v856_v32 = vor.u32 %v966_v27, %v855_v26  ;;  %v860_v34 = vor.u32 %v965_v28, %v857_v29  ;;  %v964_v35 = vld [vmem:[#allocation2 + $0x24] sm:$0xf0]  ;;  %v963_v36 = vld [vmem:[#allocation2 + $0x24] sm:$0xf]  ;;  %s1427_s28 = smov (!%p358_p6, %s1336_s28), 1 }
  0x2c   : > { %v989_v31 = vld [vmem:[#allocation6 + $0x70] sm:$0xff]  ;;  %v849_v37 = vld [vmem:[#allocation2 + $0x28] sm:$0xf0]  ;;  %v848_v40 = vor.u32 %v964_v35, %v847_v33  ;;  %v841_v45 = vld [vmem:[#allocation2 + $0x18] sm:$0xf0]  ;;  %s827_s29 = sshll.u32 %s1427_s28, 3 }
  0x2d   : > { %633 = vmatpush.bf16.msra.mxu2 %v981_v30  ;;  %v980_v38 = vld [vmem:[#allocation6 + $0x28] sm:$0xff]  ;;  %v852_v41 = vor.u32 %v963_v36, %v849_v37  ;;  %v962_v43 = vld [vmem:[#allocation2 + $0x14] sm:$0xf0]  ;;  %v961_v44 = vld [vmem:[#allocation2 + $0x14] sm:$0xf]  ;;  %s361_s21 = scalar_lea.vmem %s1416_s0, %s827_s29  ;;  %s365_s25 = scalar_lea.vmem %s1423_s7, %s827_s29 }
  0x2e   : > { %472 = vmatpush.bf16.msra.mxu0 %v872_v16  ;;  %646 = vmatpush.bf16.msra.mxu3 %v989_v31  ;;  %v988_v39 = vld [vmem:[#allocation6 + $0x68] sm:$0xff]  ;;  %v979_v46 = vld [vmem:[#allocation6 + $0x20] sm:$0xff]  ;;  %v844_v49 = vor.u32 %v961_v44, %v841_v45  ;;  %v978_v54 = vld [vmem:[#allocation6 + $0x18] sm:$0xff] }
  0x2f   : > { %485 = vmatpush.bf16.msra.mxu1 %v876_v17  ;;  %v839_v42 = vld [vmem:[#allocation2 + $0x10] sm:$0xf]  ;;  %v987_v47 = vld [vmem:[#allocation6 + $0x60] sm:$0xff]  ;;  %v833_v53 = vld [vmem:[#allocation2 + $0x8] sm:$0xf0] }
  0x30   : > { %v840_v48 = vor.u32 %v962_v43, %v839_v42  ;;  %v831_v50 = vld [vmem:[#allocation2] sm:$0xf]  ;;  %v960_v51 = vld [vmem:[#allocation2 + $0x4] sm:$0xf0]  ;;  %v959_v52 = vld [vmem:[#allocation2 + $0x4] sm:$0xf]  ;;  %v1069_v24 = vpop.eup %1068 }
  0x31   : > { %634 = vmatpush.bf16.msra.mxu2 %v980_v38  ;;  %v986_v55 = vld [vmem:[#allocation6 + $0x58] sm:$0xff]  ;;  %v832_v56 = vor.u32 %v960_v51, %v831_v50  ;;  %v836_v58 = vor.u32 %v959_v52, %v833_v53  ;;  %v977_v59 = vld [vmem:[#allocation6 + $0x10] sm:$0xff]  ;;  %v976_v62 = vld [vmem:[#allocation6 + $0x8] sm:$0xff]  ;;  %vm668_vm0 = vweird.f32 %v1069_v24 }
  0x32   : > { %473 = vmatpush.bf16.msra.mxu0 %v864_v22  ;;  %647 = vmatpush.bf16.msra.mxu3 %v988_v39  ;;  %v366_v57 = vld [vmem:[%s361_s21] sm:$0xff]  ;;  %v985_v60 = vld [vmem:[#allocation6 + $0x50] sm:$0xff]  ;;  %v984_v63 = vld [vmem:[#allocation6 + $0x48] sm:$0xff] }
  0x33   : > { %486 = vmatpush.bf16.msra.mxu1 %v868_v25  ;;  %v367_v61 = vpack.c.bf16 %v366_v57, %v366_v57  ;;  %v975_v0 = vld [vmem:[#allocation6] sm:$0xff]  ;;  %v384_v2 = vld [vmem:[#allocation4] sm:$0x3]  ;;  %v664_v25 = vmul.f32 128.0, %v1069_v24 }
  0x34   : > { %v983_v1 = vld [vmem:[#allocation6 + $0x40] sm:$0xff]  ;;  %v386_v3 = vperm.slane %v384_v2, 0  ;;  %v387_v4 = vperm.slane %v384_v2, 1 }
  0x35   : > { %635 = vmatpush.bf16.msra.mxu2 %v979_v46  ;;  %v1065_v15 = vld [vmem:[#allocation7] ss:$0 sm:$0xff]  ;;  %v665_v26 = vsub.f32 1.0, %v664_v25  ;;  %v1066_v43 = vld [vmem:[#allocation9] ss:$0 sm:$0xff] }
  0x36   : > { %474 = vmatpush.bf16.msra.mxu0 %v856_v32  ;;  %648 = vmatpush.bf16.msra.mxu3 %v987_v47  ;;  %v1067_v45 = vld [vmem:[#allocation10] ss:$0 sm:$0xff] }
  0x37   : > { %487 = vmatpush.bf16.msra.mxu1 %v860_v34  ;;  %v666_v27 = vmul.f32 %v1069_v24, %v665_v26 }
  0x39   : > { %636 = vmatpush.bf16.msra.mxu2 %v978_v54  ;;  %v667_v28 = vadd.f32 %v1069_v24, %v666_v27 }
  0x3a   : > { %475 = vmatpush.bf16.msra.mxu0 %v848_v40  ;;  %649 = vmatpush.bf16.msra.mxu3 %v986_v55 }
  0x3b   : > { %488 = vmatpush.bf16.msra.mxu1 %v852_v41  ;;  %v669_v29 = vsel %vm668_vm0, %v1069_v24, %v667_v28 }
  0x3d   : > { %637 = vmatpush.bf16.msra.mxu2 %v977_v59 }
  0x3e   : > { %476 = vmatpush.bf16.msra.mxu0 %v840_v48  ;;  %650 = vmatpush.bf16.msra.mxu3 %v985_v60 }
  0x3f   : > { %489 = vmatpush.bf16.msra.mxu1 %v844_v49 }
  0x41   : > { %638 = vmatpush.bf16.msra.mxu2 %v976_v62 }
  0x42   : > { %477 = vmatpush.bf16.msra.mxu0 %v832_v56  ;;  %651 = vmatpush.bf16.msra.mxu3 %v984_v63 }
  0x43   : > { %490 = vmatpush.bf16.msra.mxu1 %v836_v58 }
  0x45   : > { %478 = vmatmul.bf16.vlgmr.msra.gmra.mxu0 %v367_v61  ;;  %639 = vmatpush.bf16.msra.mxu2 %v975_v0 }
  0x46   : > { %491 = vmatmul.bf16.vlgmr.msra.gmra.mxu1 %v367_v61  ;;  %652 = vmatpush.bf16.msra.mxu3 %v983_v1 }
  0xc2   : > { %v479_v5 = vpop.f32.mrf.mxu0 }
  0xc3   : > { %v480_v6 = vadd.f32 %v479_v5, %v386_v3  ;;  %v492_v7 = vpop.f32.mrf.mxu1 }
  0xc4   : > { %v493_v8 = vadd.f32 %v492_v7, %v387_v4 }
  0xc5   : > { %v496_v9 = vmax.f32 %v480_v6, 0.0 }
  0xc6   : > { %v497_v10 = vmax.f32 %v493_v8, 0.0 }
  0xc7   : > { %v498_v11 = vpack.c.bf16 %v496_v9, %v496_v9 }
  0xc8   : > { %v499_v12 = vpack.c.bf16 %v497_v10, %v497_v10 }
  0xc9   : > { %640 = vmatmul.bf16.vlgmr.msra.gmra.mxu2 %v498_v11 }
  0xca   : > { %653 = vmatmul.bf16.vlgmr.msra.gmra.mxu3 %v499_v12  ;;  %v481_v13 = vpop.f32.mrf.mxu0 }
  0xcb   : > { %v494_v14 = vpop.f32.mrf.mxu1 }
 0x14c   : > { %v641_v16 = vpop.f32.mrf.mxu2 }
 0x14d   : > { %v642_v17 = vadd.f32 %v1065_v15, %v641_v16  ;;  %v654_v18 = vpop.f32.mrf.mxu3 }
 0x14f   : > { %v655_v19 = vadd.f32 %v654_v18, %v642_v17 }
 0x151   : > { %v658_v20 = vadd.f32 %v655_v19, %v366_v57 }
 0x153   : > { %661 = vadd.xlane.f32.xlu0 %v658_v20 }
 0x154   : > { %v643_v21 = vpop.f32.mrf.mxu2 }
 0x155   : > { %v656_v22 = vpop.f32.mrf.mxu3 }
 0x1c6   : > { %v662_v30 = vpop.xlane.xlu0 %661 }
 0x1c7   : > { %v670_v31 = vmul.f32 %v669_v29, %v662_v30 }
 0x1c9   : > { %v671_v32 = vsub.f32 %v658_v20, %v670_v31 }
 0x1cb   : > { %v672_v33 = vmul.f32 %v671_v32, %v671_v32 }
 0x1cd   : > { %673 = vadd.xlane.f32.xlu0 %v672_v33 }
 0x240   : > { %v674_v34 = vpop.xlane.xlu0 %673 }
 0x241   : > { %v675_v35 = vmul.f32 %v674_v34, %v669_v29 }
 0x243   : > { %v676_v36 = vadd.f32 1e-05, %v675_v35 }
 0x245   : > { %1070 = vrsqrt.f32 %v676_v36  ;;  %vm683_vm2 = vweird.f32 %v676_v36 }
 0x24b   : > { %v1071_v37 = vpop.eup %1070 }
 0x24c   : > { %v678_v38 = vmul.f32 %v1071_v37, %v676_v36  ;;  %vm684_vm1 = vweird.f32 %v1071_v37 }
 0x24d   : > { %vm685_vm3 = vmor %vm683_vm2, %vm684_vm1 }
 0x24e   : > { %v679_v39 = vmul.f32 %v1071_v37, %v678_v38 }
 0x250   : > { %v680_v40 = vmul.f32 0.5, %v679_v39 }
 0x252   : > { %v681_v41 = vsub.f32 1.5, %v680_v40 }
 0x254   : > { %v682_v42 = vmul.f32 %v1071_v37, %v681_v41 }
 0x256   : > { %v686_v44 = vsel %vm685_vm3, %v1071_v37, %v682_v42 }
 0x257   : > { %v687_v46 = vmul.f32 %v686_v44, %v671_v32 }
 0x259   : > { %v691_v47 = vmul.f32 %v1066_v43, %v687_v46 }
 0x25b   : > { %v695_v48 = vadd.f32 %v1067_v45, %v691_v47 }
 0x25d   : > { %696 = vst [vmem:[%s365_s25] sm:$0xff] %v695_v48 }
 0x25e PF: > { %s21_s24 = sadd.s32 1, %s1274_s24  }
 0x25f   : > { %p18_p7 = scmp.ge.s32.totalorder %s21_s24, 4  }
 0x261   :  { %20 = sbr.rel (!%p18_p7) target bundleno = 4 (0x4), region = 103 }
 0x266   :  { %716 = vsyncpa [#allocation3], 1 }
 0x267   :  { %718 = vsyncpa [#allocation3 + $0x1], 1 }
 0x268   :  { %719 = vsyncpa [#allocation5], 1 }
 0x269   :  { %720 = vsyncpa [#allocation8], 1 }
 0x26a   :  { %721 = vsyncpa [#allocation11], 1 }

// kernel: transformer_forward.18
= control target key start
LH: loop header
LB: loop body
LE: loop exit
PB: predicated region body
PF: predicated region fallthrough
CT: control target
= control target key end

     0   :  { %s2069_s0 = inlined_call_operand.vmem [shape: f32[2,8,128], index: 0, kind: input, shape index: {}]   ;;  %s2070_s1 = inlined_call_operand.vmem [shape: f32[2,8,128], index: 1, kind: input, shape index: {}]   ;;  %s2071_s2 = inlined_call_operand.hbm [shape: bf16[128,128], index: 2, kind: input, shape index: {}]   ;;  %s2072_s3 = inlined_call_operand.hbm [shape: f32[1,128], index: 3, kind: input, shape index: {}]   ;;  %s2073_s4 = inlined_call_operand.hbm [shape: bf16[128,256], index: 4, kind: input, shape index: {}]   ;;  %s2074_s5 = inlined_call_operand.hbm [shape: f32[1,256], index: 5, kind: input, shape index: {}]   ;;  %s2075_s6 = inlined_call_operand.hbm [shape: bf16[128,128], index: 6, kind: input, shape index: {}]   ;;  %s2076_s7 = inlined_call_operand.hbm [shape: f32[1,128], index: 7, kind: input, shape index: {}]   ;;  %s2077_s8 = inlined_call_operand.hbm [shape: f32[1,128], index: 8, kind: input, shape index: {}]   ;;  %s2078_s9 = inlined_call_operand.hbm [shape: f32[1,128], index: 9, kind: input, shape index: {}]   ;;  %s2079_s10 = inlined_call_operand.vmem [shape: f32[2,8,128], index: 10, kind: output, shape index: {}]  }
   0x1   :  { %2080 = sst [smem:[#allocation20_spill]] %s2071_s2 }
   0x2   :  { %15 = vsyncpa [#allocation3], 0 }
   0x3   :  { %16 = vsyncpa [#allocation5], 0 }
   0x4   :  { %17 = vsyncpa [#allocation8], 0 }
   0x5   :  { %18 = vsyncpa [#allocation11], 0 }
   0x6   :  { %19 = vsyncpa [#allocation14], 0  ;;  %s1917_s13 = smov 0  }
   0x7 LB: > { %s302_s16 = sshll.u32 %s2072_s3, 4  ;;  %s1926_s17 = sadd.s32 4294967295, %s1844_s13   ;;  %s1844_s13 = sphi %s1917_s13, %s25_s13   ;;  %s303_s16 = int_to_ptr.hbm [resolvable:$true] %s302_s16 }
   0x8   : > { %p1261_p0 = scmp.ge.s32.totalorder %s1844_s13, 1  ;;  %p276_p1 = scmp.lt.s32.totalorder %s1844_s13, 3 }
   0x9   : > { %p1514_p2 = scmp.eq.s32.totalorder %s1926_s17, 0  ;;  %s1846_s19 = smov [#allocation4]  }
   0xa   : > { %p1931_p3 = pnand %p1261_p0, %p276_p1  ;;  %s304_s20 = sshll.u32 %s1846_s19, 4  ;;  %s305_s20 = int_to_ptr.vmem [resolvable:$true] %s304_s20 }
   0xb   : > { %s328_s23 = sshll.u32 %s2074_s5, 4  ;;  %s354_s26 = sshll.u32 %s2076_s7, 4  ;;  %s329_s23 = int_to_ptr.hbm [resolvable:$true] %s328_s23  ;;  %s355_s26 = int_to_ptr.hbm [resolvable:$true] %s354_s26 }
   0xc   : > { %p1489_p4 = pneg %p1931_p3  ;;  %s1847_s28 = smov [#allocation7]  }
   0xd   : > { %s330_s29 = sshll.u32 %s1847_s28, 4  ;;  %s1848_s30 = smov [#allocation10]   ;;  %s331_s29 = int_to_ptr.vmem [resolvable:$true] %s330_s29 }
   0xe   : > { %p1945_p5 = pnand %p1514_p2, %p1489_p4  ;;  %s356_s11 = sshll.u32 %s1848_s30, 4  ;;  %s357_s11 = int_to_ptr.vmem [resolvable:$true] %s356_s11 }
   0xf   : > { %s2083_s2 = sld [smem:[#allocation20_spill]]  ;;  %s1849_s19 = smov [#allocation2]  }
  0x10   : > { %1495 = dma.hbm_to_vmem [thread:$0]  (!%p1945_p5), %s303_s16, 16, %s305_s20, [#allocation5]  }
  0x11   : > { %1501 = dma.hbm_to_vmem [thread:$0]  (!%p1945_p5), %s329_s23, 32, %s331_s29, [#allocation8]  }
  0x12   : > { %1507 = dma.hbm_to_vmem [thread:$0]  (!%p1945_p5), %s355_s26, 16, %s357_s11, [#allocation11]  }
  0x13   : > { %s289_s21 = sshll.u32 %s1849_s19, 4  ;;  %s313_s16 = sshll.u32 %s2073_s4, 4  ;;  %s290_s21 = int_to_ptr.vmem [resolvable:$true] %s289_s21  ;;  %s314_s16 = int_to_ptr.hbm [resolvable:$true] %s313_s16 }
  0x14   : > { %s1850_s20 = smov 64   ;;  %s1851_s23 = smov 4  }
  0x15   : > { %s287_s15 = sshll.u32 %s2083_s2, 4  ;;  %s1852_s25 = smov [#allocation6]   ;;  %s288_s15 = int_to_ptr.hbm [resolvable:$true] %s287_s15 }
  0x16   : > { %1492 = dma.hbm_to_vmem [thread:$0]  (!%p1945_p5), %s288_s15, 1024, %s290_s21, [#allocation3], %s1850_s20, %s1850_s20, %s1851_s23  }
  0x17   : > { %s315_s28 = sshll.u32 %s1852_s25, 4  ;;  %s1853_s29 = smov 128   ;;  %s316_s28 = int_to_ptr.vmem [resolvable:$true] %s315_s28 }
  0x18   : > { %s1854_s30 = smov 8   ;;  %s339_s12 = sshll.u32 %s2075_s6, 4  ;;  %s340_s12 = int_to_ptr.hbm [resolvable:$true] %s339_s12 }
  0x19   : > { %1498 = dma.hbm_to_vmem [thread:$0]  (!%p1945_p5), %s314_s16, 2048, %s316_s28, [#allocation5], %s1853_s29, %s1853_s29, %s1854_s30  }
  0x1a   : > { %s1855_s14 = smov [#allocation9]   ;;  %s366_s21 = sshll.u32 %s2077_s8, 4  ;;  %s367_s21 = int_to_ptr.hbm [resolvable:$true] %s366_s21 }
  0x1b   : > { %s341_s19 = sshll.u32 %s1855_s14, 4  ;;  %s1856_s24 = smov [#allocation12]   ;;  %s342_s19 = int_to_ptr.vmem [resolvable:$true] %s341_s19 }
  0x1c   : > { %1504 = dma.hbm_to_vmem [thread:$0]  (!%p1945_p5), %s340_s12, 1024, %s342_s19, [#allocation8], %s1850_s20, %s1850_s20, %s1851_s23  }
  0x1d   : > { %s368_s25 = sshll.u32 %s1856_s24, 4  ;;  %s378_s28 = sshll.u32 %s2078_s9, 4  ;;  %s369_s25 = int_to_ptr.vmem [resolvable:$true] %s368_s25  ;;  %s379_s28 = int_to_ptr.hbm [resolvable:$true] %s378_s28 }
  0x1e   : > { %1510 = dma.hbm_to_vmem [thread:$0]  (!%p1945_p5), %s367_s21, 16, %s369_s25, [#allocation11]  }
  0x1f   : > { %s1857_s29 = smov [#allocation13]   ;;  %407 = sbr.rel (%p1931_p3) target bundleno = 1441 (0x5a1), region = 60 }
  0x20   : > { %s380_s30 = sshll.u32 %s1857_s29, 4  ;;  %s381_s30 = int_to_ptr.vmem [resolvable:$true] %s380_s30 }
  0x21   : > { %1513 = dma.hbm_to_vmem [thread:$0]  (!%p1945_p5), %s379_s28, 16, %s381_s30, [#allocation14]  }
  0x24   : > { %1823 = dma.done.wait (%p1514_p2), [#allocation3], 1024  }
  0x25   : > { %1825 = vsyncadd (%p1514_p2), [#allocation3], 4294966272 }
  0x26   : > { %1827 = dma.done.wait (%p1514_p2), [#allocation5], 2064  }
  0x27   : > { %1829 = vsyncadd (%p1514_p2), [#allocation5], 4294965232 }
  0x28   : > { %1831 = dma.done.wait (%p1514_p2), [#allocation8], 1056  }
  0x29   : > { %1833 = vsyncadd (%p1514_p2), [#allocation8], 4294966240 }
  0x2a   : > { %1835 = dma.done.wait (%p1514_p2), [#allocation11], 32  }
  0x2b   : > { %1837 = vsyncadd (%p1514_p2), [#allocation11], 4294967264 }
  0x2c   : > { %1839 = dma.done.wait (%p1514_p2), [#allocation14], 16  }
  0x2d   : > { %1841 = vsyncadd (%p1514_p2), [#allocation14], 4294967280  ;;  %v1432_v0 = vld [vmem:[#allocation2 + $0x38] sm:$0xff]  ;;  %v1373_v1 = vld [vmem:[#allocation6 + $0x70] sm:$0xf]  ;;  %p483_p6 = scmp.lt.s32.totalorder %s1926_s17, 1 }
  0x2e   : > { %v1448_v2 = vld [vmem:[#allocation6 + $0x74] sm:$0xf0]  ;;  %v1365_v4 = vld [vmem:[#allocation6 + $0x60] sm:$0xf]  ;;  %v1446_v5 = vld [vmem:[#allocation6 + $0x64] sm:$0xf0]  ;;  %567 = vmatpush.bf16.msra.mxu0 %v1432_v0 }
  0x2f   : > { %v1374_v3 = vor.u32 %v1448_v2, %v1373_v1  ;;  %v1431_v6 = vld [vmem:[#allocation2 + $0x30] sm:$0xff]  ;;  %v1366_v7 = vor.u32 %v1446_v5, %v1365_v4  ;;  %v1444_v9 = vld [vmem:[#allocation6 + $0x54] sm:$0xf0]  ;;  %v1430_v10 = vld [vmem:[#allocation2 + $0x28] sm:$0xff]  ;;  %s2085_s17 = smov (!%p483_p6, %s1926_s17), 1  ;;  %vm729_vm0 = vcmask 261120  }
  0x30   : > { %v1357_v8 = vld [vmem:[#allocation6 + $0x50] sm:$0xf]  ;;  %v1349_v12 = vld [vmem:[#allocation6 + $0x40] sm:$0xf]  ;;  %v1442_v13 = vld [vmem:[#allocation6 + $0x44] sm:$0xf0] }
  0x31   : > { %683 = vmatpush.bf16.msra.mxu1 %v1374_v3  ;;  %v1358_v11 = vor.u32 %v1444_v9, %v1357_v8  ;;  %v1447_v14 = vld [vmem:[#allocation6 + $0x74] sm:$0xf]  ;;  %v1375_v15 = vld [vmem:[#allocation6 + $0x78] sm:$0xf0]  ;;  %v1445_v16 = vld [vmem:[#allocation6 + $0x64] sm:$0xf]  ;;  %v1350_v20 = vor.u32 %v1442_v13, %v1349_v12 }
  0x32   : > { %568 = vmatpush.bf16.msra.mxu0 %v1431_v6  ;;  %v1367_v17 = vld [vmem:[#allocation6 + $0x68] sm:$0xf0]  ;;  %v1429_v18 = vld [vmem:[#allocation2 + $0x20] sm:$0xff]  ;;  %v1378_v19 = vor.u32 %v1447_v14, %v1375_v15  ;;  %v1341_v21 = vld [vmem:[#allocation6 + $0x30] sm:$0xf]  ;;  %s2004_s2 = sshll.u32 %s2085_s17, 3 }
  0x33   : > { %v1440_v22 = vld [vmem:[#allocation6 + $0x34] sm:$0xf0]  ;;  %v1370_v23 = vor.u32 %v1445_v16, %v1367_v17  ;;  %v1443_v24 = vld [vmem:[#allocation6 + $0x54] sm:$0xf]  ;;  %v1359_v25 = vld [vmem:[#allocation6 + $0x58] sm:$0xf0]  ;;  %s486_s20 = scalar_lea.vmem %s2069_s0, %s2004_s2  ;;  %s490_s17 = scalar_lea.vmem %s2070_s1, %s2004_s2 }
  0x34   : > { %696 = vmatpush.bf16.msra.mxu2 %v1378_v19  ;;  %v1428_v26 = vld [vmem:[#allocation2 + $0x18] sm:$0xff]  ;;  %v1342_v27 = vor.u32 %v1440_v22, %v1341_v21  ;;  %v1333_v28 = vld [vmem:[#allocation6 + $0x20] sm:$0xf]  ;;  %v1438_v29 = vld [vmem:[#allocation6 + $0x24] sm:$0xf0]  ;;  %v1362_v30 = vor.u32 %v1443_v24, %v1359_v25  ;;  %s1858_s11 = smov 32   ;;  %s494_s15 = scalar_lea.vmem %s2079_s10, %s2004_s2 }
  0x35   : > { %684 = vmatpush.bf16.msra.mxu1 %v1366_v7  ;;  %v1441_v31 = vld [vmem:[#allocation6 + $0x44] sm:$0xf]  ;;  %v1351_v32 = vld [vmem:[#allocation6 + $0x48] sm:$0xf0]  ;;  %v1334_v34 = vor.u32 %v1438_v29, %v1333_v28  ;;  %v1325_v35 = vld [vmem:[#allocation6 + $0x10] sm:$0xf] }
  0x36   : > { %569 = vmatpush.bf16.msra.mxu0 %v1430_v10  ;;  %v1427_v33 = vld [vmem:[#allocation2 + $0x10] sm:$0xff]  ;;  %v1436_v36 = vld [vmem:[#allocation6 + $0x14] sm:$0xf0]  ;;  %v1354_v37 = vor.u32 %v1441_v31, %v1351_v32  ;;  %v1343_v39 = vld [vmem:[#allocation6 + $0x38] sm:$0xf0]  ;;  %s1859_s12 = smov 96  }
  0x37   : > { %v1439_v38 = vld [vmem:[#allocation6 + $0x34] sm:$0xf]  ;;  %v1426_v40 = vld [vmem:[#allocation2 + $0x8] sm:$0xff]  ;;  %v1326_v41 = vor.u32 %v1436_v36, %v1325_v35  ;;  %v1317_v42 = vld [vmem:[#allocation6] sm:$0xf]  ;;  %s1860_s14 = smov 64  }
  0x38   : > { %697 = vmatpush.bf16.msra.mxu2 %v1370_v23  ;;  %v1434_v43 = vld [vmem:[#allocation6 + $0x4] sm:$0xf0]  ;;  %v1346_v44 = vor.u32 %v1439_v38, %v1343_v39  ;;  %v1437_v45 = vld [vmem:[#allocation6 + $0x24] sm:$0xf]  ;;  %v1335_v46 = vld [vmem:[#allocation6 + $0x28] sm:$0xf0] }
  0x39   : > { %685 = vmatpush.bf16.msra.mxu1 %v1358_v11  ;;  %v1425_v47 = vld [vmem:[#allocation2] sm:$0xff]  ;;  %v1318_v49 = vor.u32 %v1434_v43, %v1317_v42  ;;  %v1338_v51 = vor.u32 %v1437_v45, %v1335_v46  ;;  %v1435_v53 = vld [vmem:[#allocation6 + $0x14] sm:$0xf]  ;;  %v1319_v58 = vld [vmem:[#allocation6 + $0x8] sm:$0xf0]  ;;  %vm763_vm1 = vcmask 1043456  }
  0x3a   : > { %570 = vmatpush.bf16.msra.mxu0 %v1429_v18  ;;  %v2014_v48 = vld [vmem:[%s486_s20] sm:$0xff]  ;;  %v1450_v60 = vld [vmem:[#allocation9 + $0x8] sm:$0xff]  ;;  %vm749_vm2 = vcmask 64512  }
  0x3b   : > { %v497_v50 = vld [vmem:[%s490_s17] sm:$0xff]  ;;  %v498_v52 = vpack.c.bf16 %v2014_v48, %v2014_v48 }
  0x3c   : > { %698 = vmatpush.bf16.msra.mxu2 %v1362_v30  ;;  %v1327_v54 = vld [vmem:[#allocation6 + $0x18] sm:$0xf0]  ;;  %v580_v55 = vpack.c.bf16 %v497_v50, %v497_v50  ;;  %v1433_v57 = vld [vmem:[#allocation6 + $0x4] sm:$0xf]  ;;  %v597_v61 = vld [vmem:[#allocation7] sm:$0x3] }
  0x3d   : > { %686 = vmatpush.bf16.msra.mxu1 %v1350_v20  ;;  %v1330_v56 = vor.u32 %v1435_v53, %v1327_v54  ;;  %v1322_v59 = vor.u32 %v1433_v57, %v1319_v58  ;;  %v1554_v62 = vld [vmem:[#allocation4] ss:$0 sm:$0xff]  ;;  %v599_v63 = vperm.slane %v597_v61, 0  ;;  %v1449_v10 = vld [vmem:[#allocation9] sm:$0xff]  ;;  %v600_v11 = vperm.slane %v597_v61, 1 }
  0x3e   : > { %571 = vmatpush.bf16.msra.mxu0 %v1428_v26 }
  0x40   : > { %699 = vmatpush.bf16.msra.mxu2 %v1354_v37 }
  0x41   : > { %687 = vmatpush.bf16.msra.mxu1 %v1342_v27 }
  0x42   : > { %572 = vmatpush.bf16.msra.mxu0 %v1427_v33 }
  0x44   : > { %700 = vmatpush.bf16.msra.mxu2 %v1346_v44 }
  0x45   : > { %688 = vmatpush.bf16.msra.mxu1 %v1334_v34 }
  0x46   : > { %573 = vmatpush.bf16.msra.mxu0 %v1426_v40 }
  0x48   : > { %701 = vmatpush.bf16.msra.mxu2 %v1338_v51 }
  0x49   : > { %689 = vmatpush.bf16.msra.mxu1 %v1326_v41 }
  0x4a   : > { %574 = vmatpush.bf16.msra.mxu0 %v1425_v47 }
  0x4c   : > { %702 = vmatpush.bf16.msra.mxu2 %v1330_v56 }
  0x4d   : > { %690 = vmatpush.bf16.msra.mxu1 %v1318_v49  ;;  %575 = vmatmul.bf16.vlgmr.msra.gmra.mxu0 %v498_v52 }
  0x50   : > { %691 = vmatmul.bf16.vlgmr.msra.gmra.mxu1 %v580_v55  ;;  %703 = vmatpush.bf16.msra.mxu2 %v1322_v59 }
  0x53   : > { %704 = vmatmul.bf16.vlgmr.msra.gmra.mxu2 %v580_v55 }
  0x54   : > { %892 = vmatpush.bf16.msrb.mxu2 %v1450_v60 }
  0x58   : > { %893 = vmatpush.bf16.msrb.mxu2 %v1449_v10 }
  0xca   : > { %v576_v0 = vpop.f32.mrf.mxu0 }
  0xcb   : > { %v577_v2 = vadd.f32 %v1554_v62, %v576_v0 }
  0xcd   : > { %v692_v1 = vpop.f32.mrf.mxu1  ;;  %v725_v5 = vmul.f32 0.17677669, %v577_v2 }
  0xce   : > { %v693_v3 = vadd.f32 %v692_v1, %v599_v63 }
  0xcf   : > { %v726_v9 = vpack.c.bf16 %v725_v5, %v725_v5  ;;  %v1451_v5 = vld [vmem:[#allocation9 + $0x10] sm:$0xff] }
  0xd0   : > { %v727_v4 = vpack.c.bf16 %v693_v3, %v693_v3 }
  0xd2   : > { %987 = vrot.lane.b32.xlu2 %v727_v4, %s1858_s11  ;;  %787 = vrot.lane.b32.xlu1 %v727_v4, %s1859_s12  ;;  %v734_v6 = vsel %vm729_vm0, %v727_v4, 0  ;;  %v578_v7 = vpop.f32.mrf.mxu0 }
  0xd3   : > { %743 = vmatpush.bf16.xpose.msra.mxu3 %v734_v6 }
  0xd5   : > { %v694_v8 = vpop.f32.mrf.mxu1 }
  0xd6   : > { %v705_v12 = vpop.f32.mrf.mxu2 }
  0xd7   : > { %v706_v13 = vadd.f32 %v705_v12, %v600_v11 }
  0xd9   : > { %v2023_v14 = vpack.c.bf16 %v706_v13, %v706_v13 }
  0xda   : > { %901 = vrot.lane.b32.xlu2 %v727_v4, %s1860_s14  ;;  %784 = vrot.lane.b32.xlu1 %v726_v9, %s1859_s12  ;;  %v1452_v4 = vld [vmem:[#allocation9 + $0x18] sm:$0xff] }
  0xdb   : > { %1379 = vmatmul.msk.bf16.vlgmr.msra.gmra.mxu3 %vm729_vm0, %v726_v9  ;;  %v765_v16 = vsel %vm763_vm1, %v2023_v14, 0  ;;  %864 = vmatpush.bf16.msrb.mxu1 %v1452_v4 }
  0xdc   : > { %774 = vmatpush.bf16.msrb.mxu3 %v765_v16 }
  0xde   : > { %v707_v15 = vpop.f32.mrf.mxu2 }
  0xdf   : > { %865 = vmatpush.bf16.msrb.mxu1 %v1451_v5  ;;  %v1556_v5 = vld [vmem:[#allocation12] ss:$0 sm:$0xff] }
  0xe2   : > { %899 = vrot.lane.b32.xlu1 %v726_v9, %s1860_s14 }
  0xea   : > { %819 = vrot.lane.b32.xlu1 %v2023_v14, %s1859_s12 }
 0x12c   : > { %v988_v17 = vpop.permute.xlu2 %987 }
 0x12d   : > { %v993_v18 = vsel %vm729_vm0, %v988_v17, 0 }
 0x12e   : > { %1002 = vmatpush.bf16.xpose.msra.mxu2 %v993_v18 }
 0x134   : > { %v902_v30 = vpop.permute.xlu2 %901 }
 0x135   : > { %v907_v33 = vsel %vm729_vm0, %v902_v30, 0 }
 0x144   : > { %v788_v19 = vpop.permute.xlu1 %787 }
 0x145   : > { %v793_v20 = vsel %vm729_vm0, %v788_v19, 0 }
 0x146   : > { %802 = vmatpush.bf16.xpose.msra.mxu3 %v793_v20 }
 0x14c   : > { %v785_v24 = vpop.permute.xlu1 %784 }
 0x154   : > { %v900_v28 = vpop.permute.xlu1 %899 }
 0x15c   : > { %v820_v34 = vpop.permute.xlu1 %819 }
 0x15d   : > { %v825_v35 = vsel %vm763_vm1, %v820_v34, 0 }
 0x15e   : > { %v745_v21 = vpop.f32.mrf.mxu3  ;;  %834 = vmatpush.bf16.msrb.mxu0 %v825_v35 }
 0x15f   : > { %v750_v22 = vsel %vm749_vm2, %v745_v21, -inf }
 0x160   : > { %751 = vmax.xlane.f32.xlu0 %v750_v22  ;;  %v1455_v22 = vld [vmem:[#allocation9 + $0x30] sm:$0xff] }
 0x166   : > { %v747_v23 = vpop.f32.mrf.mxu3 }
 0x167   : > { %v1454_v23 = vld [vmem:[#allocation9 + $0x28] sm:$0xff] }
 0x168   : > { %977 = vmatpush.bf16.msra.mxu1 %v1454_v23 }
 0x1d3   : > { %v752_v25 = vpop.xlane.xlu0 %751 }
 0x1d4   : > { %v753_v26 = vsub.f32 %v745_v21, %v752_v25  ;;  %v1456_v21 = vld [vmem:[#allocation9 + $0x38] sm:$0xff] }
 0x1d6   : > { %v754_v27 = vmul.f32 1.442695, %v753_v26 }
 0x1d8   : > { %1558 = vpow2.f32 %v754_v27 }
 0x1de   : > { %v1559_v29 = vpop.eup %1558 }
 0x1df   : > { %v756_v31 = vsel %vm749_vm2, %v1559_v29, 0.0  ;;  %v759_v32 = vpack.c.bf16 %v1559_v29, %v1559_v29 }
 0x1e0   : > { %757 = vadd.xlane.f32.xlu0 %v756_v31 }
 0x1e1   : > { %1380 = vmatmul.msk.bf16.vlgmr.msrb.gmra.mxu3 %vm749_vm2, %v759_v32 }
 0x1e2   : > { %916 = vmatpush.bf16.xpose.msrb.mxu3 %v907_v33 }
 0x1f1   : > { %1381 = vmatmul.msk.bf16.vlgmr.msra.gmra.mxu3 %vm729_vm0, %v785_v24  ;;  %v1453_v24 = vld [vmem:[#allocation9 + $0x20] sm:$0xff] }
 0x1f2   : > { %978 = vmatpush.bf16.msra.mxu1 %v1453_v24 }
 0x1f4   : > { %985 = vrot.lane.b32.xlu0 %v726_v9, %s1858_s11 }
 0x201   : > { %1401 = vmatmul.msk.bf16.vlgmr.msrb.gmra.mxu3 %vm729_vm0, %v900_v28 }
 0x253   : > { %v758_v36 = vpop.xlane.xlu0 %757 }
 0x254   : > { %1560 = vrcp.f32 %v758_v36 }
 0x25a   : > { %v1561_v37 = vpop.eup %1560 }
 0x264   : > { %v776_v38 = vpop.f32.mrf.mxu3 }
 0x265   : > { %v781_v39 = vmul.f32 %v1561_v37, %v776_v38 }
 0x266   : > { %v986_v44 = vpop.permute.xlu0 %985 }
 0x267   : > { %v782_v40 = vpack.c.bf16 %v781_v39, %v781_v39 }
 0x269   : > { %1400 = vmatmul.msk.bf16.vlgmr.msrb.gmra.mxu2 %vm729_vm0, %v782_v40 }
 0x26c   : > { %v778_v41 = vpop.f32.mrf.mxu3 }
 0x274   : > { %v804_v42 = vpop.f32.mrf.mxu3 }
 0x275   : > { %v808_v43 = vsel %vm749_vm2, %v804_v42, -inf }
 0x276   : > { %809 = vmax.xlane.f32.xlu2 %v808_v43 }
 0x279   : > { %1412 = vmatmul.msk.bf16.vlgmr.msra.gmra.mxu2 %vm729_vm0, %v986_v44 }
 0x27c   : > { %v806_v45 = vpop.f32.mrf.mxu3 }
 0x27d   : > { %v1555_v45 = vld [vmem:[#allocation10] ss:$0 sm:$0xff] }
 0x284   : > { %v918_v46 = vpop.f32.mrf.mxu3 }
 0x285   : > { %v922_v47 = vsel %vm749_vm2, %v918_v46, -inf }
 0x286   : > { %923 = vmax.xlane.f32.xlu0 %v922_v47 }
 0x28c   : > { %v920_v49 = vpop.f32.mrf.mxu3 }
 0x28e   : > { %1018 = vrot.lane.b32.xlu2 %v2023_v14, %s1858_s11 }
 0x2e9   : > { %v810_v50 = vpop.xlane.xlu2 %809 }
 0x2ea   : > { %v811_v51 = vsub.f32 %v804_v42, %v810_v50  ;;  %v1861_v50 = vmov 128.0  }
 0x2ec   : > { %v812_v52 = vmul.f32 1.442695, %v811_v51  ;;  %v2044_v53 = vpop.f32.mrf.mxu2 }
 0x2ee   : > { %1562 = vpow2.f32 %v812_v52 }
 0x2f1   : > { %v1019_v54 = vpop.permute.xlu2 %1018 }
 0x2f2   : > { %v1024_v55 = vsel %vm763_vm1, %v1019_v54, 0 }
 0x2f3   : > { %1033 = vmatpush.bf16.msra.mxu3 %v1024_v55 }
 0x2f4   : > { %v1563_v56 = vpop.eup %1562  ;;  %v897_v57 = vpop.f32.mrf.mxu2 }
 0x2f5   : > { %v814_v58 = vsel %vm749_vm2, %v1563_v56, 0.0  ;;  %v817_v59 = vpack.c.bf16 %v1563_v56, %v1563_v56 }
 0x2f6   : > { %815 = vadd.xlane.f32.xlu0 %v814_v58 }
 0x2f7   : > { %1382 = vmatmul.msk.bf16.vlgmr.msrb.gmra.mxu0 %vm749_vm2, %v817_v59 }
 0x2f9   : > { %v924_v60 = vpop.xlane.xlu0 %923 }
 0x2fa   : > { %v925_v61 = vsub.f32 %v918_v46, %v924_v60 }
 0x2fc   : > { %v926_v62 = vmul.f32 1.442695, %v925_v61  ;;  %v1004_v63 = vpop.f32.mrf.mxu2 }
 0x2fd   : > { %v1008_v0 = vsel %vm749_vm2, %v1004_v63, -inf }
 0x2fe   : > { %1564 = vpow2.f32 %v926_v62  ;;  %1009 = vmax.xlane.f32.xlu1 %v1008_v0 }
 0x304   : > { %v1565_v1 = vpop.eup %1564  ;;  %v1006_v2 = vpop.f32.mrf.mxu2 }
 0x305   : > { %v928_v3 = vsel %vm749_vm2, %v1565_v1, 0.0  ;;  %v931_v20 = vpack.c.bf16 %v1565_v1, %v1565_v1 }
 0x306   : > { %929 = vadd.xlane.f32.xlu2 %v928_v3 }
 0x317   : > { %932 = vrot.lane.b32.xlu1 %v2023_v14, %s1860_s14 }
 0x369   : > { %v816_v6 = vpop.xlane.xlu0 %815 }
 0x36a   : > { %1566 = vrcp.f32 %v816_v6 }
 0x370   : > { %v1567_v9 = vpop.eup %1566 }
 0x371   : > { %v1010_v7 = vpop.xlane.xlu1 %1009 }
 0x372   : > { %v1011_v8 = vsub.f32 %v1004_v63, %v1010_v7  ;;  %v1557_v7 = vld [vmem:[#allocation13] ss:$0 sm:$0xff] }
 0x374   : > { %v1012_v10 = vmul.f32 1.442695, %v1011_v8  ;;  %v836_v11 = vpop.f32.mrf.mxu0 }
 0x375   : > { %v841_v12 = vmul.f32 %v1567_v9, %v836_v11 }
 0x376   : > { %1568 = vpow2.f32 %v1012_v10 }
 0x377   : > { %v842_v13 = vpack.c.bf16 %v841_v12, %v841_v12 }
 0x379   : > { %1391 = vmatmul.msk.bf16.vlgmr.msrb.gmra.mxu1 %vm729_vm0, %v842_v13  ;;  %v930_v29 = vpop.xlane.xlu2 %929 }
 0x37c   : > { %v1569_v15 = vpop.eup %1568  ;;  %v838_v16 = vpop.f32.mrf.mxu0 }
 0x37d   : > { %v1017_v17 = vpack.c.bf16 %v1569_v15, %v1569_v15  ;;  %v1014_v14 = vsel %vm749_vm2, %v1569_v15, 0.0 }
 0x37e   : > { %1015 = vadd.xlane.f32.xlu0 %v1014_v14 }
 0x37f   : > { %1413 = vmatmul.msk.bf16.vlgmr.msra.gmra.mxu3 %vm749_vm2, %v1017_v17 }
 0x389   : > { %v933_v18 = vpop.permute.xlu1 %932 }
 0x38a   : > { %v938_v19 = vsel %vm763_vm1, %v933_v18, 0 }
 0x38b   : > { %947 = vmatpush.bf16.msra.mxu0 %v938_v19 }
 0x38e   : > { %1402 = vmatmul.msk.bf16.vlgmr.msra.gmra.mxu0 %vm749_vm2, %v931_v20 }
 0x38f   : > { %1063 = vmatpush.bf16.msrb.mxu0 %v1456_v21 }
 0x393   : > { %1064 = vmatpush.bf16.msrb.mxu0 %v1455_v22 }
 0x3f1   : > { %v1016_v26 = vpop.xlane.xlu0 %1015 }
 0x3f2   : > { %1570 = vrcp.f32 %v1016_v26 }
 0x3f3   : > { %1572 = vrcp.f32 %v930_v29 }
 0x3f4   : > { %1574 = vrcp.f32 %v1861_v50 }
 0x3f6   : > { %v867_v25 = vpop.f32.mrf.mxu1 }
 0x3f7   : > { %v896_v40 = vadd.f32 %v2044_v53, %v867_v25 }
 0x3f8   : > { %v1571_v28 = vpop.eup %1570 }
 0x3f9   : > { %v1573_v34 = vpop.eup %1572 }
 0x3fa   : > { %v1575_v51 = vpop.eup %1574 }
 0x3fb   : > { %v1082_v52 = vmul.f32 128.0, %v1575_v51  ;;  %vm1086_vm3 = vweird.f32 %v1575_v51 }
 0x3fd   : > { %v1083_v54 = vsub.f32 1.0, %v1082_v52 }
 0x3fe   : > { %v869_v27 = vpop.f32.mrf.mxu1 }
 0x3ff   : > { %v1084_v55 = vmul.f32 %v1575_v51, %v1083_v54 }
 0x401   : > { %v1085_v56 = vadd.f32 %v1575_v51, %v1084_v55 }
 0x402   : > { %v1035_v30 = vpop.f32.mrf.mxu3 }
 0x403   : > { %v1040_v31 = vmul.f32 %v1571_v28, %v1035_v30  ;;  %v1087_v57 = vsel %vm1086_vm3, %v1575_v51, %v1085_v56 }
 0x405   : > { %v1041_v32 = vpack.c.bf16 %v1040_v31, %v1040_v31 }
 0x407   : > { %1422 = vmatmul.msk.bf16.vlgmr.msrb.gmra.mxu0 %vm729_vm0, %v1041_v32 }
 0x40a   : > { %v1037_v33 = vpop.f32.mrf.mxu3 }
 0x40b   : > { %v949_v35 = vpop.f32.mrf.mxu0 }
 0x40c   : > { %v954_v36 = vmul.f32 %v1573_v34, %v949_v35 }
 0x40e   : > { %v955_v37 = vpack.c.bf16 %v954_v36, %v954_v36 }
 0x410   : > { %1411 = vmatmul.msk.bf16.vlgmr.msra.gmra.mxu1 %vm729_vm0, %v955_v37 }
 0x413   : > { %v951_v38 = vpop.f32.mrf.mxu0 }
 0x484   : > { %v1066_v39 = vpop.f32.mrf.mxu0 }
 0x48c   : > { %v1068_v41 = vpop.f32.mrf.mxu0 }
 0x48d   : > { %v980_v42 = vpop.f32.mrf.mxu1 }
 0x48e   : > { %v984_v43 = vadd.f32 %v980_v42, %v896_v40 }
 0x490   : > { %v1070_v44 = vadd.f32 %v1066_v39, %v984_v43 }
 0x492   : > { %v1071_v46 = vadd.f32 %v1070_v44, %v2014_v48 }
 0x494   : > { %v1076_v47 = vadd.f32 %v1555_v45, %v1071_v46 }
 0x495   : > { %v982_v49 = vpop.f32.mrf.mxu1 }
 0x496   : > { %1079 = vadd.xlane.f32.xlu0 %v1076_v47 }
 0x509   : > { %v1080_v53 = vpop.xlane.xlu0 %1079 }
 0x50a   : > { %v1088_v58 = vmul.f32 %v1087_v57, %v1080_v53 }
 0x50c   : > { %v1089_v59 = vsub.f32 %v1076_v47, %v1088_v58 }
 0x50e   : > { %v1090_v60 = vmul.f32 %v1089_v59, %v1089_v59 }
 0x510   : > { %1091 = vadd.xlane.f32.xlu1 %v1090_v60 }
 0x583   : > { %v1092_v61 = vpop.xlane.xlu1 %1091 }
 0x584   : > { %v1093_v62 = vmul.f32 %v1092_v61, %v1087_v57 }
 0x586   : > { %v1094_v48 = vadd.f32 1e-05, %v1093_v62 }
 0x588   : > { %1576 = vrsqrt.f32 %v1094_v48  ;;  %vm1101_vm5 = vweird.f32 %v1094_v48 }
 0x58e   : > { %v1577_v63 = vpop.eup %1576 }
 0x58f   : > { %v1096_v0 = vmul.f32 %v1577_v63, %v1094_v48  ;;  %vm1102_vm4 = vweird.f32 %v1577_v63 }
 0x590   : > { %vm1103_vm6 = vmor %vm1101_vm5, %vm1102_vm4 }
 0x591   : > { %v1097_v1 = vmul.f32 %v1577_v63, %v1096_v0 }
 0x593   : > { %v1098_v2 = vmul.f32 0.5, %v1097_v1 }
 0x595   : > { %v1099_v3 = vsub.f32 1.5, %v1098_v2 }
 0x597   : > { %v1100_v4 = vmul.f32 %v1577_v63, %v1099_v3 }
 0x599   : > { %v1104_v6 = vsel %vm1103_vm6, %v1577_v63, %v1100_v4 }
 0x59a   : > { %v1105_v8 = vmul.f32 %v1104_v6, %v1089_v59 }
 0x59c   : > { %v1109_v9 = vmul.f32 %v1556_v5, %v1105_v8 }
 0x59e   : > { %v1113_v10 = vadd.f32 %v1557_v7, %v1109_v9 }
 0x5a0   : > { %1114 = vst [vmem:[%s494_s15] sm:$0xff] %v1113_v10 }
 0x5a1 PF: > { %s25_s13 = sadd.s32 1, %s1844_s13  }
 0x5a2   : > { %p22_p7 = scmp.ge.s32.totalorder %s25_s13, 4  }
 0x5a4   :  { %24 = sbr.rel (!%p22_p7) target bundleno = 7 (0x7), region = 126 }
 0x5a9   :  { %1134 = vsyncpa [#allocation3], 1 }
 0x5aa   :  { %1136 = vsyncpa [#allocation3 + $0x1], 1 }
 0x5ab   :  { %1137 = vsyncpa [#allocation5], 1 }
 0x5ac   :  { %1138 = vsyncpa [#allocation8], 1 }
 0x5ad   :  { %1139 = vsyncpa [#allocation11], 1 }
 0x5ae   :  { %1140 = vsyncpa [#allocation14], 1 }

// kernel: transformer_forward.23
= control target key start
LH: loop header
LB: loop body
LE: loop exit
PB: predicated region body
PF: predicated region fallthrough
CT: control target
= control target key end

     0   :  { %10 = vsyncpa [#allocation3], 0  ;;  %s1085_s0 = inlined_call_operand.vmem [shape: f32[16,128], index: 0, kind: input, shape index: {}]   ;;  %s1086_s1 = inlined_call_operand.hbm [shape: f32[1,128], index: 1, kind: input, shape index: {}]   ;;  %s1087_s2 = inlined_call_operand.hbm [shape: f32[1,128], index: 2, kind: input, shape index: {}]   ;;  %s1088_s3 = inlined_call_operand.hbm [shape: bf16[128,256], index: 3, kind: input, shape index: {}]   ;;  %s1089_s4 = inlined_call_operand.hbm [shape: f32[1,256], index: 4, kind: input, shape index: {}]   ;;  %s1090_s5 = inlined_call_operand.vmem [shape: f32[16,256], index: 5, kind: output, shape index: {}]  }
   0x1   :  { %11 = vsyncpa [#allocation5], 0 }
   0x2   :  { %12 = vsyncpa [#allocation8], 0  ;;  %s984_s18 = smov 0   ;;  %s986_s19 = smov 0  }
   0x3   :  { %s988_s20 = smov 0  }
   0x4 LB: > { %s207_s23 = sshll.u32 %s1087_s2, 4  ;;  %s618_s24 = sadd.s32 4294967295, %s945_s20   ;;  %s945_s20 = sphi %s988_s20, %s18_s20   ;;  %s941_s19 = sphi %s986_s19, %s1095_s19   ;;  %s937_s18 = sphi %s984_s18, %s1094_s18   ;;  %s208_s23 = int_to_ptr.hbm [resolvable:$true] %s207_s23 }
   0x5   : > { %p620_p0 = scmp.ge.s32.totalorder %s945_s20, 1  ;;  %p183_p1 = scmp.lt.s32.totalorder %s945_s20, 3 }
   0x6   : > { %p1005_p2 = scmp.eq.s32.totalorder %s618_s24, 0  ;;  %s947_s27 = smov [#allocation4]  }
   0x7   : > { %p1009_p3 = pnand %p620_p0, %p183_p1  ;;  %s209_s28 = sshll.u32 %s947_s27, 4  ;;  %s210_s28 = int_to_ptr.vmem [resolvable:$true] %s209_s28 }
   0x8   : > { %s30_s30 = sadd.s32 1, %s941_s19  ;;  %s195_s8 = sshll.u32 %s1086_s1, 4  ;;  %s196_s8 = int_to_ptr.hbm [resolvable:$true] %s195_s8 }
   0x9   : > { %p733_p4 = pneg %p1009_p3  ;;  %p32_p6 = scmp.ge.s32.totalorder %s30_s30, 2 }
   0xa   : > { %s221_s11 = sshll.u32 %s1088_s3, 4  ;;  %s948_s12 = smov [#allocation2]   ;;  %s222_s11 = int_to_ptr.hbm [resolvable:$true] %s221_s11 }
   0xb   : > { %p1017_p5 = pnand %p1005_p2, %p733_p4  ;;  %s1097_s30 = smov (%p32_p6, %s30_s30), 0 }
   0xc   : > { %s197_s13 = sshll.u32 %s948_s12, 4  ;;  %s949_s14 = smov [#allocation6]   ;;  %s198_s13 = int_to_ptr.vmem [resolvable:$true] %s197_s13 }
   0xd   : > { %739 = dma.hbm_to_vmem [thread:$0]  (!%p1017_p5), %s208_s23, 16, %s210_s28, [#allocation5]  }
   0xe   : > { %736 = dma.hbm_to_vmem [thread:$0]  (!%p1017_p5), %s196_s8, 16, %s198_s13, [#allocation3]  }
   0xf   : > { %s223_s15 = sshll.u32 %s949_s14, 4  ;;  %s950_s16 = smov 128   ;;  %s224_s15 = int_to_ptr.vmem [resolvable:$true] %s223_s15 }
  0x10   : > { %s951_s17 = smov 8   ;;  %s238_s23 = sshll.u32 %s1089_s4, 4  ;;  %s239_s23 = int_to_ptr.hbm [resolvable:$true] %s238_s23 }
  0x11   : > { %742 = dma.hbm_to_vmem [thread:$0]  (!%p1017_p5), %s222_s11, 2048, %s224_s15, [#allocation5], %s950_s16, %s950_s16, %s951_s17  }
  0x12   : > { %s952_s24 = smov [#allocation7]   ;;  %260 = sbr.rel (%p1009_p3) target bundleno = 436 (0x1b4), region = 40 }
  0x13   : > { %s240_s27 = sshll.u32 %s952_s24, 4  ;;  %s241_s27 = int_to_ptr.vmem [resolvable:$true] %s240_s27 }
  0x14   : > { %745 = dma.hbm_to_vmem [thread:$0]  (!%p1017_p5), %s239_s23, 32, %s241_s27, [#allocation8]  }
  0x17   : > { %924 = dma.done.wait (%p1005_p2), [#allocation3], 16  }
  0x18   : > { %926 = vsyncadd (%p1005_p2), [#allocation3], 4294967280 }
  0x19   : > { %928 = dma.done.wait (%p1005_p2), [#allocation5], 2064  }
  0x1a   : > { %930 = vsyncadd (%p1005_p2), [#allocation5], 4294965232 }
  0x1b   : > { %932 = dma.done.wait (%p1005_p2), [#allocation8], 32  }
  0x1c   : > { %934 = vsyncadd (%p1005_p2), [#allocation8], 4294967264  ;;  %p307_p7 = scmp.lt.s32.totalorder %s937_s18, 1  ;;  %v953_v1 = vmov 128.0   ;;  %v692_v2 = vld [vmem:[#allocation6 + $0x70] sm:$0xf] }
  0x1d   : > { %787 = vrcp.f32 %v953_v1  ;;  %v716_v3 = vld [vmem:[#allocation6 + $0x74] sm:$0xf0]  ;;  %v715_v4 = vld [vmem:[#allocation6 + $0x74] sm:$0xf]  ;;  %v694_v6 = vld [vmem:[#allocation6 + $0x78] sm:$0xf0] }
  0x1e   : > { %s1099_s18 = smov (!%p307_p7, %s937_s18), 1  ;;  %v693_v5 = vor.u32 %v716_v3, %v692_v2  ;;  %v697_v7 = vor.u32 %v715_v4, %v694_v6  ;;  %v684_v18 = vld [vmem:[#allocation6 + $0x60] sm:$0xf]  ;;  %v714_v19 = vld [vmem:[#allocation6 + $0x64] sm:$0xf0] }
  0x1f   : > { %s631_s26 = sshll.u32 %s1099_s18, 3  ;;  %v713_v20 = vld [vmem:[#allocation6 + $0x64] sm:$0xf]  ;;  %v685_v21 = vor.u32 %v714_v19, %v684_v18  ;;  %v686_v22 = vld [vmem:[#allocation6 + $0x68] sm:$0xf0]  ;;  %s700_s25 = sshll.u32 %s1099_s18, 4 }
  0x20   : > { %s310_s6 = scalar_lea.vmem %s1085_s0, %s631_s26  ;;  %464 = vmatpush.bf16.msra.mxu0 %v693_v5  ;;  %477 = vmatpush.bf16.msra.mxu1 %v697_v7  ;;  %v689_v23 = vor.u32 %v713_v20, %v686_v22  ;;  %v676_v24 = vld [vmem:[#allocation6 + $0x50] sm:$0xf]  ;;  %v712_v25 = vld [vmem:[#allocation6 + $0x54] sm:$0xf0]  ;;  %v711_v26 = vld [vmem:[#allocation6 + $0x54] sm:$0xf]  ;;  %s321_s9 = scalar_lea.vmem %s1090_s5, %s700_s25 }
  0x21   : > { %v323_v0 = vld [vmem:[%s310_s6] sm:$0xff]  ;;  %v677_v27 = vor.u32 %v712_v25, %v676_v24  ;;  %v710_v31 = vld [vmem:[#allocation6 + $0x44] sm:$0xf0]  ;;  %v709_v32 = vld [vmem:[#allocation6 + $0x44] sm:$0xf] }
  0x22   : > { %326 = vadd.xlane.f32.xlu0 %v323_v0  ;;  %v678_v28 = vld [vmem:[#allocation6 + $0x58] sm:$0xf0]  ;;  %v668_v30 = vld [vmem:[#allocation6 + $0x40] sm:$0xf]  ;;  %v670_v34 = vld [vmem:[#allocation6 + $0x48] sm:$0xf0] }
  0x23   : > { %v788_v8 = vpop.eup %787  ;;  %v681_v29 = vor.u32 %v711_v26, %v678_v28  ;;  %v669_v33 = vor.u32 %v710_v31, %v668_v30  ;;  %v673_v35 = vor.u32 %v709_v32, %v670_v34  ;;  %v660_v36 = vld [vmem:[#allocation6 + $0x30] sm:$0xf]  ;;  %v708_v37 = vld [vmem:[#allocation6 + $0x34] sm:$0xf0]  ;;  %v707_v38 = vld [vmem:[#allocation6 + $0x34] sm:$0xf] }
  0x24   : > { %v329_v9 = vmul.f32 128.0, %v788_v8  ;;  %vm333_vm0 = vweird.f32 %v788_v8  ;;  %465 = vmatpush.bf16.msra.mxu0 %v685_v21  ;;  %478 = vmatpush.bf16.msra.mxu1 %v689_v23  ;;  %v661_v39 = vor.u32 %v708_v37, %v660_v36  ;;  %v662_v40 = vld [vmem:[#allocation6 + $0x38] sm:$0xf0]  ;;  %v652_v42 = vld [vmem:[#allocation6 + $0x20] sm:$0xf] }
  0x25   : > { %v665_v41 = vor.u32 %v707_v38, %v662_v40  ;;  %v706_v43 = vld [vmem:[#allocation6 + $0x24] sm:$0xf0]  ;;  %v705_v44 = vld [vmem:[#allocation6 + $0x24] sm:$0xf]  ;;  %v654_v46 = vld [vmem:[#allocation6 + $0x28] sm:$0xf0] }
  0x26   : > { %v330_v10 = vsub.f32 1.0, %v329_v9  ;;  %v653_v45 = vor.u32 %v706_v43, %v652_v42  ;;  %v657_v47 = vor.u32 %v705_v44, %v654_v46  ;;  %v644_v48 = vld [vmem:[#allocation6 + $0x10] sm:$0xf]  ;;  %v704_v49 = vld [vmem:[#allocation6 + $0x14] sm:$0xf0] }
  0x27   : > { %v703_v50 = vld [vmem:[#allocation6 + $0x14] sm:$0xf]  ;;  %v645_v51 = vor.u32 %v704_v49, %v644_v48  ;;  %v646_v52 = vld [vmem:[#allocation6 + $0x18] sm:$0xf0]  ;;  %v636_v53 = vld [vmem:[#allocation6] sm:$0xf] }
  0x28   : > { %v331_v11 = vmul.f32 %v788_v8, %v330_v10  ;;  %466 = vmatpush.bf16.msra.mxu0 %v677_v27  ;;  %479 = vmatpush.bf16.msra.mxu1 %v681_v29  ;;  %v702_v54 = vld [vmem:[#allocation6 + $0x4] sm:$0xf0]  ;;  %v649_v55 = vor.u32 %v703_v50, %v646_v52  ;;  %v701_v56 = vld [vmem:[#allocation6 + $0x4] sm:$0xf]  ;;  %v638_v57 = vld [vmem:[#allocation6 + $0x8] sm:$0xf0] }
  0x29   : > { %v637_v58 = vor.u32 %v702_v54, %v636_v53  ;;  %v641_v59 = vor.u32 %v701_v56, %v638_v57  ;;  %v785_v5 = vld [vmem:[#allocation2] ss:$0 sm:$0xff] }
  0x2a   : > { %v332_v12 = vadd.f32 %v788_v8, %v331_v11 }
  0x2c   : > { %v1063_v13 = vsel %vm333_vm0, %v788_v8, %v332_v12  ;;  %467 = vmatpush.bf16.msra.mxu0 %v669_v33  ;;  %480 = vmatpush.bf16.msra.mxu1 %v673_v35  ;;  %v786_v8 = vld [vmem:[#allocation4] ss:$0 sm:$0xff]  ;;  %v378_v12 = vld [vmem:[#allocation7] sm:$0x3] }
  0x30   : > { %468 = vmatpush.bf16.msra.mxu0 %v661_v39  ;;  %481 = vmatpush.bf16.msra.mxu1 %v665_v41 }
  0x34   : > { %469 = vmatpush.bf16.msra.mxu0 %v653_v45  ;;  %482 = vmatpush.bf16.msra.mxu1 %v657_v47 }
  0x38   : > { %470 = vmatpush.bf16.msra.mxu0 %v645_v51  ;;  %483 = vmatpush.bf16.msra.mxu1 %v649_v55 }
  0x3c   : > { %471 = vmatpush.bf16.msra.mxu0 %v637_v58  ;;  %484 = vmatpush.bf16.msra.mxu1 %v641_v59 }
  0x95   : > { %v327_v14 = vpop.xlane.xlu0 %326 }
  0x96   : > { %v335_v15 = vmul.f32 %v1063_v13, %v327_v14  ;;  %v381_v14 = vperm.slane %v378_v12, 1 }
  0x98   : > { %v1066_v16 = vsub.f32 %v323_v0, %v335_v15 }
  0x9a   : > { %v337_v17 = vmul.f32 %v1066_v16, %v1066_v16 }
  0x9c   : > { %338 = vadd.xlane.f32.xlu0 %v337_v17 }
 0x10f   : > { %v339_v60 = vpop.xlane.xlu0 %338 }
 0x110   : > { %v340_v61 = vmul.f32 %v339_v60, %v1063_v13  ;;  %v380_v13 = vperm.slane %v378_v12, 0 }
 0x112   : > { %v341_v62 = vadd.f32 1e-05, %v340_v61 }
 0x114   : > { %789 = vrsqrt.f32 %v341_v62  ;;  %vm348_vm2 = vweird.f32 %v341_v62 }
 0x11a   : > { %v790_v63 = vpop.eup %789 }
 0x11b   : > { %v343_v0 = vmul.f32 %v790_v63, %v341_v62  ;;  %vm349_vm1 = vweird.f32 %v790_v63 }
 0x11c   : > { %vm350_vm3 = vmor %vm348_vm2, %vm349_vm1 }
 0x11d   : > { %v344_v1 = vmul.f32 %v790_v63, %v343_v0 }
 0x11f   : > { %v345_v2 = vmul.f32 0.5, %v344_v1 }
 0x121   : > { %v346_v3 = vsub.f32 1.5, %v345_v2 }
 0x123   : > { %v347_v4 = vmul.f32 %v790_v63, %v346_v3 }
 0x125   : > { %v351_v6 = vsel %vm350_vm3, %v790_v63, %v347_v4 }
 0x126   : > { %v352_v7 = vmul.f32 %v351_v6, %v1066_v16 }
 0x128   : > { %v356_v9 = vmul.f32 %v785_v5, %v352_v7 }
 0x12a   : > { %v360_v10 = vadd.f32 %v786_v8, %v356_v9 }
 0x12c   : > { %v361_v11 = vpack.c.bf16 %v360_v10, %v360_v10 }
 0x12e   : > { %472 = vmatmul.bf16.vlgmr.msra.gmra.mxu0 %v361_v11  ;;  %485 = vmatmul.bf16.vlgmr.msra.gmra.mxu1 %v361_v11 }
 0x1ab   : > { %v473_v15 = vpop.f32.mrf.mxu0  ;;  %v486_v17 = vpop.f32.mrf.mxu1 }
 0x1ac   : > { %v474_v18 = vadd.f32 %v473_v15, %v380_v13  ;;  %v487_v19 = vadd.f32 %v486_v17, %v381_v14 }
 0x1ae   : > { %490 = vst [vmem:[%s321_s9] sm:$0xff] %v474_v18 }
 0x1af   : > { %491 = vst [vmem:[%s321_s9 + $0x8] sm:$0xff] %v487_v19 }
 0x1b3   : > { %v475_v16 = vpop.f32.mrf.mxu0  ;;  %v488_v20 = vpop.f32.mrf.mxu1 }
 0x1b4 PF: > { %s18_s20 = sadd.s32 1, %s945_s20   ;;  %s1094_s18 = smov %s941_s19 }
 0x1b5   : > { %p15_p8 = scmp.ge.s32.totalorder %s18_s20, 4   ;;  %s1095_s19 = smov %s1097_s30 }
 0x1b7   :  { %17 = sbr.rel (!%p15_p8) target bundleno = 4 (0x4), region = 89 }
 0x1bc   :  { %522 = vsyncpa [#allocation3], 1 }
 0x1bd   :  { %524 = vsyncpa [#allocation3 + $0x1], 1 }
 0x1be   :  { %525 = vsyncpa [#allocation5], 1 }
 0x1bf   :  { %526 = vsyncpa [#allocation8], 1 }

// kernel: transformer_forward.12
= control target key start
LH: loop header
LB: loop body
LE: loop exit
PB: predicated region body
PF: predicated region fallthrough
CT: control target
= control target key end

     0   :  { %12 = vsyncpa [#allocation3], 0  ;;  %s1707_s0 = inlined_call_operand.vmem [shape: f32[2,8,128], index: 0, kind: input, shape index: {}]   ;;  %s1708_s1 = inlined_call_operand.hbm [shape: bf16[128,384], index: 1, kind: input, shape index: {}]   ;;  %s1709_s2 = inlined_call_operand.vmem [shape: f32[1,384], index: 2, kind: input, shape index: {}]   ;;  %s1710_s3 = inlined_call_operand.hbm [shape: bf16[128,128], index: 3, kind: input, shape index: {}]   ;;  %s1711_s4 = inlined_call_operand.hbm [shape: f32[1,128], index: 4, kind: input, shape index: {}]   ;;  %s1712_s5 = inlined_call_operand.hbm [shape: f32[1,128], index: 5, kind: input, shape index: {}]   ;;  %s1713_s6 = inlined_call_operand.hbm [shape: f32[1,128], index: 6, kind: input, shape index: {}]   ;;  %s1714_s7 = inlined_call_operand.vmem [shape: f32[2,8,128], index: 7, kind: output, shape index: {}]  }
   0x1   :  { %13 = vsyncpa [#allocation5], 0 }
   0x2   :  { %14 = vsyncpa [#allocation8], 0  ;;  %s1574_s24 = smov 0  }
   0x3 LB: > { %s231_s27 = sshll.u32 %s1710_s3, 4  ;;  %s1583_s28 = sadd.s32 4294967295, %s1519_s24   ;;  %s1519_s24 = sphi %s1574_s24, %s20_s24   ;;  %s232_s27 = int_to_ptr.hbm [resolvable:$true] %s231_s27 }
   0x4   : > { %p1072_p0 = scmp.ge.s32.totalorder %s1519_s24, 1  ;;  %p203_p1 = scmp.lt.s32.totalorder %s1519_s24, 3 }
   0x5   : > { %p1297_p2 = scmp.eq.s32.totalorder %s1583_s28, 0  ;;  %s1521_s30 = smov [#allocation4]  }
   0x6   : > { %p1588_p3 = pnand %p1072_p0, %p203_p1  ;;  %s233_s8 = sshll.u32 %s1521_s30, 4  ;;  %s234_s8 = int_to_ptr.vmem [resolvable:$true] %s233_s8 }
   0x7   : > { %s258_s11 = sshll.u32 %s1712_s5, 4  ;;  %s1522_s13 = smov [#allocation7]   ;;  %s259_s11 = int_to_ptr.hbm [resolvable:$true] %s258_s11 }
   0x8   : > { %p1281_p4 = pneg %p1588_p3  ;;  %s260_s14 = sshll.u32 %s1522_s13, 4  ;;  %s261_s14 = int_to_ptr.vmem [resolvable:$true] %s260_s14 }
   0x9   : > { %s214_s17 = sshll.u32 %s1708_s1, 4  ;;  %s1523_s18 = smov 64   ;;  %s215_s17 = int_to_ptr.hbm [resolvable:$true] %s214_s17 }
   0xa   : > { %p1599_p5 = pnand %p1297_p2, %p1281_p4  ;;  %s1524_s19 = smov 4  }
   0xb   : > { %s1525_s20 = smov [#allocation2]   ;;  %s1526_s22 = smov 192  }
   0xc   : > { %1287 = dma.hbm_to_vmem [thread:$0]  (!%p1599_p5), %s232_s27, 1024, %s234_s8, [#allocation5], %s1523_s18, %s1523_s18, %s1524_s19  }
   0xd   : > { %1293 = dma.hbm_to_vmem [thread:$0]  (!%p1599_p5), %s259_s11, 16, %s261_s14, [#allocation8]  }
   0xe   : > { %s216_s21 = sshll.u32 %s1525_s20, 4  ;;  %s1527_s23 = smov 12   ;;  %s217_s21 = int_to_ptr.vmem [resolvable:$true] %s216_s21 }
   0xf   : > { %1284 = dma.hbm_to_vmem [thread:$0]  (!%p1599_p5), %s215_s17, 3072, %s217_s21, [#allocation3], %s1526_s22, %s1526_s22, %s1527_s23  }
  0x10   : > { %s246_s30 = sshll.u32 %s1711_s4, 4  ;;  %s1528_s9 = smov [#allocation6]   ;;  %s247_s30 = int_to_ptr.hbm [resolvable:$true] %s246_s30 }
  0x11   : > { %s248_s10 = sshll.u32 %s1528_s9, 4  ;;  %s270_s11 = sshll.u32 %s1713_s6, 4  ;;  %s249_s10 = int_to_ptr.vmem [resolvable:$true] %s248_s10  ;;  %s271_s11 = int_to_ptr.hbm [resolvable:$true] %s270_s11 }
  0x12   : > { %1290 = dma.hbm_to_vmem [thread:$0]  (!%p1599_p5), %s247_s30, 16, %s249_s10, [#allocation5]  }
  0x13   : > { %s1529_s13 = smov [#allocation9]   ;;  %292 = sbr.rel (%p1588_p3) target bundleno = 1425 (0x591), region = 48 }
  0x14   : > { %s272_s14 = sshll.u32 %s1529_s13, 4  ;;  %s273_s14 = int_to_ptr.vmem [resolvable:$true] %s272_s14 }
  0x15   : > { %1296 = dma.hbm_to_vmem [thread:$0]  (!%p1599_p5), %s271_s11, 16, %s273_s14, [#allocation8]  }
  0x18   : > { %1506 = dma.done.wait (%p1297_p2), [#allocation3], 3072  }
  0x19   : > { %1508 = vsyncadd (%p1297_p2), [#allocation3], 4294964224 }
  0x1a   : > { %1510 = dma.done.wait (%p1297_p2), [#allocation5], 1040  }
  0x1b   : > { %1512 = vsyncadd (%p1297_p2), [#allocation5], 4294966256 }
  0x1c   : > { %1514 = dma.done.wait (%p1297_p2), [#allocation8], 32  }
  0x1d   : > { %1516 = vsyncadd (%p1297_p2), [#allocation8], 4294967264  ;;  %v1173_v0 = vld [vmem:[#allocation2 + $0xa8] sm:$0xf]  ;;  %v1251_v1 = vld [vmem:[#allocation2 + $0xb0] sm:$0xf0] }
  0x1e   : > { %v1250_v2 = vld [vmem:[#allocation2 + $0xac] sm:$0xf]  ;;  %v1174_v3 = vor.u32 %v1251_v1, %v1173_v0  ;;  %v1175_v4 = vld [vmem:[#allocation2 + $0xb4] sm:$0xf0]  ;;  %v1161_v5 = vld [vmem:[#allocation2 + $0x90] sm:$0xf] }
  0x1f   : > { %v1248_v6 = vld [vmem:[#allocation2 + $0x98] sm:$0xf0]  ;;  %v1178_v7 = vor.u32 %v1250_v2, %v1175_v4  ;;  %v1247_v8 = vld [vmem:[#allocation2 + $0x94] sm:$0xf]  ;;  %v1163_v9 = vld [vmem:[#allocation2 + $0x9c] sm:$0xf0] }
  0x20   : > { %522 = vmatpush.bf16.msra.mxu0 %v1174_v3  ;;  %v1162_v10 = vor.u32 %v1248_v6, %v1161_v5  ;;  %v1166_v11 = vor.u32 %v1247_v8, %v1163_v9  ;;  %v1149_v12 = vld [vmem:[#allocation2 + $0x78] sm:$0xf]  ;;  %v1245_v13 = vld [vmem:[#allocation2 + $0x80] sm:$0xf0]  ;;  %v1244_v14 = vld [vmem:[#allocation2 + $0x7c] sm:$0xf] }
  0x21   : > { %535 = vmatpush.bf16.msra.mxu1 %v1178_v7  ;;  %v1151_v15 = vld [vmem:[#allocation2 + $0x84] sm:$0xf0]  ;;  %v1150_v16 = vor.u32 %v1245_v13, %v1149_v12  ;;  %v1137_v18 = vld [vmem:[#allocation2 + $0x60] sm:$0xf]  ;;  %v1242_v19 = vld [vmem:[#allocation2 + $0x68] sm:$0xf0] }
  0x22   : > { %v1154_v17 = vor.u32 %v1244_v14, %v1151_v15  ;;  %v1241_v20 = vld [vmem:[#allocation2 + $0x64] sm:$0xf]  ;;  %v1139_v21 = vld [vmem:[#allocation2 + $0x6c] sm:$0xf0]  ;;  %p343_p6 = scmp.lt.s32.totalorder %s1583_s28, 1  ;;  %v1138_v22 = vor.u32 %v1242_v19, %v1137_v18  ;;  %vm581_vm0 = vcmask 261120  }
  0x23   : > { %v1181_v23 = vld [vmem:[#allocation2 + $0xb0] sm:$0xf]  ;;  %v1252_v24 = vld [vmem:[#allocation2 + $0xb8] sm:$0xf0]  ;;  %v1169_v25 = vld [vmem:[#allocation2 + $0x98] sm:$0xf]  ;;  %v1142_v26 = vor.u32 %v1241_v20, %v1139_v21 }
  0x24   : > { %523 = vmatpush.bf16.msra.mxu0 %v1162_v10  ;;  %v1125_v27 = vld [vmem:[#allocation2 + $0x48] sm:$0xf]  ;;  %v1239_v28 = vld [vmem:[#allocation2 + $0x50] sm:$0xf0]  ;;  %v1182_v29 = vor.u32 %v1252_v24, %v1181_v23  ;;  %v1249_v30 = vld [vmem:[#allocation2 + $0xa0] sm:$0xf0] }
  0x25   : > { %536 = vmatpush.bf16.msra.mxu1 %v1166_v11  ;;  %v1238_v31 = vld [vmem:[#allocation2 + $0x4c] sm:$0xf]  ;;  %v1127_v32 = vld [vmem:[#allocation2 + $0x54] sm:$0xf0]  ;;  %s1718_s28 = smov (!%p343_p6, %s1583_s28), 1  ;;  %v1170_v33 = vor.u32 %v1249_v30, %v1169_v25  ;;  %v1126_v34 = vor.u32 %v1239_v28, %v1125_v27  ;;  %s1530_s19 = smov 32  }
  0x26   : > { %548 = vmatpush.bf16.msra.mxu2 %v1182_v29  ;;  %v1113_v35 = vld [vmem:[#allocation2 + $0x30] sm:$0xf]  ;;  %v1157_v36 = vld [vmem:[#allocation2 + $0x80] sm:$0xf]  ;;  %v1246_v37 = vld [vmem:[#allocation2 + $0x88] sm:$0xf0]  ;;  %v1130_v38 = vor.u32 %v1238_v31, %v1127_v32 }
  0x27   : > { %v1236_v39 = vld [vmem:[#allocation2 + $0x38] sm:$0xf0]  ;;  %v1235_v40 = vld [vmem:[#allocation2 + $0x34] sm:$0xf]  ;;  %v1115_v41 = vld [vmem:[#allocation2 + $0x3c] sm:$0xf0]  ;;  %v1158_v42 = vor.u32 %v1246_v37, %v1157_v36 }
  0x28   : > { %524 = vmatpush.bf16.msra.mxu0 %v1150_v16  ;;  %v1114_v43 = vor.u32 %v1236_v39, %v1113_v35  ;;  %v1145_v44 = vld [vmem:[#allocation2 + $0x68] sm:$0xf]  ;;  %v1243_v45 = vld [vmem:[#allocation2 + $0x70] sm:$0xf0]  ;;  %v1118_v46 = vor.u32 %v1235_v40, %v1115_v41  ;;  %v1101_v47 = vld [vmem:[#allocation2 + $0x18] sm:$0xf] }
  0x29   : > { %537 = vmatpush.bf16.msra.mxu1 %v1154_v17  ;;  %v1233_v48 = vld [vmem:[#allocation2 + $0x20] sm:$0xf0]  ;;  %v1232_v49 = vld [vmem:[#allocation2 + $0x1c] sm:$0xf]  ;;  %v1103_v50 = vld [vmem:[#allocation2 + $0x24] sm:$0xf0]  ;;  %v1146_v51 = vor.u32 %v1243_v45, %v1145_v44 }
  0x2a   : > { %549 = vmatpush.bf16.msra.mxu2 %v1170_v33  ;;  %s1085_s29 = sshll.u32 %s1718_s28, 3  ;;  %v1102_v52 = vor.u32 %v1233_v48, %v1101_v47  ;;  %v1133_v53 = vld [vmem:[#allocation2 + $0x50] sm:$0xf]  ;;  %v1240_v54 = vld [vmem:[#allocation2 + $0x58] sm:$0xf0]  ;;  %v1106_v55 = vor.u32 %v1232_v49, %v1103_v50  ;;  %v1254_v10 = vld [vmem:[#allocation4 + $0x8] sm:$0xff] }
  0x2b   : > { %v1089_v56 = vld [vmem:[#allocation2] sm:$0xf]  ;;  %v1230_v57 = vld [vmem:[#allocation2 + $0x8] sm:$0xf0]  ;;  %s346_s16 = scalar_lea.vmem %s1707_s0, %s1085_s29  ;;  %v1229_v58 = vld [vmem:[#allocation2 + $0x4] sm:$0xf]  ;;  %v1134_v60 = vor.u32 %v1240_v54, %v1133_v53  ;;  %s350_s25 = scalar_lea.vmem %s1714_s7, %s1085_s29 }
  0x2c   : > { %525 = vmatpush.bf16.msra.mxu0 %v1138_v22  ;;  %v1091_v59 = vld [vmem:[#allocation2 + $0xc] sm:$0xf0]  ;;  %v1090_v61 = vor.u32 %v1230_v57, %v1089_v56  ;;  %v1648_v62 = vld [vmem:[%s346_s16] sm:$0xff]  ;;  %v1121_v63 = vld [vmem:[#allocation2 + $0x38] sm:$0xf]  ;;  %s1531_s20 = smov 96  }
  0x2d   : > { %538 = vmatpush.bf16.msra.mxu1 %v1142_v26  ;;  %v1237_v0 = vld [vmem:[#allocation2 + $0x40] sm:$0xf0]  ;;  %v1094_v1 = vor.u32 %v1229_v58, %v1091_v59  ;;  %v353_v2 = vpack.c.bf16 %v1648_v62, %v1648_v62  ;;  %v1109_v4 = vld [vmem:[#allocation2 + $0x20] sm:$0xf]  ;;  %v1234_v5 = vld [vmem:[#allocation2 + $0x28] sm:$0xf0] }
  0x2e   : > { %550 = vmatpush.bf16.msra.mxu2 %v1158_v42  ;;  %v1122_v3 = vor.u32 %v1237_v0, %v1121_v63  ;;  %v1110_v6 = vor.u32 %v1234_v5, %v1109_v4  ;;  %v1097_v7 = vld [vmem:[#allocation2 + $0x8] sm:$0xf]  ;;  %v1231_v8 = vld [vmem:[#allocation2 + $0x10] sm:$0xf0]  ;;  %v386_v11 = vld [vmem:[%s1709_s2] sm:$0x7] }
  0x2f   : > { %v1098_v9 = vor.u32 %v1231_v8, %v1097_v7  ;;  %v388_v12 = vperm.slane %v386_v11, 0  ;;  %v389_v13 = vperm.slane %v386_v11, 1  ;;  %s1532_s21 = smov 64   ;;  %v1253_v24 = vld [vmem:[#allocation4] sm:$0xff]  ;;  %v390_v25 = vperm.slane %v386_v11, 2 }
  0x30   : > { %526 = vmatpush.bf16.msra.mxu0 %v1126_v34  ;;  %vm615_vm1 = vcmask 1043456   ;;  %vm601_vm2 = vcmask 64512  }
  0x31   : > { %539 = vmatpush.bf16.msra.mxu1 %v1130_v38 }
  0x32   : > { %551 = vmatpush.bf16.msra.mxu2 %v1146_v51 }
  0x34   : > { %527 = vmatpush.bf16.msra.mxu0 %v1114_v43 }
  0x35   : > { %540 = vmatpush.bf16.msra.mxu1 %v1118_v46 }
  0x36   : > { %552 = vmatpush.bf16.msra.mxu2 %v1134_v60 }
  0x38   : > { %528 = vmatpush.bf16.msra.mxu0 %v1102_v52 }
  0x39   : > { %541 = vmatpush.bf16.msra.mxu1 %v1106_v55 }
  0x3a   : > { %553 = vmatpush.bf16.msra.mxu2 %v1122_v3 }
  0x3c   : > { %529 = vmatpush.bf16.msra.mxu0 %v1090_v61 }
  0x3d   : > { %542 = vmatpush.bf16.msra.mxu1 %v1094_v1 }
  0x3e   : > { %554 = vmatpush.bf16.msra.mxu2 %v1110_v6 }
  0x3f   : > { %530 = vmatmul.bf16.vlgmr.msra.gmra.mxu0 %v353_v2 }
  0x40   : > { %543 = vmatmul.bf16.vlgmr.msra.gmra.mxu1 %v353_v2 }
  0x42   : > { %555 = vmatpush.bf16.msra.mxu2 %v1098_v9 }
  0x45   : > { %556 = vmatmul.bf16.vlgmr.msra.gmra.mxu2 %v353_v2 }
  0x46   : > { %744 = vmatpush.bf16.msrb.mxu2 %v1254_v10 }
  0x4a   : > { %745 = vmatpush.bf16.msrb.mxu2 %v1253_v24 }
  0xbc   : > { %v531_v14 = vpop.f32.mrf.mxu0 }
  0xbd   : > { %v544_v15 = vpop.f32.mrf.mxu1  ;;  %v532_v16 = vadd.f32 %v531_v14, %v388_v12 }
  0xbe   : > { %v545_v17 = vadd.f32 %v544_v15, %v389_v13 }
  0xbf   : > { %v577_v19 = vmul.f32 0.17677669, %v532_v16 }
  0xc0   : > { %v579_v18 = vpack.c.bf16 %v545_v17, %v545_v17 }
  0xc1   : > { %v578_v23 = vpack.c.bf16 %v577_v19, %v577_v19  ;;  %v1255_v19 = vld [vmem:[#allocation4 + $0x10] sm:$0xff] }
  0xc2   : > { %839 = vrot.lane.b32.xlu2 %v579_v18, %s1530_s19  ;;  %639 = vrot.lane.b32.xlu1 %v579_v18, %s1531_s20  ;;  %v586_v20 = vsel %vm581_vm0, %v579_v18, 0 }
  0xc3   : > { %595 = vmatpush.bf16.xpose.msra.mxu3 %v586_v20 }
  0xc4   : > { %v533_v21 = vpop.f32.mrf.mxu0 }
  0xc5   : > { %v546_v22 = vpop.f32.mrf.mxu1 }
  0xc8   : > { %v557_v26 = vpop.f32.mrf.mxu2 }
  0xc9   : > { %v558_v27 = vadd.f32 %v557_v26, %v390_v25 }
  0xca   : > { %753 = vrot.lane.b32.xlu2 %v579_v18, %s1532_s21  ;;  %636 = vrot.lane.b32.xlu1 %v578_v23, %s1531_s20  ;;  %v1256_v18 = vld [vmem:[#allocation4 + $0x18] sm:$0xff] }
  0xcb   : > { %1183 = vmatmul.msk.bf16.vlgmr.msra.gmra.mxu3 %vm581_vm0, %v578_v23  ;;  %v1660_v28 = vpack.c.bf16 %v558_v27, %v558_v27  ;;  %716 = vmatpush.bf16.msrb.mxu1 %v1256_v18 }
  0xcd   : > { %v617_v30 = vsel %vm615_vm1, %v1660_v28, 0 }
  0xce   : > { %626 = vmatpush.bf16.msrb.mxu3 %v617_v30 }
  0xcf   : > { %717 = vmatpush.bf16.msrb.mxu1 %v1255_v19  ;;  %v1329_v19 = vld [vmem:[#allocation7] ss:$0 sm:$0xff] }
  0xd0   : > { %v559_v29 = vpop.f32.mrf.mxu2 }
  0xd2   : > { %751 = vrot.lane.b32.xlu1 %v578_v23, %s1532_s21 }
  0xda   : > { %671 = vrot.lane.b32.xlu1 %v1660_v28, %s1531_s20 }
 0x11c   : > { %v840_v31 = vpop.permute.xlu2 %839 }
 0x11d   : > { %v845_v32 = vsel %vm581_vm0, %v840_v31, 0 }
 0x11e   : > { %854 = vmatpush.bf16.xpose.msra.mxu2 %v845_v32 }
 0x124   : > { %v754_v44 = vpop.permute.xlu2 %753 }
 0x125   : > { %v759_v47 = vsel %vm581_vm0, %v754_v44, 0 }
 0x134   : > { %v640_v33 = vpop.permute.xlu1 %639 }
 0x135   : > { %v645_v34 = vsel %vm581_vm0, %v640_v33, 0 }
 0x136   : > { %654 = vmatpush.bf16.xpose.msra.mxu3 %v645_v34 }
 0x13c   : > { %v637_v38 = vpop.permute.xlu1 %636 }
 0x144   : > { %v752_v42 = vpop.permute.xlu1 %751 }
 0x14c   : > { %v672_v48 = vpop.permute.xlu1 %671 }
 0x14d   : > { %v677_v49 = vsel %vm615_vm1, %v672_v48, 0 }
 0x14e   : > { %v597_v35 = vpop.f32.mrf.mxu3  ;;  %686 = vmatpush.bf16.msrb.mxu0 %v677_v49 }
 0x14f   : > { %v602_v36 = vsel %vm601_vm2, %v597_v35, -inf }
 0x150   : > { %603 = vmax.xlane.f32.xlu0 %v602_v36  ;;  %v1259_v36 = vld [vmem:[#allocation4 + $0x30] sm:$0xff] }
 0x156   : > { %v599_v37 = vpop.f32.mrf.mxu3 }
 0x157   : > { %v1258_v37 = vld [vmem:[#allocation4 + $0x28] sm:$0xff] }
 0x158   : > { %829 = vmatpush.bf16.msra.mxu1 %v1258_v37 }
 0x1c3   : > { %v604_v39 = vpop.xlane.xlu0 %603 }
 0x1c4   : > { %v605_v40 = vsub.f32 %v597_v35, %v604_v39  ;;  %v1260_v35 = vld [vmem:[#allocation4 + $0x38] sm:$0xff] }
 0x1c6   : > { %v606_v41 = vmul.f32 1.442695, %v605_v40 }
 0x1c8   : > { %1331 = vpow2.f32 %v606_v41 }
 0x1ce   : > { %v1332_v43 = vpop.eup %1331 }
 0x1cf   : > { %v608_v45 = vsel %vm601_vm2, %v1332_v43, 0.0  ;;  %v611_v46 = vpack.c.bf16 %v1332_v43, %v1332_v43 }
 0x1d0   : > { %609 = vadd.xlane.f32.xlu0 %v608_v45 }
 0x1d1   : > { %1184 = vmatmul.msk.bf16.vlgmr.msrb.gmra.mxu3 %vm601_vm2, %v611_v46 }
 0x1d2   : > { %768 = vmatpush.bf16.xpose.msrb.mxu3 %v759_v47 }
 0x1e1   : > { %1185 = vmatmul.msk.bf16.vlgmr.msra.gmra.mxu3 %vm581_vm0, %v637_v38  ;;  %v1257_v38 = vld [vmem:[#allocation4 + $0x20] sm:$0xff] }
 0x1e2   : > { %830 = vmatpush.bf16.msra.mxu1 %v1257_v38 }
 0x1e4   : > { %837 = vrot.lane.b32.xlu0 %v578_v23, %s1530_s19 }
 0x1f1   : > { %1205 = vmatmul.msk.bf16.vlgmr.msrb.gmra.mxu3 %vm581_vm0, %v752_v42 }
 0x243   : > { %v610_v50 = vpop.xlane.xlu0 %609 }
 0x244   : > { %1333 = vrcp.f32 %v610_v50 }
 0x24a   : > { %v1334_v51 = vpop.eup %1333 }
 0x254   : > { %v628_v52 = vpop.f32.mrf.mxu3 }
 0x255   : > { %v633_v53 = vmul.f32 %v1334_v51, %v628_v52 }
 0x256   : > { %v838_v58 = vpop.permute.xlu0 %837 }
 0x257   : > { %v634_v54 = vpack.c.bf16 %v633_v53, %v633_v53 }
 0x259   : > { %1204 = vmatmul.msk.bf16.vlgmr.msrb.gmra.mxu2 %vm581_vm0, %v634_v54 }
 0x25c   : > { %v630_v55 = vpop.f32.mrf.mxu3 }
 0x264   : > { %v656_v56 = vpop.f32.mrf.mxu3 }
 0x265   : > { %v660_v57 = vsel %vm601_vm2, %v656_v56, -inf }
 0x266   : > { %661 = vmax.xlane.f32.xlu2 %v660_v57 }
 0x269   : > { %1216 = vmatmul.msk.bf16.vlgmr.msra.gmra.mxu2 %vm581_vm0, %v838_v58 }
 0x26c   : > { %v658_v59 = vpop.f32.mrf.mxu3 }
 0x26d   : > { %v1328_v59 = vld [vmem:[#allocation6] ss:$0 sm:$0xff] }
 0x274   : > { %v770_v60 = vpop.f32.mrf.mxu3 }
 0x275   : > { %v774_v61 = vsel %vm601_vm2, %v770_v60, -inf }
 0x276   : > { %775 = vmax.xlane.f32.xlu0 %v774_v61 }
 0x27c   : > { %v772_v63 = vpop.f32.mrf.mxu3 }
 0x27e   : > { %870 = vrot.lane.b32.xlu2 %v1660_v28, %s1530_s19 }
 0x2d9   : > { %v662_v0 = vpop.xlane.xlu2 %661 }
 0x2da   : > { %v663_v1 = vsub.f32 %v656_v56, %v662_v0  ;;  %v1533_v0 = vmov 128.0  }
 0x2dc   : > { %v664_v2 = vmul.f32 1.442695, %v663_v1  ;;  %v1681_v3 = vpop.f32.mrf.mxu2 }
 0x2de   : > { %1335 = vpow2.f32 %v664_v2 }
 0x2e1   : > { %v871_v4 = vpop.permute.xlu2 %870 }
 0x2e2   : > { %v876_v5 = vsel %vm615_vm1, %v871_v4, 0 }
 0x2e3   : > { %885 = vmatpush.bf16.msra.mxu3 %v876_v5 }
 0x2e4   : > { %v1336_v6 = vpop.eup %1335  ;;  %v749_v7 = vpop.f32.mrf.mxu2 }
 0x2e5   : > { %v666_v8 = vsel %vm601_vm2, %v1336_v6, 0.0  ;;  %v669_v9 = vpack.c.bf16 %v1336_v6, %v1336_v6 }
 0x2e6   : > { %667 = vadd.xlane.f32.xlu0 %v666_v8 }
 0x2e7   : > { %1186 = vmatmul.msk.bf16.vlgmr.msrb.gmra.mxu0 %vm601_vm2, %v669_v9 }
 0x2e9   : > { %v776_v10 = vpop.xlane.xlu0 %775 }
 0x2ea   : > { %v777_v11 = vsub.f32 %v770_v60, %v776_v10 }
 0x2ec   : > { %v778_v12 = vmul.f32 1.442695, %v777_v11  ;;  %v856_v13 = vpop.f32.mrf.mxu2 }
 0x2ed   : > { %v860_v14 = vsel %vm601_vm2, %v856_v13, -inf }
 0x2ee   : > { %1337 = vpow2.f32 %v778_v12  ;;  %861 = vmax.xlane.f32.xlu1 %v860_v14 }
 0x2f4   : > { %v1338_v15 = vpop.eup %1337  ;;  %v858_v16 = vpop.f32.mrf.mxu2 }
 0x2f5   : > { %v780_v17 = vsel %vm601_vm2, %v1338_v15, 0.0  ;;  %v783_v34 = vpack.c.bf16 %v1338_v15, %v1338_v15 }
 0x2f6   : > { %781 = vadd.xlane.f32.xlu2 %v780_v17 }
 0x307   : > { %784 = vrot.lane.b32.xlu1 %v1660_v28, %s1532_s21 }
 0x359   : > { %v668_v20 = vpop.xlane.xlu0 %667 }
 0x35a   : > { %1339 = vrcp.f32 %v668_v20 }
 0x360   : > { %v1340_v23 = vpop.eup %1339 }
 0x361   : > { %v862_v21 = vpop.xlane.xlu1 %861 }
 0x362   : > { %v863_v22 = vsub.f32 %v856_v13, %v862_v21  ;;  %v1330_v21 = vld [vmem:[#allocation9] ss:$0 sm:$0xff] }
 0x364   : > { %v864_v24 = vmul.f32 1.442695, %v863_v22  ;;  %v688_v25 = vpop.f32.mrf.mxu0 }
 0x365   : > { %v693_v26 = vmul.f32 %v1340_v23, %v688_v25 }
 0x366   : > { %1341 = vpow2.f32 %v864_v24 }
 0x367   : > { %v694_v27 = vpack.c.bf16 %v693_v26, %v693_v26 }
 0x369   : > { %1195 = vmatmul.msk.bf16.vlgmr.msrb.gmra.mxu1 %vm581_vm0, %v694_v27  ;;  %v782_v43 = vpop.xlane.xlu2 %781 }
 0x36c   : > { %v1342_v29 = vpop.eup %1341  ;;  %v690_v30 = vpop.f32.mrf.mxu0 }
 0x36d   : > { %v869_v31 = vpack.c.bf16 %v1342_v29, %v1342_v29  ;;  %v866_v28 = vsel %vm601_vm2, %v1342_v29, 0.0 }
 0x36e   : > { %867 = vadd.xlane.f32.xlu0 %v866_v28 }
 0x36f   : > { %1217 = vmatmul.msk.bf16.vlgmr.msra.gmra.mxu3 %vm601_vm2, %v869_v31 }
 0x379   : > { %v785_v32 = vpop.permute.xlu1 %784 }
 0x37a   : > { %v790_v33 = vsel %vm615_vm1, %v785_v32, 0 }
 0x37b   : > { %799 = vmatpush.bf16.msra.mxu0 %v790_v33 }
 0x37e   : > { %1206 = vmatmul.msk.bf16.vlgmr.msra.gmra.mxu0 %vm601_vm2, %v783_v34 }
 0x37f   : > { %915 = vmatpush.bf16.msrb.mxu0 %v1260_v35 }
 0x383   : > { %916 = vmatpush.bf16.msrb.mxu0 %v1259_v36 }
 0x3e1   : > { %v868_v40 = vpop.xlane.xlu0 %867 }
 0x3e2   : > { %1343 = vrcp.f32 %v868_v40 }
 0x3e3   : > { %1345 = vrcp.f32 %v782_v43 }
 0x3e4   : > { %1347 = vrcp.f32 %v1533_v0 }
 0x3e6   : > { %v719_v39 = vpop.f32.mrf.mxu1 }
 0x3e7   : > { %v748_v54 = vadd.f32 %v1681_v3, %v719_v39 }
 0x3e8   : > { %v1344_v42 = vpop.eup %1343 }
 0x3e9   : > { %v1346_v48 = vpop.eup %1345 }
 0x3ea   : > { %v1348_v1 = vpop.eup %1347 }
 0x3eb   : > { %v934_v2 = vmul.f32 128.0, %v1348_v1  ;;  %vm938_vm3 = vweird.f32 %v1348_v1 }
 0x3ed   : > { %v935_v4 = vsub.f32 1.0, %v934_v2 }
 0x3ee   : > { %v721_v41 = vpop.f32.mrf.mxu1 }
 0x3ef   : > { %v936_v5 = vmul.f32 %v1348_v1, %v935_v4 }
 0x3f1   : > { %v937_v6 = vadd.f32 %v1348_v1, %v936_v5 }
 0x3f2   : > { %v887_v44 = vpop.f32.mrf.mxu3 }
 0x3f3   : > { %v892_v45 = vmul.f32 %v1344_v42, %v887_v44  ;;  %v939_v7 = vsel %vm938_vm3, %v1348_v1, %v937_v6 }
 0x3f5   : > { %v893_v46 = vpack.c.bf16 %v892_v45, %v892_v45 }
 0x3f7   : > { %1226 = vmatmul.msk.bf16.vlgmr.msrb.gmra.mxu0 %vm581_vm0, %v893_v46 }
 0x3fa   : > { %v889_v47 = vpop.f32.mrf.mxu3 }
 0x3fb   : > { %v801_v49 = vpop.f32.mrf.mxu0 }
 0x3fc   : > { %v806_v50 = vmul.f32 %v1346_v48, %v801_v49 }
 0x3fe   : > { %v807_v51 = vpack.c.bf16 %v806_v50, %v806_v50 }
 0x400   : > { %1215 = vmatmul.msk.bf16.vlgmr.msra.gmra.mxu1 %vm581_vm0, %v807_v51 }
 0x403   : > { %v803_v52 = vpop.f32.mrf.mxu0 }
 0x474   : > { %v918_v53 = vpop.f32.mrf.mxu0 }
 0x47c   : > { %v920_v55 = vpop.f32.mrf.mxu0 }
 0x47d   : > { %v832_v56 = vpop.f32.mrf.mxu1 }
 0x47e   : > { %v836_v57 = vadd.f32 %v832_v56, %v748_v54 }
 0x480   : > { %v922_v58 = vadd.f32 %v918_v53, %v836_v57 }
 0x482   : > { %v923_v60 = vadd.f32 %v922_v58, %v1648_v62 }
 0x484   : > { %v928_v61 = vadd.f32 %v1328_v59, %v923_v60 }
 0x485   : > { %v834_v63 = vpop.f32.mrf.mxu1 }
 0x486   : > { %931 = vadd.xlane.f32.xlu0 %v928_v61 }
 0x4f9   : > { %v932_v3 = vpop.xlane.xlu0 %931 }
 0x4fa   : > { %v940_v8 = vmul.f32 %v939_v7, %v932_v3 }
 0x4fc   : > { %v941_v9 = vsub.f32 %v928_v61, %v940_v8 }
 0x4fe   : > { %v942_v10 = vmul.f32 %v941_v9, %v941_v9 }
 0x500   : > { %943 = vadd.xlane.f32.xlu1 %v942_v10 }
 0x573   : > { %v944_v11 = vpop.xlane.xlu1 %943 }
 0x574   : > { %v945_v12 = vmul.f32 %v944_v11, %v939_v7 }
 0x576   : > { %v946_v62 = vadd.f32 1e-05, %v945_v12 }
 0x578   : > { %1349 = vrsqrt.f32 %v946_v62  ;;  %vm953_vm5 = vweird.f32 %v946_v62 }
 0x57e   : > { %v1350_v13 = vpop.eup %1349 }
 0x57f   : > { %v948_v14 = vmul.f32 %v1350_v13, %v946_v62  ;;  %vm954_vm4 = vweird.f32 %v1350_v13 }
 0x580   : > { %vm955_vm6 = vmor %vm953_vm5, %vm954_vm4 }
 0x581   : > { %v949_v15 = vmul.f32 %v1350_v13, %v948_v14 }
 0x583   : > { %v950_v16 = vmul.f32 0.5, %v949_v15 }
 0x585   : > { %v951_v17 = vsub.f32 1.5, %v950_v16 }
 0x587   : > { %v952_v18 = vmul.f32 %v1350_v13, %v951_v17 }
 0x589   : > { %v956_v20 = vsel %vm955_vm6, %v1350_v13, %v952_v18 }
 0x58a   : > { %v957_v22 = vmul.f32 %v956_v20, %v941_v9 }
 0x58c   : > { %v961_v23 = vmul.f32 %v1329_v19, %v957_v22 }
 0x58e   : > { %v965_v24 = vadd.f32 %v1330_v21, %v961_v23 }
 0x590   : > { %966 = vst [vmem:[%s350_s25] sm:$0xff] %v965_v24 }
 0x591 PF: > { %s20_s24 = sadd.s32 1, %s1519_s24  }
 0x592   : > { %p17_p7 = scmp.ge.s32.totalorder %s20_s24, 4  }
 0x594   :  { %19 = sbr.rel (!%p17_p7) target bundleno = 3 (0x3), region = 99 }
 0x599   :  { %986 = vsyncpa [#allocation3], 1 }
 0x59a   :  { %988 = vsyncpa [#allocation3 + $0x1], 1 }
 0x59b   :  { %989 = vsyncpa [#allocation5], 1 }
 0x59c   :  { %990 = vsyncpa [#allocation8], 1 }

</bundles_post_ra>
